<compile_context>
chip_gen: v7x
topology: tpu7x:2x2x1
jax: 0.10.0
libtpu: 0.0.40
codegen_flags: <defaults>
</compile_context>

<pallas_src>
import functools

import jax
import jax.numpy as jnp
from jax.experimental import pallas as pl
from jax.experimental.pallas import tpu as pltpu


# ----------------------------------------------------------------------------
# Fused kernel factory: Embedded sequence -> GRU stack -> Linear -> Sigmoid
# ----------------------------------------------------------------------------
def make_fused_gru_net_kernel(S, Bp, E, H, num_layers, bi):
    n_gru_refs = num_layers * bi * 4        # (w_ih, w_hh_cat, b_x, b_hn) per (layer, dir)
    n_levels = 2 if num_layers > 2 else 1   # ping-pong levels of activation scratch
    f32 = jnp.float32

    def kernel(*refs):
        # ---- positional ref parsing -------------------------------------
        emb_ref = refs[0]                                        # (S*Bp, E)
        gru_refs = refs[1:1 + n_gru_refs]
        w_cls_refs = refs[1 + n_gru_refs:1 + n_gru_refs + bi]    # (H, 1) each
        b_cls_ref = refs[1 + n_gru_refs + bi]                    # (1, 1)
        out_ref = refs[1 + n_gru_refs + bi + 1]                  # (Bp, 1)
        scratch = refs[1 + n_gru_refs + bi + 2:]
        act_refs = scratch[:n_levels * bi]                       # (S*Bp, H) each
        gx_refs = scratch[n_levels * bi:]                        # (S*Bp, 3H) each, one per dir

        final_h = None

        for layer in range(num_layers):
            is_last = layer == num_layers - 1
            write_level = layer % n_levels
            read_level = (layer - 1) % n_levels

            layer_p = []
            for d in range(bi):
                base = (layer * bi + d) * 4
                layer_p.append(tuple(gru_refs[base:base + 4]))

            # -- hoisted, gate-fused input-path matmul (all S timesteps, N = 3H).
            #    r/z biases (b_ih+b_hh) and b_in are pre-folded into b_x.
            for d in range(bi):
                w_ih_ref, _, b_x_ref, _ = layer_p[d]
                if layer == 0:
                    gx = jnp.dot(emb_ref[...], w_ih_ref[...],
                                 preferred_element_type=f32) + b_x_ref[...]
                else:
                    gx = b_x_ref[...]                            # (1, 3H), broadcasts
                    for s in range(bi):
                        src = act_refs[read_level * bi + s]      # (S*Bp, H)
                        gx = gx + jnp.dot(src[...], w_ih_ref[s],
                                          preferred_element_type=f32)
                gx_refs[d][...] = gx                             # (S*Bp, 3H)

            # -- interleaved fwd/bwd recurrence, one gate-fused matmul per
            #    direction per step.  S is small & static -> fully unrolled.
            whh = [layer_p[d][1][...] for d in range(bi)]        # (H, 3H)
            bhn = [layer_p[d][3][...] for d in range(bi)]        # (1, H)
            h = [jnp.zeros((Bp, H), f32) for _ in range(bi)]

            for step in range(S):
                for d in range(bi):
                    # Last layer backward: only its first step (t = S-1) feeds
                    # the classifier -> skip the remaining S-1 steps entirely.
                    if is_last and d == 1 and step > 0:
                        continue
                    t = step if d == 0 else (S - 1 - step)
                    row = t * Bp                                 # 8-aligned
                    gx_row = gx_refs[d][row:row + Bp, :]         # (Bp, 3H) aligned load
                    ghh = jnp.dot(h[d], whh[d],
                                  preferred_element_type=f32)    # (Bp, 3H) single MXU call
                    r = jax.nn.sigmoid(gx_row[:, 0:H] + ghh[:, 0:H])
                    z = jax.nn.sigmoid(gx_row[:, H:2 * H] + ghh[:, H:2 * H])
                    n = jnp.tanh(gx_row[:, 2 * H:3 * H]
                                 + r * (ghh[:, 2 * H:3 * H] + bhn[d]))
                    h_new = (1.0 - z) * n + z * h[d]
                    h[d] = h_new
                    if not is_last:
                        # Dense 8-sublane-aligned store, original time order.
                        act_refs[write_level * bi + d][row:row + Bp, :] = h_new

            if is_last:
                final_h = h

        # ---- fused classifier: Linear(bi*H -> 1) + Sigmoid on last timestep
        #      (features come straight from the held vregs, no scratch trip).
        logits = b_cls_ref[...]                                  # (1, 1) broadcast
        for d in range(bi):
            logits = logits + jnp.dot(final_h[d], w_cls_refs[d][...],
                                      preferred_element_type=f32)
        out_ref[...] = jax.nn.sigmoid(logits)

    return kernel


# ----------------------------------------------------------------------------
# Forward pass (mirrors LSTM_Net.forward, eval mode)
# ----------------------------------------------------------------------------
def lstm_net_forward(tokens, params, *, embedding_dim, hidden_dim, num_layers, bi):
    B, S = tokens.shape
    E, H = embedding_dim, hidden_dim
    Bp = ((B + 7) // 8) * 8                                 # pad batch to sublane tile

    # nn.Embedding lookup (plain JAX gather), time-major, batch padded to Bp so
    # every in-kernel row slab is (8, *)-tile aligned.
    emb = params["embedding"][tokens]                       # (B, S, E)
    emb = jnp.transpose(emb, (1, 0, 2))                     # (S, B, E)
    emb = jnp.pad(emb, ((0, 0), (0, Bp - B), (0, 0)))       # (S, Bp, E)
    emb_flat = emb.reshape(S * Bp, E)

    inputs = [emb_flat]
    for layer in range(num_layers):
        for d in range(bi):
            inputs.extend(params["gru"][(layer, d)])
    inputs.extend(params["classifier"])                     # (*w_per_dir, b)

    n_levels = 2 if num_layers > 2 else 1
    kernel = make_fused_gru_net_kernel(S, Bp, E, H, num_layers, bi)
    vmem = pltpu.MemorySpace.VMEM
    out = pl.pallas_call(
        kernel,
        out_shape=jax.ShapeDtypeStruct((Bp, 1), jnp.float32),
        in_specs=[pl.BlockSpec(memory_space=vmem) for _ in inputs],
        out_specs=pl.BlockSpec(memory_space=vmem),
        scratch_shapes=(
            [pltpu.VMEM((S * Bp, H), jnp.float32) for _ in range(n_levels * bi)]
            + [pltpu.VMEM((S * Bp, 3 * H), jnp.float32) for _ in range(bi)]),
    )(*inputs)
    return out[:B]


# ----------------------------------------------------------------------------
# Deterministic parameters in PyTorch layout (nn.Embedding / nn.GRU / nn.Linear)
# ----------------------------------------------------------------------------
def make_params(key, vocab_size, embedding_dim, hidden_dim, num_layers, bi):
    H = hidden_dim
    keys = jax.random.split(key, 64)
    ki = iter(range(64))

    params = {
        "embedding": jax.random.normal(
            keys[next(ki)], (vocab_size, embedding_dim), jnp.float32) * 0.1
    }
    scale = 1.0 / float(H) ** 0.5
    gru = {}
    for layer in range(num_layers):
        d_in = embedding_dim if layer == 0 else hidden_dim * bi
        for d in range(bi):
            w_ih = jax.random.uniform(keys[next(ki)], (3 * H, d_in), jnp.float32, -scale, scale)
            w_hh = jax.random.uniform(keys[next(ki)], (3 * H, H), jnp.float32, -scale, scale)
            b_ih = jax.random.uniform(keys[next(ki)], (3 * H,), jnp.float32, -scale, scale)
            b_hh = jax.random.uniform(keys[next(ki)], (3 * H,), jnp.float32, -scale, scale)
            gru[(layer, d)] = (w_ih, w_hh, b_ih, b_hh)
    params["gru"] = gru
    params["classifier"] = (
        jax.random.normal(keys[next(ki)], (1, hidden_dim * bi), jnp.float32) * 0.1,
        jnp.zeros((1,), jnp.float32),
    )
    return params


def prepare_kernel_params(torch_params, *, hidden_dim, num_layers, bi):
    """Transpose / gate-fuse / bias-fold PyTorch-layout weights into kernel layout.

    Per (layer, dir), gate order [r, z, n] concatenated along the OUTPUT axis:
      w_ih: layer 0 -> (E, 3H); layer > 0 -> (bi, H, 3H) split by source dir
      w_hh: (H, 3H)                          (right-multiplication: h @ W)
      b_x : (1, 3H)   r/z columns pre-folded (b_ih + b_hh); n column is b_in only
      b_hn: (1, H)    stays separate because of the r * (...) multiply
    """
    H = hidden_dim
    out = {"embedding": torch_params["embedding"], "gru": {}}
    for layer in range(num_layers):
        for d in range(bi):
            w_ih, w_hh, b_ih, b_hh = torch_params["gru"][(layer, d)]
            w_ih_t = jnp.transpose(w_ih)                     # (d_in, 3H), cols = r|z|n
            if layer == 0:
                w_ih_k = w_ih_t                              # (E, 3H)
            else:
                w_ih_k = w_ih_t.reshape(bi, H, 3 * H)        # per-source-direction blocks
            w_hh_k = jnp.transpose(w_hh)                     # (H, 3H)
            b_x = jnp.concatenate(
                [b_ih[:2 * H] + b_hh[:2 * H], b_ih[2 * H:]]).reshape(1, 3 * H)
            b_hn = b_hh[2 * H:].reshape(1, H)
            out["gru"][(layer, d)] = (w_ih_k, w_hh_k, b_x, b_hn)

    w_cls, b_cls = torch_params["classifier"]                # (1, bi*H), (1,)
    cls_ws = tuple(jnp.transpose(w_cls[:, s * H:(s + 1) * H]) for s in range(bi))
    out["classifier"] = cls_ws + (b_cls.reshape(1, 1),)
    return out


# ----------------------------------------------------------------------------
# Pure-JAX reference (direct transcription of PyTorch GRU eval semantics)
# ----------------------------------------------------------------------------
def reference_forward(tokens, torch_params, *, hidden_dim, num_layers, bi):
    H = hidden_dim
    x = torch_params["embedding"][tokens]            # (B, S, E)
    B, S, _ = x.shape
    for layer in range(num_layers):
        outs = []
        for d in range(bi):
            w_ih, w_hh, b_ih, b_hh = torch_params["gru"][(layer, d)]
            Wir, Wiz, Win = w_ih[:H], w_ih[H:2 * H], w_ih[2 * H:]
            Whr, Whz, Whn = w_hh[:H], w_hh[H:2 * H], w_hh[2 * H:]
            bir, biz, bin_ = b_ih[:H], b_ih[H:2 * H], b_ih[2 * H:]
            bhr, bhz, bhn = b_hh[:H], b_hh[H:2 * H], b_hh[2 * H:]
            h = jnp.zeros((B, H), jnp.float32)
            seq = [None] * S
            order = range(S) if d == 0 else range(S - 1, -1, -1)
            for t in order:
                xt = x[:, t, :]
                r = jax.nn.sigmoid(xt @ Wir.T + bir + h @ Whr.T + bhr)
                z = jax.nn.sigmoid(xt @ Wiz.T + biz + h @ Whz.T + bhz)
                n = jnp.tanh(xt @ Win.T + bin_ + r * (h @ Whn.T + bhn))
                h = (1.0 - z) * n + z * h
                seq[t] = h
            outs.append(jnp.stack(seq, axis=1))       # (B, S, H)
        x = jnp.concatenate(outs, axis=-1) if bi == 2 else outs[0]
    last = x[:, -1, :]
    w_cls, b_cls = torch_params["classifier"]
    return jax.nn.sigmoid(last @ w_cls.T + b_cls)     # (B, 1)


if __name__ == "__main__":
    VOCAB = 50
    EMBEDDING_DIM = 16
    HIDDEN_DIM = 32
    NUM_LAYERS = 2
    BI_DIREC = True
    BI = 2 if BI_DIREC else 1
    BATCH = 2
    SEQ = 8

    key = jax.random.PRNGKey(0)
    k_tok, k_param = jax.random.split(key)

    tokens = jax.random.randint(k_tok, (BATCH, SEQ), 0, VOCAB)       # (B, S) ids
    torch_params = make_params(k_param, VOCAB, EMBEDDING_DIM, HIDDEN_DIM,
                               NUM_LAYERS, BI)
    kparams = prepare_kernel_params(torch_params, hidden_dim=HIDDEN_DIM,
                                    num_layers=NUM_LAYERS, bi=BI)

    fwd = jax.jit(functools.partial(
        lstm_net_forward, embedding_dim=EMBEDDING_DIM, hidden_dim=HIDDEN_DIM,
        num_layers=NUM_LAYERS, bi=BI))

    out = fwd(tokens, kparams)
    out = jax.block_until_ready(out)

    assert out.shape == (BATCH, 1), out.shape
    assert bool(jnp.all((out >= 0.0) & (out <= 1.0)))

    ref = reference_forward(tokens, torch_params, hidden_dim=HIDDEN_DIM,
                            num_layers=NUM_LAYERS, bi=BI)
    assert bool(jnp.allclose(out, ref, atol=1e-3, rtol=1e-3)), (out, ref)

    print("KERNEL_OK")
</pallas_src>

<mosaic_0001>
module attributes {stable_mosaic.version = 11 : i64} {
  func.func @kernel(%arg0: memref<64x16xf32, #tpu.memory_space<vmem>>, %arg1: memref<16x96xf32, #tpu.memory_space<vmem>>, %arg2: memref<32x96xf32, #tpu.memory_space<vmem>>, %arg3: memref<1x96xf32, #tpu.memory_space<vmem>>, %arg4: memref<1x32xf32, #tpu.memory_space<vmem>>, %arg5: memref<16x96xf32, #tpu.memory_space<vmem>>, %arg6: memref<32x96xf32, #tpu.memory_space<vmem>>, %arg7: memref<1x96xf32, #tpu.memory_space<vmem>>, %arg8: memref<1x32xf32, #tpu.memory_space<vmem>>, %arg9: memref<2x32x96xf32, #tpu.memory_space<vmem>>, %arg10: memref<32x96xf32, #tpu.memory_space<vmem>>, %arg11: memref<1x96xf32, #tpu.memory_space<vmem>>, %arg12: memref<1x32xf32, #tpu.memory_space<vmem>>, %arg13: memref<2x32x96xf32, #tpu.memory_space<vmem>>, %arg14: memref<32x96xf32, #tpu.memory_space<vmem>>, %arg15: memref<1x96xf32, #tpu.memory_space<vmem>>, %arg16: memref<1x32xf32, #tpu.memory_space<vmem>>, %arg17: memref<32x1xf32, #tpu.memory_space<vmem>>, %arg18: memref<32x1xf32, #tpu.memory_space<vmem>>, %arg19: memref<1x1xf32, #tpu.memory_space<vmem>>, %arg20: memref<8x1xf32, #tpu.memory_space<vmem>>, %arg21: memref<64x32xf32, #tpu.memory_space<vmem>>, %arg22: memref<64x32xf32, #tpu.memory_space<vmem>>, %arg23: memref<64x96xf32, #tpu.memory_space<vmem>>, %arg24: memref<64x96xf32, #tpu.memory_space<vmem>>) attributes {dimension_semantics = [], scalar_prefetch = 0 : i64, scratch_operands = 4 : i64, tpu.core_type = #tpu.core_type<tc>} {
    %c0 = arith.constant 0 : index
    %c0_0 = arith.constant 0 : index
    %0 = vector.load %arg0[%c0, %c0_0] : memref<64x16xf32, #tpu.memory_space<vmem>>, vector<64x16xf32>
    %c0_1 = arith.constant 0 : index
    %c0_2 = arith.constant 0 : index
    %1 = vector.load %arg1[%c0_1, %c0_2] : memref<16x96xf32, #tpu.memory_space<vmem>>, vector<16x96xf32>
    %cst = arith.constant dense<0.000000e+00> : vector<64x96xf32>
    %2 = tpu.matmul %0, %1, %cst {dimension_numbers = #tpu.dot_dimension_numbers<[1], [0], [0], [1], [0, 0, 1, 1], [], []>} : vector<64x16xf32>, vector<16x96xf32>, vector<64x96xf32> -> vector<64x96xf32>
    %c0_3 = arith.constant 0 : index
    %c0_4 = arith.constant 0 : index
    %3 = vector.load %arg3[%c0_3, %c0_4] : memref<1x96xf32, #tpu.memory_space<vmem>>, vector<1x96xf32>
    %4 = vector.broadcast %3 : vector<1x96xf32> to vector<64x96xf32>
    %5 = arith.addf %2, %4 : vector<64x96xf32>
    %c0_5 = arith.constant 0 : index
    %c0_6 = arith.constant 0 : index
    %6 = vector.load %arg23[%c0_5, %c0_6] : memref<64x96xf32, #tpu.memory_space<vmem>>, vector<64x96xf32>
    tpu.vector_store %arg23[%c0_5, %c0_6], %5 {strides = array<i32>} : memref<64x96xf32, #tpu.memory_space<vmem>>, vector<64x96xf32>,
    %c0_7 = arith.constant 0 : index
    %c0_8 = arith.constant 0 : index
    %7 = vector.load %arg0[%c0_7, %c0_8] : memref<64x16xf32, #tpu.memory_space<vmem>>, vector<64x16xf32>
    %c0_9 = arith.constant 0 : index
    %c0_10 = arith.constant 0 : index
    %8 = vector.load %arg5[%c0_9, %c0_10] : memref<16x96xf32, #tpu.memory_space<vmem>>, vector<16x96xf32>
    %cst_11 = arith.constant dense<0.000000e+00> : vector<64x96xf32>
    %9 = tpu.matmul %7, %8, %cst_11 {dimension_numbers = #tpu.dot_dimension_numbers<[1], [0], [0], [1], [0, 0, 1, 1], [], []>} : vector<64x16xf32>, vector<16x96xf32>, vector<64x96xf32> -> vector<64x96xf32>
    %c0_12 = arith.constant 0 : index
    %c0_13 = arith.constant 0 : index
    %10 = vector.load %arg7[%c0_12, %c0_13] : memref<1x96xf32, #tpu.memory_space<vmem>>, vector<1x96xf32>
    %11 = vector.broadcast %10 : vector<1x96xf32> to vector<64x96xf32>
    %12 = arith.addf %9, %11 : vector<64x96xf32>
    %c0_14 = arith.constant 0 : index
    %c0_15 = arith.constant 0 : index
    %13 = vector.load %arg24[%c0_14, %c0_15] : memref<64x96xf32, #tpu.memory_space<vmem>>, vector<64x96xf32>
    tpu.vector_store %arg24[%c0_14, %c0_15], %12 {strides = array<i32>} : memref<64x96xf32, #tpu.memory_space<vmem>>, vector<64x96xf32>,
    %c0_16 = arith.constant 0 : index
    %c0_17 = arith.constant 0 : index
    %14 = vector.load %arg2[%c0_16, %c0_17] : memref<32x96xf32, #tpu.memory_space<vmem>>, vector<32x96xf32>
    %c0_18 = arith.constant 0 : index
    %c0_19 = arith.constant 0 : index
    %15 = vector.load %arg6[%c0_18, %c0_19] : memref<32x96xf32, #tpu.memory_space<vmem>>, vector<32x96xf32>
    %c0_20 = arith.constant 0 : index
    %c0_21 = arith.constant 0 : index
    %16 = vector.load %arg4[%c0_20, %c0_21] : memref<1x32xf32, #tpu.memory_space<vmem>>, vector<1x32xf32>
    %c0_22 = arith.constant 0 : index
    %c0_23 = arith.constant 0 : index
    %17 = vector.load %arg8[%c0_22, %c0_23] : memref<1x32xf32, #tpu.memory_space<vmem>>, vector<1x32xf32>
    %cst_24 = arith.constant 0.000000e+00 : f32
    %18 = vector.broadcast %cst_24 : f32 to vector<8x32xf32>
    %cst_25 = arith.constant 0.000000e+00 : f32
    %19 = vector.broadcast %cst_25 : f32 to vector<8x32xf32>
    %c0_26 = arith.constant 0 : index
    %c0_27 = arith.constant 0 : index
    %20 = vector.load %arg23[%c0_26, %c0_27] : memref<64x96xf32, #tpu.memory_space<vmem>>, vector<8x96xf32>
    %cst_28 = arith.constant dense<0.000000e+00> : vector<8x96xf32>
    %21 = tpu.matmul %18, %14, %cst_28 {dimension_numbers = #tpu.dot_dimension_numbers<[1], [0], [0], [1], [0, 0, 1, 1], [], []>} : vector<8x32xf32>, vector<32x96xf32>, vector<8x96xf32> -> vector<8x96xf32>
    %22 = vector.extract_strided_slice %20 {offsets = [0, 0], sizes = [8, 32], strides = [1, 1]} : vector<8x96xf32> to vector<8x32xf32>
    %23 = vector.extract_strided_slice %21 {offsets = [0, 0], sizes = [8, 32], strides = [1, 1]} : vector<8x96xf32> to vector<8x32xf32>
    %24 = arith.addf %22, %23 : vector<8x32xf32>
    %25 = arith.negf %24 : vector<8x32xf32>
    %26 = math.exp %25 : vector<8x32xf32>
    %cst_29 = arith.constant 1.000000e+00 : f32
    %27 = vector.broadcast %cst_29 : f32 to vector<8x32xf32>
    %28 = arith.addf %27, %26 : vector<8x32xf32>
    %29 = arith.divf %27, %28 : vector<8x32xf32>
    %30 = vector.extract_strided_slice %20 {offsets = [0, 32], sizes = [8, 32], strides = [1, 1]} : vector<8x96xf32> to vector<8x32xf32>
    %31 = vector.extract_strided_slice %21 {offsets = [0, 32], sizes = [8, 32], strides = [1, 1]} : vector<8x96xf32> to vector<8x32xf32>
    %32 = arith.addf %30, %31 : vector<8x32xf32>
    %33 = arith.negf %32 : vector<8x32xf32>
    %34 = math.exp %33 : vector<8x32xf32>
    %cst_30 = arith.constant 1.000000e+00 : f32
    %35 = vector.broadcast %cst_30 : f32 to vector<8x32xf32>
    %36 = arith.addf %35, %34 : vector<8x32xf32>
    %37 = arith.divf %35, %36 : vector<8x32xf32>
    %38 = vector.extract_strided_slice %20 {offsets = [0, 64], sizes = [8, 32], strides = [1, 1]} : vector<8x96xf32> to vector<8x32xf32>
    %39 = vector.extract_strided_slice %21 {offsets = [0, 64], sizes = [8, 32], strides = [1, 1]} : vector<8x96xf32> to vector<8x32xf32>
    %40 = vector.broadcast %16 : vector<1x32xf32> to vector<8x32xf32>
    %41 = arith.addf %39, %40 : vector<8x32xf32>
    %42 = arith.mulf %29, %41 : vector<8x32xf32>
    %43 = arith.addf %38, %42 : vector<8x32xf32>
    %44 = math.tanh %43 : vector<8x32xf32>
    %cst_31 = arith.constant 1.000000e+00 : f32
    %45 = vector.broadcast %cst_31 : f32 to vector<8x32xf32>
    %46 = arith.subf %45, %37 : vector<8x32xf32>
    %47 = arith.mulf %46, %44 : vector<8x32xf32>
    %48 = arith.mulf %37, %18 : vector<8x32xf32>
    %49 = arith.addf %47, %48 : vector<8x32xf32>
    %c0_32 = arith.constant 0 : index
    %c0_33 = arith.constant 0 : index
    %50 = vector.load %arg21[%c0_32, %c0_33] : memref<64x32xf32, #tpu.memory_space<vmem>>, vector<8x32xf32>
    tpu.vector_store %arg21[%c0_32, %c0_33], %49 {strides = array<i32>} : memref<64x32xf32, #tpu.memory_space<vmem>>, vector<8x32xf32>,
    %c56 = arith.constant 56 : index
    %c0_34 = arith.constant 0 : index
    %51 = vector.load %arg24[%c56, %c0_34] : memref<64x96xf32, #tpu.memory_space<vmem>>, vector<8x96xf32>
    %cst_35 = arith.constant dense<0.000000e+00> : vector<8x96xf32>
    %52 = tpu.matmul %19, %15, %cst_35 {dimension_numbers = #tpu.dot_dimension_numbers<[1], [0], [0], [1], [0, 0, 1, 1], [], []>} : vector<8x32xf32>, vector<32x96xf32>, vector<8x96xf32> -> vector<8x96xf32>
    %53 = vector.extract_strided_slice %51 {offsets = [0, 0], sizes = [8, 32], strides = [1, 1]} : vector<8x96xf32> to vector<8x32xf32>
    %54 = vector.extract_strided_slice %52 {offsets = [0, 0], sizes = [8, 32], strides = [1, 1]} : vector<8x96xf32> to vector<8x32xf32>
    %55 = arith.addf %53, %54 : vector<8x32xf32>
    %56 = arith.negf %55 : vector<8x32xf32>
    %57 = math.exp %56 : vector<8x32xf32>
    %cst_36 = arith.constant 1.000000e+00 : f32
    %58 = vector.broadcast %cst_36 : f32 to vector<8x32xf32>
    %59 = arith.addf %58, %57 : vector<8x32xf32>
    %60 = arith.divf %58, %59 : vector<8x32xf32>
    %61 = vector.extract_strided_slice %51 {offsets = [0, 32], sizes = [8, 32], strides = [1, 1]} : vector<8x96xf32> to vector<8x32xf32>
    %62 = vector.extract_strided_slice %52 {offsets = [0, 32], sizes = [8, 32], strides = [1, 1]} : vector<8x96xf32> to vector<8x32xf32>
    %63 = arith.addf %61, %62 : vector<8x32xf32>
    %64 = arith.negf %63 : vector<8x32xf32>
    %65 = math.exp %64 : vector<8x32xf32>
    %cst_37 = arith.constant 1.000000e+00 : f32
    %66 = vector.broadcast %cst_37 : f32 to vector<8x32xf32>
    %67 = arith.addf %66, %65 : vector<8x32xf32>
    %68 = arith.divf %66, %67 : vector<8x32xf32>
    %69 = vector.extract_strided_slice %51 {offsets = [0, 64], sizes = [8, 32], strides = [1, 1]} : vector<8x96xf32> to vector<8x32xf32>
    %70 = vector.extract_strided_slice %52 {offsets = [0, 64], sizes = [8, 32], strides = [1, 1]} : vector<8x96xf32> to vector<8x32xf32>
    %71 = vector.broadcast %17 : vector<1x32xf32> to vector<8x32xf32>
    %72 = arith.addf %70, %71 : vector<8x32xf32>
    %73 = arith.mulf %60, %72 : vector<8x32xf32>
    %74 = arith.addf %69, %73 : vector<8x32xf32>
    %75 = math.tanh %74 : vector<8x32xf32>
    %cst_38 = arith.constant 1.000000e+00 : f32
    %76 = vector.broadcast %cst_38 : f32 to vector<8x32xf32>
    %77 = arith.subf %76, %68 : vector<8x32xf32>
    %78 = arith.mulf %77, %75 : vector<8x32xf32>
    %79 = arith.mulf %68, %19 : vector<8x32xf32>
    %80 = arith.addf %78, %79 : vector<8x32xf32>
    %c56_39 = arith.constant 56 : index
    %c0_40 = arith.constant 0 : index
    %81 = vector.load %arg22[%c56_39, %c0_40] : memref<64x32xf32, #tpu.memory_space<vmem>>, vector<8x32xf32>
    tpu.vector_store %arg22[%c56_39, %c0_40], %80 {strides = array<i32>} : memref<64x32xf32, #tpu.memory_space<vmem>>, vector<8x32xf32>,
    %c8 = arith.constant 8 : index
    %c0_41 = arith.constant 0 : index
    %82 = vector.load %arg23[%c8, %c0_41] : memref<64x96xf32, #tpu.memory_space<vmem>>, vector<8x96xf32>
    %cst_42 = arith.constant dense<0.000000e+00> : vector<8x96xf32>
    %83 = tpu.matmul %49, %14, %cst_42 {dimension_numbers = #tpu.dot_dimension_numbers<[1], [0], [0], [1], [0, 0, 1, 1], [], []>} : vector<8x32xf32>, vector<32x96xf32>, vector<8x96xf32> -> vector<8x96xf32>
    %84 = vector.extract_strided_slice %82 {offsets = [0, 0], sizes = [8, 32], strides = [1, 1]} : vector<8x96xf32> to vector<8x32xf32>
    %85 = vector.extract_strided_slice %83 {offsets = [0, 0], sizes = [8, 32], strides = [1, 1]} : vector<8x96xf32> to vector<8x32xf32>
    %86 = arith.addf %84, %85 : vector<8x32xf32>
    %87 = arith.negf %86 : vector<8x32xf32>
    %88 = math.exp %87 : vector<8x32xf32>
    %cst_43 = arith.constant 1.000000e+00 : f32
    %89 = vector.broadcast %cst_43 : f32 to vector<8x32xf32>
    %90 = arith.addf %89, %88 : vector<8x32xf32>
    %91 = arith.divf %89, %90 : vector<8x32xf32>
    %92 = vector.extract_strided_slice %82 {offsets = [0, 32], sizes = [8, 32], strides = [1, 1]} : vector<8x96xf32> to vector<8x32xf32>
    %93 = vector.extract_strided_slice %83 {offsets = [0, 32], sizes = [8, 32], strides = [1, 1]} : vector<8x96xf32> to vector<8x32xf32>
    %94 = arith.addf %92, %93 : vector<8x32xf32>
    %95 = arith.negf %94 : vector<8x32xf32>
    %96 = math.exp %95 : vector<8x32xf32>
    %cst_44 = arith.constant 1.000000e+00 : f32
    %97 = vector.broadcast %cst_44 : f32 to vector<8x32xf32>
    %98 = arith.addf %97, %96 : vector<8x32xf32>
    %99 = arith.divf %97, %98 : vector<8x32xf32>
    %100 = vector.extract_strided_slice %82 {offsets = [0, 64], sizes = [8, 32], strides = [1, 1]} : vector<8x96xf32> to vector<8x32xf32>
    %101 = vector.extract_strided_slice %83 {offsets = [0, 64], sizes = [8, 32], strides = [1, 1]} : vector<8x96xf32> to vector<8x32xf32>
    %102 = vector.broadcast %16 : vector<1x32xf32> to vector<8x32xf32>
    %103 = arith.addf %101, %102 : vector<8x32xf32>
    %104 = arith.mulf %91, %103 : vector<8x32xf32>
    %105 = arith.addf %100, %104 : vector<8x32xf32>
    %106 = math.tanh %105 : vector<8x32xf32>
    %cst_45 = arith.constant 1.000000e+00 : f32
    %107 = vector.broadcast %cst_45 : f32 to vector<8x32xf32>
    %108 = arith.subf %107, %99 : vector<8x32xf32>
    %109 = arith.mulf %108, %106 : vector<8x32xf32>
    %110 = arith.mulf %99, %49 : vector<8x32xf32>
    %111 = arith.addf %109, %110 : vector<8x32xf32>
    %c8_46 = arith.constant 8 : index
    %c0_47 = arith.constant 0 : index
    %112 = vector.load %arg21[%c8_46, %c0_47] : memref<64x32xf32, #tpu.memory_space<vmem>>, vector<8x32xf32>
    tpu.vector_store %arg21[%c8_46, %c0_47], %111 {strides = array<i32>} : memref<64x32xf32, #tpu.memory_space<vmem>>, vector<8x32xf32>,
    %c48 = arith.constant 48 : index
    %c0_48 = arith.constant 0 : index
    %113 = vector.load %arg24[%c48, %c0_48] : memref<64x96xf32, #tpu.memory_space<vmem>>, vector<8x96xf32>
    %cst_49 = arith.constant dense<0.000000e+00> : vector<8x96xf32>
    %114 = tpu.matmul %80, %15, %cst_49 {dimension_numbers = #tpu.dot_dimension_numbers<[1], [0], [0], [1], [0, 0, 1, 1], [], []>} : vector<8x32xf32>, vector<32x96xf32>, vector<8x96xf32> -> vector<8x96xf32>
    %115 = vector.extract_strided_slice %113 {offsets = [0, 0], sizes = [8, 32], strides = [1, 1]} : vector<8x96xf32> to vector<8x32xf32>
    %116 = vector.extract_strided_slice %114 {offsets = [0, 0], sizes = [8, 32], strides = [1, 1]} : vector<8x96xf32> to vector<8x32xf32>
    %117 = arith.addf %115, %116 : vector<8x32xf32>
    %118 = arith.negf %117 : vector<8x32xf32>
    %119 = math.exp %118 : vector<8x32xf32>
    %cst_50 = arith.constant 1.000000e+00 : f32
    %120 = vector.broadcast %cst_50 : f32 to vector<8x32xf32>
    %121 = arith.addf %120, %119 : vector<8x32xf32>
    %122 = arith.divf %120, %121 : vector<8x32xf32>
    %123 = vector.extract_strided_slice %113 {offsets = [0, 32], sizes = [8, 32], strides = [1, 1]} : vector<8x96xf32> to vector<8x32xf32>
    %124 = vector.extract_strided_slice %114 {offsets = [0, 32], sizes = [8, 32], strides = [1, 1]} : vector<8x96xf32> to vector<8x32xf32>
    %125 = arith.addf %123, %124 : vector<8x32xf32>
    %126 = arith.negf %125 : vector<8x32xf32>
    %127 = math.exp %126 : vector<8x32xf32>
    %cst_51 = arith.constant 1.000000e+00 : f32
    %128 = vector.broadcast %cst_51 : f32 to vector<8x32xf32>
    %129 = arith.addf %128, %127 : vector<8x32xf32>
    %130 = arith.divf %128, %129 : vector<8x32xf32>
    %131 = vector.extract_strided_slice %113 {offsets = [0, 64], sizes = [8, 32], strides = [1, 1]} : vector<8x96xf32> to vector<8x32xf32>
    %132 = vector.extract_strided_slice %114 {offsets = [0, 64], sizes = [8, 32], strides = [1, 1]} : vector<8x96xf32> to vector<8x32xf32>
    %133 = vector.broadcast %17 : vector<1x32xf32> to vector<8x32xf32>
    %134 = arith.addf %132, %133 : vector<8x32xf32>
    %135 = arith.mulf %122, %134 : vector<8x32xf32>
    %136 = arith.addf %131, %135 : vector<8x32xf32>
    %137 = math.tanh %136 : vector<8x32xf32>
    %cst_52 = arith.constant 1.000000e+00 : f32
    %138 = vector.broadcast %cst_52 : f32 to vector<8x32xf32>
    %139 = arith.subf %138, %130 : vector<8x32xf32>
    %140 = arith.mulf %139, %137 : vector<8x32xf32>
    %141 = arith.mulf %130, %80 : vector<8x32xf32>
    %142 = arith.addf %140, %141 : vector<8x32xf32>
    %c48_53 = arith.constant 48 : index
    %c0_54 = arith.constant 0 : index
    %143 = vector.load %arg22[%c48_53, %c0_54] : memref<64x32xf32, #tpu.memory_space<vmem>>, vector<8x32xf32>
    tpu.vector_store %arg22[%c48_53, %c0_54], %142 {strides = array<i32>} : memref<64x32xf32, #tpu.memory_space<vmem>>, vector<8x32xf32>,
    %c16 = arith.constant 16 : index
    %c0_55 = arith.constant 0 : index
    %144 = vector.load %arg23[%c16, %c0_55] : memref<64x96xf32, #tpu.memory_space<vmem>>, vector<8x96xf32>
    %cst_56 = arith.constant dense<0.000000e+00> : vector<8x96xf32>
    %145 = tpu.matmul %111, %14, %cst_56 {dimension_numbers = #tpu.dot_dimension_numbers<[1], [0], [0], [1], [0, 0, 1, 1], [], []>} : vector<8x32xf32>, vector<32x96xf32>, vector<8x96xf32> -> vector<8x96xf32>
    %146 = vector.extract_strided_slice %144 {offsets = [0, 0], sizes = [8, 32], strides = [1, 1]} : vector<8x96xf32> to vector<8x32xf32>
    %147 = vector.extract_strided_slice %145 {offsets = [0, 0], sizes = [8, 32], strides = [1, 1]} : vector<8x96xf32> to vector<8x32xf32>
    %148 = arith.addf %146, %147 : vector<8x32xf32>
    %149 = arith.negf %148 : vector<8x32xf32>
    %150 = math.exp %149 : vector<8x32xf32>
    %cst_57 = arith.constant 1.000000e+00 : f32
    %151 = vector.broadcast %cst_57 : f32 to vector<8x32xf32>
    %152 = arith.addf %151, %150 : vector<8x32xf32>
    %153 = arith.divf %151, %152 : vector<8x32xf32>
    %154 = vector.extract_strided_slice %144 {offsets = [0, 32], sizes = [8, 32], strides = [1, 1]} : vector<8x96xf32> to vector<8x32xf32>
    %155 = vector.extract_strided_slice %145 {offsets = [0, 32], sizes = [8, 32], strides = [1, 1]} : vector<8x96xf32> to vector<8x32xf32>
    %156 = arith.addf %154, %155 : vector<8x32xf32>
    %157 = arith.negf %156 : vector<8x32xf32>
    %158 = math.exp %157 : vector<8x32xf32>
    %cst_58 = arith.constant 1.000000e+00 : f32
    %159 = vector.broadcast %cst_58 : f32 to vector<8x32xf32>
    %160 = arith.addf %159, %158 : vector<8x32xf32>
    %161 = arith.divf %159, %160 : vector<8x32xf32>
    %162 = vector.extract_strided_slice %144 {offsets = [0, 64], sizes = [8, 32], strides = [1, 1]} : vector<8x96xf32> to vector<8x32xf32>
    %163 = vector.extract_strided_slice %145 {offsets = [0, 64], sizes = [8, 32], strides = [1, 1]} : vector<8x96xf32> to vector<8x32xf32>
    %164 = vector.broadcast %16 : vector<1x32xf32> to vector<8x32xf32>
    %165 = arith.addf %163, %164 : vector<8x32xf32>
    %166 = arith.mulf %153, %165 : vector<8x32xf32>
    %167 = arith.addf %162, %166 : vector<8x32xf32>
    %168 = math.tanh %167 : vector<8x32xf32>
    %cst_59 = arith.constant 1.000000e+00 : f32
    %169 = vector.broadcast %cst_59 : f32 to vector<8x32xf32>
    %170 = arith.subf %169, %161 : vector<8x32xf32>
    %171 = arith.mulf %170, %168 : vector<8x32xf32>
    %172 = arith.mulf %161, %111 : vector<8x32xf32>
    %173 = arith.addf %171, %172 : vector<8x32xf32>
    %c16_60 = arith.constant 16 : index
    %c0_61 = arith.constant 0 : index
    %174 = vector.load %arg21[%c16_60, %c0_61] : memref<64x32xf32, #tpu.memory_space<vmem>>, vector<8x32xf32>
    tpu.vector_store %arg21[%c16_60, %c0_61], %173 {strides = array<i32>} : memref<64x32xf32, #tpu.memory_space<vmem>>, vector<8x32xf32>,
    %c40 = arith.constant 40 : index
    %c0_62 = arith.constant 0 : index
    %175 = vector.load %arg24[%c40, %c0_62] : memref<64x96xf32, #tpu.memory_space<vmem>>, vector<8x96xf32>
    %cst_63 = arith.constant dense<0.000000e+00> : vector<8x96xf32>
    %176 = tpu.matmul %142, %15, %cst_63 {dimension_numbers = #tpu.dot_dimension_numbers<[1], [0], [0], [1], [0, 0, 1, 1], [], []>} : vector<8x32xf32>, vector<32x96xf32>, vector<8x96xf32> -> vector<8x96xf32>
    %177 = vector.extract_strided_slice %175 {offsets = [0, 0], sizes = [8, 32], strides = [1, 1]} : vector<8x96xf32> to vector<8x32xf32>
    %178 = vector.extract_strided_slice %176 {offsets = [0, 0], sizes = [8, 32], strides = [1, 1]} : vector<8x96xf32> to vector<8x32xf32>
    %179 = arith.addf %177, %178 : vector<8x32xf32>
    %180 = arith.negf %179 : vector<8x32xf32>
    %181 = math.exp %180 : vector<8x32xf32>
    %cst_64 = arith.constant 1.000000e+00 : f32
    %182 = vector.broadcast %cst_64 : f32 to vector<8x32xf32>
    %183 = arith.addf %182, %181 : vector<8x32xf32>
    %184 = arith.divf %182, %183 : vector<8x32xf32>
    %185 = vector.extract_strided_slice %175 {offsets = [0, 32], sizes = [8, 32], strides = [1, 1]} : vector<8x96xf32> to vector<8x32xf32>
    %186 = vector.extract_strided_slice %176 {offsets = [0, 32], sizes = [8, 32], strides = [1, 1]} : vector<8x96xf32> to vector<8x32xf32>
    %187 = arith.addf %185, %186 : vector<8x32xf32>
    %188 = arith.negf %187 : vector<8x32xf32>
    %189 = math.exp %188 : vector<8x32xf32>
    %cst_65 = arith.constant 1.000000e+00 : f32
    %190 = vector.broadcast %cst_65 : f32 to vector<8x32xf32>
    %191 = arith.addf %190, %189 : vector<8x32xf32>
    %192 = arith.divf %190, %191 : vector<8x32xf32>
    %193 = vector.extract_strided_slice %175 {offsets = [0, 64], sizes = [8, 32], strides = [1, 1]} : vector<8x96xf32> to vector<8x32xf32>
    %194 = vector.extract_strided_slice %176 {offsets = [0, 64], sizes = [8, 32], strides = [1, 1]} : vector<8x96xf32> to vector<8x32xf32>
    %195 = vector.broadcast %17 : vector<1x32xf32> to vector<8x32xf32>
    %196 = arith.addf %194, %195 : vector<8x32xf32>
    %197 = arith.mulf %184, %196 : vector<8x32xf32>
    %198 = arith.addf %193, %197 : vector<8x32xf32>
    %199 = math.tanh %198 : vector<8x32xf32>
    %cst_66 = arith.constant 1.000000e+00 : f32
    %200 = vector.broadcast %cst_66 : f32 to vector<8x32xf32>
    %201 = arith.subf %200, %192 : vector<8x32xf32>
    %202 = arith.mulf %201, %199 : vector<8x32xf32>
    %203 = arith.mulf %192, %142 : vector<8x32xf32>
    %204 = arith.addf %202, %203 : vector<8x32xf32>
    %c40_67 = arith.constant 40 : index
    %c0_68 = arith.constant 0 : index
    %205 = vector.load %arg22[%c40_67, %c0_68] : memref<64x32xf32, #tpu.memory_space<vmem>>, vector<8x32xf32>
    tpu.vector_store %arg22[%c40_67, %c0_68], %204 {strides = array<i32>} : memref<64x32xf32, #tpu.memory_space<vmem>>, vector<8x32xf32>,
    %c24 = arith.constant 24 : index
    %c0_69 = arith.constant 0 : index
    %206 = vector.load %arg23[%c24, %c0_69] : memref<64x96xf32, #tpu.memory_space<vmem>>, vector<8x96xf32>
    %cst_70 = arith.constant dense<0.000000e+00> : vector<8x96xf32>
    %207 = tpu.matmul %173, %14, %cst_70 {dimension_numbers = #tpu.dot_dimension_numbers<[1], [0], [0], [1], [0, 0, 1, 1], [], []>} : vector<8x32xf32>, vector<32x96xf32>, vector<8x96xf32> -> vector<8x96xf32>
    %208 = vector.extract_strided_slice %206 {offsets = [0, 0], sizes = [8, 32], strides = [1, 1]} : vector<8x96xf32> to vector<8x32xf32>
    %209 = vector.extract_strided_slice %207 {offsets = [0, 0], sizes = [8, 32], strides = [1, 1]} : vector<8x96xf32> to vector<8x32xf32>
    %210 = arith.addf %208, %209 : vector<8x32xf32>
    %211 = arith.negf %210 : vector<8x32xf32>
    %212 = math.exp %211 : vector<8x32xf32>
    %cst_71 = arith.constant 1.000000e+00 : f32
    %213 = vector.broadcast %cst_71 : f32 to vector<8x32xf32>
    %214 = arith.addf %213, %212 : vector<8x32xf32>
    %215 = arith.divf %213, %214 : vector<8x32xf32>
    %216 = vector.extract_strided_slice %206 {offsets = [0, 32], sizes = [8, 32], strides = [1, 1]} : vector<8x96xf32> to vector<8x32xf32>
    %217 = vector.extract_strided_slice %207 {offsets = [0, 32], sizes = [8, 32], strides = [1, 1]} : vector<8x96xf32> to vector<8x32xf32>
    %218 = arith.addf %216, %217 : vector<8x32xf32>
    %219 = arith.negf %218 : vector<8x32xf32>
    %220 = math.exp %219 : vector<8x32xf32>
    %cst_72 = arith.constant 1.000000e+00 : f32
    %221 = vector.broadcast %cst_72 : f32 to vector<8x32xf32>
    %222 = arith.addf %221, %220 : vector<8x32xf32>
    %223 = arith.divf %221, %222 : vector<8x32xf32>
    %224 = vector.extract_strided_slice %206 {offsets = [0, 64], sizes = [8, 32], strides = [1, 1]} : vector<8x96xf32> to vector<8x32xf32>
    %225 = vector.extract_strided_slice %207 {offsets = [0, 64], sizes = [8, 32], strides = [1, 1]} : vector<8x96xf32> to vector<8x32xf32>
    %226 = vector.broadcast %16 : vector<1x32xf32> to vector<8x32xf32>
    %227 = arith.addf %225, %226 : vector<8x32xf32>
    %228 = arith.mulf %215, %227 : vector<8x32xf32>
    %229 = arith.addf %224, %228 : vector<8x32xf32>
    %230 = math.tanh %229 : vector<8x32xf32>
    %cst_73 = arith.constant 1.000000e+00 : f32
    %231 = vector.broadcast %cst_73 : f32 to vector<8x32xf32>
    %232 = arith.subf %231, %223 : vector<8x32xf32>
    %233 = arith.mulf %232, %230 : vector<8x32xf32>
    %234 = arith.mulf %223, %173 : vector<8x32xf32>
    %235 = arith.addf %233, %234 : vector<8x32xf32>
    %c24_74 = arith.constant 24 : index
    %c0_75 = arith.constant 0 : index
    %236 = vector.load %arg21[%c24_74, %c0_75] : memref<64x32xf32, #tpu.memory_space<vmem>>, vector<8x32xf32>
    tpu.vector_store %arg21[%c24_74, %c0_75], %235 {strides = array<i32>} : memref<64x32xf32, #tpu.memory_space<vmem>>, vector<8x32xf32>,
    %c32 = arith.constant 32 : index
    %c0_76 = arith.constant 0 : index
    %237 = vector.load %arg24[%c32, %c0_76] : memref<64x96xf32, #tpu.memory_space<vmem>>, vector<8x96xf32>
    %cst_77 = arith.constant dense<0.000000e+00> : vector<8x96xf32>
    %238 = tpu.matmul %204, %15, %cst_77 {dimension_numbers = #tpu.dot_dimension_numbers<[1], [0], [0], [1], [0, 0, 1, 1], [], []>} : vector<8x32xf32>, vector<32x96xf32>, vector<8x96xf32> -> vector<8x96xf32>
    %239 = vector.extract_strided_slice %237 {offsets = [0, 0], sizes = [8, 32], strides = [1, 1]} : vector<8x96xf32> to vector<8x32xf32>
    %240 = vector.extract_strided_slice %238 {offsets = [0, 0], sizes = [8, 32], strides = [1, 1]} : vector<8x96xf32> to vector<8x32xf32>
    %241 = arith.addf %239, %240 : vector<8x32xf32>
    %242 = arith.negf %241 : vector<8x32xf32>
    %243 = math.exp %242 : vector<8x32xf32>
    %cst_78 = arith.constant 1.000000e+00 : f32
    %244 = vector.broadcast %cst_78 : f32 to vector<8x32xf32>
    %245 = arith.addf %244, %243 : vector<8x32xf32>
    %246 = arith.divf %244, %245 : vector<8x32xf32>
    %247 = vector.extract_strided_slice %237 {offsets = [0, 32], sizes = [8, 32], strides = [1, 1]} : vector<8x96xf32> to vector<8x32xf32>
    %248 = vector.extract_strided_slice %238 {offsets = [0, 32], sizes = [8, 32], strides = [1, 1]} : vector<8x96xf32> to vector<8x32xf32>
    %249 = arith.addf %247, %248 : vector<8x32xf32>
    %250 = arith.negf %249 : vector<8x32xf32>
    %251 = math.exp %250 : vector<8x32xf32>
    %cst_79 = arith.constant 1.000000e+00 : f32
    %252 = vector.broadcast %cst_79 : f32 to vector<8x32xf32>
    %253 = arith.addf %252, %251 : vector<8x32xf32>
    %254 = arith.divf %252, %253 : vector<8x32xf32>
    %255 = vector.extract_strided_slice %237 {offsets = [0, 64], sizes = [8, 32], strides = [1, 1]} : vector<8x96xf32> to vector<8x32xf32>
    %256 = vector.extract_strided_slice %238 {offsets = [0, 64], sizes = [8, 32], strides = [1, 1]} : vector<8x96xf32> to vector<8x32xf32>
    %257 = vector.broadcast %17 : vector<1x32xf32> to vector<8x32xf32>
    %258 = arith.addf %256, %257 : vector<8x32xf32>
    %259 = arith.mulf %246, %258 : vector<8x32xf32>
    %260 = arith.addf %255, %259 : vector<8x32xf32>
    %261 = math.tanh %260 : vector<8x32xf32>
    %cst_80 = arith.constant 1.000000e+00 : f32
    %262 = vector.broadcast %cst_80 : f32 to vector<8x32xf32>
    %263 = arith.subf %262, %254 : vector<8x32xf32>
    %264 = arith.mulf %263, %261 : vector<8x32xf32>
    %265 = arith.mulf %254, %204 : vector<8x32xf32>
    %266 = arith.addf %264, %265 : vector<8x32xf32>
    %c32_81 = arith.constant 32 : index
    %c0_82 = arith.constant 0 : index
    %267 = vector.load %arg22[%c32_81, %c0_82] : memref<64x32xf32, #tpu.memory_space<vmem>>, vector<8x32xf32>
    tpu.vector_store %arg22[%c32_81, %c0_82], %266 {strides = array<i32>} : memref<64x32xf32, #tpu.memory_space<vmem>>, vector<8x32xf32>,
    %c32_83 = arith.constant 32 : index
    %c0_84 = arith.constant 0 : index
    %268 = vector.load %arg23[%c32_83, %c0_84] : memref<64x96xf32, #tpu.memory_space<vmem>>, vector<8x96xf32>
    %cst_85 = arith.constant dense<0.000000e+00> : vector<8x96xf32>
    %269 = tpu.matmul %235, %14, %cst_85 {dimension_numbers = #tpu.dot_dimension_numbers<[1], [0], [0], [1], [0, 0, 1, 1], [], []>} : vector<8x32xf32>, vector<32x96xf32>, vector<8x96xf32> -> vector<8x96xf32>
    %270 = vector.extract_strided_slice %268 {offsets = [0, 0], sizes = [8, 32], strides = [1, 1]} : vector<8x96xf32> to vector<8x32xf32>
    %271 = vector.extract_strided_slice %269 {offsets = [0, 0], sizes = [8, 32], strides = [1, 1]} : vector<8x96xf32> to vector<8x32xf32>
    %272 = arith.addf %270, %271 : vector<8x32xf32>
    %273 = arith.negf %272 : vector<8x32xf32>
    %274 = math.exp %273 : vector<8x32xf32>
    %cst_86 = arith.constant 1.000000e+00 : f32
    %275 = vector.broadcast %cst_86 : f32 to vector<8x32xf32>
    %276 = arith.addf %275, %274 : vector<8x32xf32>
    %277 = arith.divf %275, %276 : vector<8x32xf32>
    %278 = vector.extract_strided_slice %268 {offsets = [0, 32], sizes = [8, 32], strides = [1, 1]} : vector<8x96xf32> to vector<8x32xf32>
    %279 = vector.extract_strided_slice %269 {offsets = [0, 32], sizes = [8, 32], strides = [1, 1]} : vector<8x96xf32> to vector<8x32xf32>
    %280 = arith.addf %278, %279 : vector<8x32xf32>
    %281 = arith.negf %280 : vector<8x32xf32>
    %282 = math.exp %281 : vector<8x32xf32>
    %cst_87 = arith.constant 1.000000e+00 : f32
    %283 = vector.broadcast %cst_87 : f32 to vector<8x32xf32>
    %284 = arith.addf %283, %282 : vector<8x32xf32>
    %285 = arith.divf %283, %284 : vector<8x32xf32>
    %286 = vector.extract_strided_slice %268 {offsets = [0, 64], sizes = [8, 32], strides = [1, 1]} : vector<8x96xf32> to vector<8x32xf32>
    %287 = vector.extract_strided_slice %269 {offsets = [0, 64], sizes = [8, 32], strides = [1, 1]} : vector<8x96xf32> to vector<8x32xf32>
    %288 = vector.broadcast %16 : vector<1x32xf32> to vector<8x32xf32>
    %289 = arith.addf %287, %288 : vector<8x32xf32>
    %290 = arith.mulf %277, %289 : vector<8x32xf32>
    %291 = arith.addf %286, %290 : vector<8x32xf32>
    %292 = math.tanh %291 : vector<8x32xf32>
    %cst_88 = arith.constant 1.000000e+00 : f32
    %293 = vector.broadcast %cst_88 : f32 to vector<8x32xf32>
    %294 = arith.subf %293, %285 : vector<8x32xf32>
    %295 = arith.mulf %294, %292 : vector<8x32xf32>
    %296 = arith.mulf %285, %235 : vector<8x32xf32>
    %297 = arith.addf %295, %296 : vector<8x32xf32>
    %c32_89 = arith.constant 32 : index
    %c0_90 = arith.constant 0 : index
    %298 = vector.load %arg21[%c32_89, %c0_90] : memref<64x32xf32, #tpu.memory_space<vmem>>, vector<8x32xf32>
    tpu.vector_store %arg21[%c32_89, %c0_90], %297 {strides = array<i32>} : memref<64x32xf32, #tpu.memory_space<vmem>>, vector<8x32xf32>,
    %c24_91 = arith.constant 24 : index
    %c0_92 = arith.constant 0 : index
    %299 = vector.load %arg24[%c24_91, %c0_92] : memref<64x96xf32, #tpu.memory_space<vmem>>, vector<8x96xf32>
    %cst_93 = arith.constant dense<0.000000e+00> : vector<8x96xf32>
    %300 = tpu.matmul %266, %15, %cst_93 {dimension_numbers = #tpu.dot_dimension_numbers<[1], [0], [0], [1], [0, 0, 1, 1], [], []>} : vector<8x32xf32>, vector<32x96xf32>, vector<8x96xf32> -> vector<8x96xf32>
    %301 = vector.extract_strided_slice %299 {offsets = [0, 0], sizes = [8, 32], strides = [1, 1]} : vector<8x96xf32> to vector<8x32xf32>
    %302 = vector.extract_strided_slice %300 {offsets = [0, 0], sizes = [8, 32], strides = [1, 1]} : vector<8x96xf32> to vector<8x32xf32>
    %303 = arith.addf %301, %302 : vector<8x32xf32>
    %304 = arith.negf %303 : vector<8x32xf32>
    %305 = math.exp %304 : vector<8x32xf32>
    %cst_94 = arith.constant 1.000000e+00 : f32
    %306 = vector.broadcast %cst_94 : f32 to vector<8x32xf32>
    %307 = arith.addf %306, %305 : vector<8x32xf32>
    %308 = arith.divf %306, %307 : vector<8x32xf32>
    %309 = vector.extract_strided_slice %299 {offsets = [0, 32], sizes = [8, 32], strides = [1, 1]} : vector<8x96xf32> to vector<8x32xf32>
    %310 = vector.extract_strided_slice %300 {offsets = [0, 32], sizes = [8, 32], strides = [1, 1]} : vector<8x96xf32> to vector<8x32xf32>
    %311 = arith.addf %309, %310 : vector<8x32xf32>
    %312 = arith.negf %311 : vector<8x32xf32>
    %313 = math.exp %312 : vector<8x32xf32>
    %cst_95 = arith.constant 1.000000e+00 : f32
    %314 = vector.broadcast %cst_95 : f32 to vector<8x32xf32>
    %315 = arith.addf %314, %313 : vector<8x32xf32>
    %316 = arith.divf %314, %315 : vector<8x32xf32>
    %317 = vector.extract_strided_slice %299 {offsets = [0, 64], sizes = [8, 32], strides = [1, 1]} : vector<8x96xf32> to vector<8x32xf32>
    %318 = vector.extract_strided_slice %300 {offsets = [0, 64], sizes = [8, 32], strides = [1, 1]} : vector<8x96xf32> to vector<8x32xf32>
    %319 = vector.broadcast %17 : vector<1x32xf32> to vector<8x32xf32>
    %320 = arith.addf %318, %319 : vector<8x32xf32>
    %321 = arith.mulf %308, %320 : vector<8x32xf32>
    %322 = arith.addf %317, %321 : vector<8x32xf32>
    %323 = math.tanh %322 : vector<8x32xf32>
    %cst_96 = arith.constant 1.000000e+00 : f32
    %324 = vector.broadcast %cst_96 : f32 to vector<8x32xf32>
    %325 = arith.subf %324, %316 : vector<8x32xf32>
    %326 = arith.mulf %325, %323 : vector<8x32xf32>
    %327 = arith.mulf %316, %266 : vector<8x32xf32>
    %328 = arith.addf %326, %327 : vector<8x32xf32>
    %c24_97 = arith.constant 24 : index
    %c0_98 = arith.constant 0 : index
    %329 = vector.load %arg22[%c24_97, %c0_98] : memref<64x32xf32, #tpu.memory_space<vmem>>, vector<8x32xf32>
    tpu.vector_store %arg22[%c24_97, %c0_98], %328 {strides = array<i32>} : memref<64x32xf32, #tpu.memory_space<vmem>>, vector<8x32xf32>,
    %c40_99 = arith.constant 40 : index
    %c0_100 = arith.constant 0 : index
    %330 = vector.load %arg23[%c40_99, %c0_100] : memref<64x96xf32, #tpu.memory_space<vmem>>, vector<8x96xf32>
    %cst_101 = arith.constant dense<0.000000e+00> : vector<8x96xf32>
    %331 = tpu.matmul %297, %14, %cst_101 {dimension_numbers = #tpu.dot_dimension_numbers<[1], [0], [0], [1], [0, 0, 1, 1], [], []>} : vector<8x32xf32>, vector<32x96xf32>, vector<8x96xf32> -> vector<8x96xf32>
    %332 = vector.extract_strided_slice %330 {offsets = [0, 0], sizes = [8, 32], strides = [1, 1]} : vector<8x96xf32> to vector<8x32xf32>
    %333 = vector.extract_strided_slice %331 {offsets = [0, 0], sizes = [8, 32], strides = [1, 1]} : vector<8x96xf32> to vector<8x32xf32>
    %334 = arith.addf %332, %333 : vector<8x32xf32>
    %335 = arith.negf %334 : vector<8x32xf32>
    %336 = math.exp %335 : vector<8x32xf32>
    %cst_102 = arith.constant 1.000000e+00 : f32
    %337 = vector.broadcast %cst_102 : f32 to vector<8x32xf32>
    %338 = arith.addf %337, %336 : vector<8x32xf32>
    %339 = arith.divf %337, %338 : vector<8x32xf32>
    %340 = vector.extract_strided_slice %330 {offsets = [0, 32], sizes = [8, 32], strides = [1, 1]} : vector<8x96xf32> to vector<8x32xf32>
    %341 = vector.extract_strided_slice %331 {offsets = [0, 32], sizes = [8, 32], strides = [1, 1]} : vector<8x96xf32> to vector<8x32xf32>
    %342 = arith.addf %340, %341 : vector<8x32xf32>
    %343 = arith.negf %342 : vector<8x32xf32>
    %344 = math.exp %343 : vector<8x32xf32>
    %cst_103 = arith.constant 1.000000e+00 : f32
    %345 = vector.broadcast %cst_103 : f32 to vector<8x32xf32>
    %346 = arith.addf %345, %344 : vector<8x32xf32>
    %347 = arith.divf %345, %346 : vector<8x32xf32>
    %348 = vector.extract_strided_slice %330 {offsets = [0, 64], sizes = [8, 32], strides = [1, 1]} : vector<8x96xf32> to vector<8x32xf32>
    %349 = vector.extract_strided_slice %331 {offsets = [0, 64], sizes = [8, 32], strides = [1, 1]} : vector<8x96xf32> to vector<8x32xf32>
    %350 = vector.broadcast %16 : vector<1x32xf32> to vector<8x32xf32>
    %351 = arith.addf %349, %350 : vector<8x32xf32>
    %352 = arith.mulf %339, %351 : vector<8x32xf32>
    %353 = arith.addf %348, %352 : vector<8x32xf32>
    %354 = math.tanh %353 : vector<8x32xf32>
    %cst_104 = arith.constant 1.000000e+00 : f32
    %355 = vector.broadcast %cst_104 : f32 to vector<8x32xf32>
    %356 = arith.subf %355, %347 : vector<8x32xf32>
    %357 = arith.mulf %356, %354 : vector<8x32xf32>
    %358 = arith.mulf %347, %297 : vector<8x32xf32>
    %359 = arith.addf %357, %358 : vector<8x32xf32>
    %c40_105 = arith.constant 40 : index
    %c0_106 = arith.constant 0 : index
    %360 = vector.load %arg21[%c40_105, %c0_106] : memref<64x32xf32, #tpu.memory_space<vmem>>, vector<8x32xf32>
    tpu.vector_store %arg21[%c40_105, %c0_106], %359 {strides = array<i32>} : memref<64x32xf32, #tpu.memory_space<vmem>>, vector<8x32xf32>,
    %c16_107 = arith.constant 16 : index
    %c0_108 = arith.constant 0 : index
    %361 = vector.load %arg24[%c16_107, %c0_108] : memref<64x96xf32, #tpu.memory_space<vmem>>, vector<8x96xf32>
    %cst_109 = arith.constant dense<0.000000e+00> : vector<8x96xf32>
    %362 = tpu.matmul %328, %15, %cst_109 {dimension_numbers = #tpu.dot_dimension_numbers<[1], [0], [0], [1], [0, 0, 1, 1], [], []>} : vector<8x32xf32>, vector<32x96xf32>, vector<8x96xf32> -> vector<8x96xf32>
    %363 = vector.extract_strided_slice %361 {offsets = [0, 0], sizes = [8, 32], strides = [1, 1]} : vector<8x96xf32> to vector<8x32xf32>
    %364 = vector.extract_strided_slice %362 {offsets = [0, 0], sizes = [8, 32], strides = [1, 1]} : vector<8x96xf32> to vector<8x32xf32>
    %365 = arith.addf %363, %364 : vector<8x32xf32>
    %366 = arith.negf %365 : vector<8x32xf32>
    %367 = math.exp %366 : vector<8x32xf32>
    %cst_110 = arith.constant 1.000000e+00 : f32
    %368 = vector.broadcast %cst_110 : f32 to vector<8x32xf32>
    %369 = arith.addf %368, %367 : vector<8x32xf32>
    %370 = arith.divf %368, %369 : vector<8x32xf32>
    %371 = vector.extract_strided_slice %361 {offsets = [0, 32], sizes = [8, 32], strides = [1, 1]} : vector<8x96xf32> to vector<8x32xf32>
    %372 = vector.extract_strided_slice %362 {offsets = [0, 32], sizes = [8, 32], strides = [1, 1]} : vector<8x96xf32> to vector<8x32xf32>
    %373 = arith.addf %371, %372 : vector<8x32xf32>
    %374 = arith.negf %373 : vector<8x32xf32>
    %375 = math.exp %374 : vector<8x32xf32>
    %cst_111 = arith.constant 1.000000e+00 : f32
    %376 = vector.broadcast %cst_111 : f32 to vector<8x32xf32>
    %377 = arith.addf %376, %375 : vector<8x32xf32>
    %378 = arith.divf %376, %377 : vector<8x32xf32>
    %379 = vector.extract_strided_slice %361 {offsets = [0, 64], sizes = [8, 32], strides = [1, 1]} : vector<8x96xf32> to vector<8x32xf32>
    %380 = vector.extract_strided_slice %362 {offsets = [0, 64], sizes = [8, 32], strides = [1, 1]} : vector<8x96xf32> to vector<8x32xf32>
    %381 = vector.broadcast %17 : vector<1x32xf32> to vector<8x32xf32>
    %382 = arith.addf %380, %381 : vector<8x32xf32>
    %383 = arith.mulf %370, %382 : vector<8x32xf32>
    %384 = arith.addf %379, %383 : vector<8x32xf32>
    %385 = math.tanh %384 : vector<8x32xf32>
    %cst_112 = arith.constant 1.000000e+00 : f32
    %386 = vector.broadcast %cst_112 : f32 to vector<8x32xf32>
    %387 = arith.subf %386, %378 : vector<8x32xf32>
    %388 = arith.mulf %387, %385 : vector<8x32xf32>
    %389 = arith.mulf %378, %328 : vector<8x32xf32>
    %390 = arith.addf %388, %389 : vector<8x32xf32>
    %c16_113 = arith.constant 16 : index
    %c0_114 = arith.constant 0 : index
    %391 = vector.load %arg22[%c16_113, %c0_114] : memref<64x32xf32, #tpu.memory_space<vmem>>, vector<8x32xf32>
    tpu.vector_store %arg22[%c16_113, %c0_114], %390 {strides = array<i32>} : memref<64x32xf32, #tpu.memory_space<vmem>>, vector<8x32xf32>,
    %c48_115 = arith.constant 48 : index
    %c0_116 = arith.constant 0 : index
    %392 = vector.load %arg23[%c48_115, %c0_116] : memref<64x96xf32, #tpu.memory_space<vmem>>, vector<8x96xf32>
    %cst_117 = arith.constant dense<0.000000e+00> : vector<8x96xf32>
    %393 = tpu.matmul %359, %14, %cst_117 {dimension_numbers = #tpu.dot_dimension_numbers<[1], [0], [0], [1], [0, 0, 1, 1], [], []>} : vector<8x32xf32>, vector<32x96xf32>, vector<8x96xf32> -> vector<8x96xf32>
    %394 = vector.extract_strided_slice %392 {offsets = [0, 0], sizes = [8, 32], strides = [1, 1]} : vector<8x96xf32> to vector<8x32xf32>
    %395 = vector.extract_strided_slice %393 {offsets = [0, 0], sizes = [8, 32], strides = [1, 1]} : vector<8x96xf32> to vector<8x32xf32>
    %396 = arith.addf %394, %395 : vector<8x32xf32>
    %397 = arith.negf %396 : vector<8x32xf32>
    %398 = math.exp %397 : vector<8x32xf32>
    %cst_118 = arith.constant 1.000000e+00 : f32
    %399 = vector.broadcast %cst_118 : f32 to vector<8x32xf32>
    %400 = arith.addf %399, %398 : vector<8x32xf32>
    %401 = arith.divf %399, %400 : vector<8x32xf32>
    %402 = vector.extract_strided_slice %392 {offsets = [0, 32], sizes = [8, 32], strides = [1, 1]} : vector<8x96xf32> to vector<8x32xf32>
    %403 = vector.extract_strided_slice %393 {offsets = [0, 32], sizes = [8, 32], strides = [1, 1]} : vector<8x96xf32> to vector<8x32xf32>
    %404 = arith.addf %402, %403 : vector<8x32xf32>
    %405 = arith.negf %404 : vector<8x32xf32>
    %406 = math.exp %405 : vector<8x32xf32>
    %cst_119 = arith.constant 1.000000e+00 : f32
    %407 = vector.broadcast %cst_119 : f32 to vector<8x32xf32>
    %408 = arith.addf %407, %406 : vector<8x32xf32>
    %409 = arith.divf %407, %408 : vector<8x32xf32>
    %410 = vector.extract_strided_slice %392 {offsets = [0, 64], sizes = [8, 32], strides = [1, 1]} : vector<8x96xf32> to vector<8x32xf32>
    %411 = vector.extract_strided_slice %393 {offsets = [0, 64], sizes = [8, 32], strides = [1, 1]} : vector<8x96xf32> to vector<8x32xf32>
    %412 = vector.broadcast %16 : vector<1x32xf32> to vector<8x32xf32>
    %413 = arith.addf %411, %412 : vector<8x32xf32>
    %414 = arith.mulf %401, %413 : vector<8x32xf32>
    %415 = arith.addf %410, %414 : vector<8x32xf32>
    %416 = math.tanh %415 : vector<8x32xf32>
    %cst_120 = arith.constant 1.000000e+00 : f32
    %417 = vector.broadcast %cst_120 : f32 to vector<8x32xf32>
    %418 = arith.subf %417, %409 : vector<8x32xf32>
    %419 = arith.mulf %418, %416 : vector<8x32xf32>
    %420 = arith.mulf %409, %359 : vector<8x32xf32>
    %421 = arith.addf %419, %420 : vector<8x32xf32>
    %c48_121 = arith.constant 48 : index
    %c0_122 = arith.constant 0 : index
    %422 = vector.load %arg21[%c48_121, %c0_122] : memref<64x32xf32, #tpu.memory_space<vmem>>, vector<8x32xf32>
    tpu.vector_store %arg21[%c48_121, %c0_122], %421 {strides = array<i32>} : memref<64x32xf32, #tpu.memory_space<vmem>>, vector<8x32xf32>,
    %c8_123 = arith.constant 8 : index
    %c0_124 = arith.constant 0 : index
    %423 = vector.load %arg24[%c8_123, %c0_124] : memref<64x96xf32, #tpu.memory_space<vmem>>, vector<8x96xf32>
    %cst_125 = arith.constant dense<0.000000e+00> : vector<8x96xf32>
    %424 = tpu.matmul %390, %15, %cst_125 {dimension_numbers = #tpu.dot_dimension_numbers<[1], [0], [0], [1], [0, 0, 1, 1], [], []>} : vector<8x32xf32>, vector<32x96xf32>, vector<8x96xf32> -> vector<8x96xf32>
    %425 = vector.extract_strided_slice %423 {offsets = [0, 0], sizes = [8, 32], strides = [1, 1]} : vector<8x96xf32> to vector<8x32xf32>
    %426 = vector.extract_strided_slice %424 {offsets = [0, 0], sizes = [8, 32], strides = [1, 1]} : vector<8x96xf32> to vector<8x32xf32>
    %427 = arith.addf %425, %426 : vector<8x32xf32>
    %428 = arith.negf %427 : vector<8x32xf32>
    %429 = math.exp %428 : vector<8x32xf32>
    %cst_126 = arith.constant 1.000000e+00 : f32
    %430 = vector.broadcast %cst_126 : f32 to vector<8x32xf32>
    %431 = arith.addf %430, %429 : vector<8x32xf32>
    %432 = arith.divf %430, %431 : vector<8x32xf32>
    %433 = vector.extract_strided_slice %423 {offsets = [0, 32], sizes = [8, 32], strides = [1, 1]} : vector<8x96xf32> to vector<8x32xf32>
    %434 = vector.extract_strided_slice %424 {offsets = [0, 32], sizes = [8, 32], strides = [1, 1]} : vector<8x96xf32> to vector<8x32xf32>
    %435 = arith.addf %433, %434 : vector<8x32xf32>
    %436 = arith.negf %435 : vector<8x32xf32>
    %437 = math.exp %436 : vector<8x32xf32>
    %cst_127 = arith.constant 1.000000e+00 : f32
    %438 = vector.broadcast %cst_127 : f32 to vector<8x32xf32>
    %439 = arith.addf %438, %437 : vector<8x32xf32>
    %440 = arith.divf %438, %439 : vector<8x32xf32>
    %441 = vector.extract_strided_slice %423 {offsets = [0, 64], sizes = [8, 32], strides = [1, 1]} : vector<8x96xf32> to vector<8x32xf32>
    %442 = vector.extract_strided_slice %424 {offsets = [0, 64], sizes = [8, 32], strides = [1, 1]} : vector<8x96xf32> to vector<8x32xf32>
    %443 = vector.broadcast %17 : vector<1x32xf32> to vector<8x32xf32>
    %444 = arith.addf %442, %443 : vector<8x32xf32>
    %445 = arith.mulf %432, %444 : vector<8x32xf32>
    %446 = arith.addf %441, %445 : vector<8x32xf32>
    %447 = math.tanh %446 : vector<8x32xf32>
    %cst_128 = arith.constant 1.000000e+00 : f32
    %448 = vector.broadcast %cst_128 : f32 to vector<8x32xf32>
    %449 = arith.subf %448, %440 : vector<8x32xf32>
    %450 = arith.mulf %449, %447 : vector<8x32xf32>
    %451 = arith.mulf %440, %390 : vector<8x32xf32>
    %452 = arith.addf %450, %451 : vector<8x32xf32>
    %c8_129 = arith.constant 8 : index
    %c0_130 = arith.constant 0 : index
    %453 = vector.load %arg22[%c8_129, %c0_130] : memref<64x32xf32, #tpu.memory_space<vmem>>, vector<8x32xf32>
    tpu.vector_store %arg22[%c8_129, %c0_130], %452 {strides = array<i32>} : memref<64x32xf32, #tpu.memory_space<vmem>>, vector<8x32xf32>,
    %c56_131 = arith.constant 56 : index
    %c0_132 = arith.constant 0 : index
    %454 = vector.load %arg23[%c56_131, %c0_132] : memref<64x96xf32, #tpu.memory_space<vmem>>, vector<8x96xf32>
    %cst_133 = arith.constant dense<0.000000e+00> : vector<8x96xf32>
    %455 = tpu.matmul %421, %14, %cst_133 {dimension_numbers = #tpu.dot_dimension_numbers<[1], [0], [0], [1], [0, 0, 1, 1], [], []>} : vector<8x32xf32>, vector<32x96xf32>, vector<8x96xf32> -> vector<8x96xf32>
    %456 = vector.extract_strided_slice %454 {offsets = [0, 0], sizes = [8, 32], strides = [1, 1]} : vector<8x96xf32> to vector<8x32xf32>
    %457 = vector.extract_strided_slice %455 {offsets = [0, 0], sizes = [8, 32], strides = [1, 1]} : vector<8x96xf32> to vector<8x32xf32>
    %458 = arith.addf %456, %457 : vector<8x32xf32>
    %459 = arith.negf %458 : vector<8x32xf32>
    %460 = math.exp %459 : vector<8x32xf32>
    %cst_134 = arith.constant 1.000000e+00 : f32
    %461 = vector.broadcast %cst_134 : f32 to vector<8x32xf32>
    %462 = arith.addf %461, %460 : vector<8x32xf32>
    %463 = arith.divf %461, %462 : vector<8x32xf32>
    %464 = vector.extract_strided_slice %454 {offsets = [0, 32], sizes = [8, 32], strides = [1, 1]} : vector<8x96xf32> to vector<8x32xf32>
    %465 = vector.extract_strided_slice %455 {offsets = [0, 32], sizes = [8, 32], strides = [1, 1]} : vector<8x96xf32> to vector<8x32xf32>
    %466 = arith.addf %464, %465 : vector<8x32xf32>
    %467 = arith.negf %466 : vector<8x32xf32>
    %468 = math.exp %467 : vector<8x32xf32>
    %cst_135 = arith.constant 1.000000e+00 : f32
    %469 = vector.broadcast %cst_135 : f32 to vector<8x32xf32>
    %470 = arith.addf %469, %468 : vector<8x32xf32>
    %471 = arith.divf %469, %470 : vector<8x32xf32>
    %472 = vector.extract_strided_slice %454 {offsets = [0, 64], sizes = [8, 32], strides = [1, 1]} : vector<8x96xf32> to vector<8x32xf32>
    %473 = vector.extract_strided_slice %455 {offsets = [0, 64], sizes = [8, 32], strides = [1, 1]} : vector<8x96xf32> to vector<8x32xf32>
    %474 = vector.broadcast %16 : vector<1x32xf32> to vector<8x32xf32>
    %475 = arith.addf %473, %474 : vector<8x32xf32>
    %476 = arith.mulf %463, %475 : vector<8x32xf32>
    %477 = arith.addf %472, %476 : vector<8x32xf32>
    %478 = math.tanh %477 : vector<8x32xf32>
    %cst_136 = arith.constant 1.000000e+00 : f32
    %479 = vector.broadcast %cst_136 : f32 to vector<8x32xf32>
    %480 = arith.subf %479, %471 : vector<8x32xf32>
    %481 = arith.mulf %480, %478 : vector<8x32xf32>
    %482 = arith.mulf %471, %421 : vector<8x32xf32>
    %483 = arith.addf %481, %482 : vector<8x32xf32>
    %c56_137 = arith.constant 56 : index
    %c0_138 = arith.constant 0 : index
    %484 = vector.load %arg21[%c56_137, %c0_138] : memref<64x32xf32, #tpu.memory_space<vmem>>, vector<8x32xf32>
    tpu.vector_store %arg21[%c56_137, %c0_138], %483 {strides = array<i32>} : memref<64x32xf32, #tpu.memory_space<vmem>>, vector<8x32xf32>,
    %c0_139 = arith.constant 0 : index
    %c0_140 = arith.constant 0 : index
    %485 = vector.load %arg24[%c0_139, %c0_140] : memref<64x96xf32, #tpu.memory_space<vmem>>, vector<8x96xf32>
    %cst_141 = arith.constant dense<0.000000e+00> : vector<8x96xf32>
    %486 = tpu.matmul %452, %15, %cst_141 {dimension_numbers = #tpu.dot_dimension_numbers<[1], [0], [0], [1], [0, 0, 1, 1], [], []>} : vector<8x32xf32>, vector<32x96xf32>, vector<8x96xf32> -> vector<8x96xf32>
    %487 = vector.extract_strided_slice %485 {offsets = [0, 0], sizes = [8, 32], strides = [1, 1]} : vector<8x96xf32> to vector<8x32xf32>
    %488 = vector.extract_strided_slice %486 {offsets = [0, 0], sizes = [8, 32], strides = [1, 1]} : vector<8x96xf32> to vector<8x32xf32>
    %489 = arith.addf %487, %488 : vector<8x32xf32>
    %490 = arith.negf %489 : vector<8x32xf32>
    %491 = math.exp %490 : vector<8x32xf32>
    %cst_142 = arith.constant 1.000000e+00 : f32
    %492 = vector.broadcast %cst_142 : f32 to vector<8x32xf32>
    %493 = arith.addf %492, %491 : vector<8x32xf32>
    %494 = arith.divf %492, %493 : vector<8x32xf32>
    %495 = vector.extract_strided_slice %485 {offsets = [0, 32], sizes = [8, 32], strides = [1, 1]} : vector<8x96xf32> to vector<8x32xf32>
    %496 = vector.extract_strided_slice %486 {offsets = [0, 32], sizes = [8, 32], strides = [1, 1]} : vector<8x96xf32> to vector<8x32xf32>
    %497 = arith.addf %495, %496 : vector<8x32xf32>
    %498 = arith.negf %497 : vector<8x32xf32>
    %499 = math.exp %498 : vector<8x32xf32>
    %cst_143 = arith.constant 1.000000e+00 : f32
    %500 = vector.broadcast %cst_143 : f32 to vector<8x32xf32>
    %501 = arith.addf %500, %499 : vector<8x32xf32>
    %502 = arith.divf %500, %501 : vector<8x32xf32>
    %503 = vector.extract_strided_slice %485 {offsets = [0, 64], sizes = [8, 32], strides = [1, 1]} : vector<8x96xf32> to vector<8x32xf32>
    %504 = vector.extract_strided_slice %486 {offsets = [0, 64], sizes = [8, 32], strides = [1, 1]} : vector<8x96xf32> to vector<8x32xf32>
    %505 = vector.broadcast %17 : vector<1x32xf32> to vector<8x32xf32>
    %506 = arith.addf %504, %505 : vector<8x32xf32>
    %507 = arith.mulf %494, %506 : vector<8x32xf32>
    %508 = arith.addf %503, %507 : vector<8x32xf32>
    %509 = math.tanh %508 : vector<8x32xf32>
    %cst_144 = arith.constant 1.000000e+00 : f32
    %510 = vector.broadcast %cst_144 : f32 to vector<8x32xf32>
    %511 = arith.subf %510, %502 : vector<8x32xf32>
    %512 = arith.mulf %511, %509 : vector<8x32xf32>
    %513 = arith.mulf %502, %452 : vector<8x32xf32>
    %514 = arith.addf %512, %513 : vector<8x32xf32>
    %c0_145 = arith.constant 0 : index
    %c0_146 = arith.constant 0 : index
    %515 = vector.load %arg22[%c0_145, %c0_146] : memref<64x32xf32, #tpu.memory_space<vmem>>, vector<8x32xf32>
    tpu.vector_store %arg22[%c0_145, %c0_146], %514 {strides = array<i32>} : memref<64x32xf32, #tpu.memory_space<vmem>>, vector<8x32xf32>,
    %c0_147 = arith.constant 0 : index
    %c0_148 = arith.constant 0 : index
    %516 = vector.load %arg11[%c0_147, %c0_148] : memref<1x96xf32, #tpu.memory_space<vmem>>, vector<1x96xf32>
    %c0_149 = arith.constant 0 : index
    %c0_150 = arith.constant 0 : index
    %517 = vector.load %arg21[%c0_149, %c0_150] : memref<64x32xf32, #tpu.memory_space<vmem>>, vector<64x32xf32>
    %c0_151 = arith.constant 0 : index
    %c0_152 = arith.constant 0 : index
    %c0_153 = arith.constant 0 : index
    %518 = vector.load %arg9[%c0_151, %c0_152, %c0_153] : memref<2x32x96xf32, #tpu.memory_space<vmem>>, vector<1x32x96xf32>
    %519 = vector.shape_cast %518 : vector<1x32x96xf32> to vector<32x96xf32>
    %cst_154 = arith.constant dense<0.000000e+00> : vector<64x96xf32>
    %520 = tpu.matmul %517, %519, %cst_154 {dimension_numbers = #tpu.dot_dimension_numbers<[1], [0], [0], [1], [0, 0, 1, 1], [], []>} : vector<64x32xf32>, vector<32x96xf32>, vector<64x96xf32> -> vector<64x96xf32>
    %521 = vector.broadcast %516 : vector<1x96xf32> to vector<64x96xf32>
    %522 = arith.addf %521, %520 : vector<64x96xf32>
    %c0_155 = arith.constant 0 : index
    %c0_156 = arith.constant 0 : index
    %523 = vector.load %arg22[%c0_155, %c0_156] : memref<64x32xf32, #tpu.memory_space<vmem>>, vector<64x32xf32>
    %c1 = arith.constant 1 : index
    %c0_157 = arith.constant 0 : index
    %c0_158 = arith.constant 0 : index
    %524 = vector.load %arg9[%c1, %c0_157, %c0_158] : memref<2x32x96xf32, #tpu.memory_space<vmem>>, vector<1x32x96xf32>
    %525 = vector.shape_cast %524 : vector<1x32x96xf32> to vector<32x96xf32>
    %cst_159 = arith.constant dense<0.000000e+00> : vector<64x96xf32>
    %526 = tpu.matmul %523, %525, %cst_159 {dimension_numbers = #tpu.dot_dimension_numbers<[1], [0], [0], [1], [0, 0, 1, 1], [], []>} : vector<64x32xf32>, vector<32x96xf32>, vector<64x96xf32> -> vector<64x96xf32>
    %527 = arith.addf %522, %526 : vector<64x96xf32>
    %c0_160 = arith.constant 0 : index
    %c0_161 = arith.constant 0 : index
    %528 = vector.load %arg23[%c0_160, %c0_161] : memref<64x96xf32, #tpu.memory_space<vmem>>, vector<64x96xf32>
    tpu.vector_store %arg23[%c0_160, %c0_161], %527 {strides = array<i32>} : memref<64x96xf32, #tpu.memory_space<vmem>>, vector<64x96xf32>,
    %c0_162 = arith.constant 0 : index
    %c0_163 = arith.constant 0 : index
    %529 = vector.load %arg15[%c0_162, %c0_163] : memref<1x96xf32, #tpu.memory_space<vmem>>, vector<1x96xf32>
    %c0_164 = arith.constant 0 : index
    %c0_165 = arith.constant 0 : index
    %530 = vector.load %arg21[%c0_164, %c0_165] : memref<64x32xf32, #tpu.memory_space<vmem>>, vector<64x32xf32>
    %c0_166 = arith.constant 0 : index
    %c0_167 = arith.constant 0 : index
    %c0_168 = arith.constant 0 : index
    %531 = vector.load %arg13[%c0_166, %c0_167, %c0_168] : memref<2x32x96xf32, #tpu.memory_space<vmem>>, vector<1x32x96xf32>
    %532 = vector.shape_cast %531 : vector<1x32x96xf32> to vector<32x96xf32>
    %cst_169 = arith.constant dense<0.000000e+00> : vector<64x96xf32>
    %533 = tpu.matmul %530, %532, %cst_169 {dimension_numbers = #tpu.dot_dimension_numbers<[1], [0], [0], [1], [0, 0, 1, 1], [], []>} : vector<64x32xf32>, vector<32x96xf32>, vector<64x96xf32> -> vector<64x96xf32>
    %534 = vector.broadcast %529 : vector<1x96xf32> to vector<64x96xf32>
    %535 = arith.addf %534, %533 : vector<64x96xf32>
    %c0_170 = arith.constant 0 : index
    %c0_171 = arith.constant 0 : index
    %536 = vector.load %arg22[%c0_170, %c0_171] : memref<64x32xf32, #tpu.memory_space<vmem>>, vector<64x32xf32>
    %c1_172 = arith.constant 1 : index
    %c0_173 = arith.constant 0 : index
    %c0_174 = arith.constant 0 : index
    %537 = vector.load %arg13[%c1_172, %c0_173, %c0_174] : memref<2x32x96xf32, #tpu.memory_space<vmem>>, vector<1x32x96xf32>
    %538 = vector.shape_cast %537 : vector<1x32x96xf32> to vector<32x96xf32>
    %cst_175 = arith.constant dense<0.000000e+00> : vector<64x96xf32>
    %539 = tpu.matmul %536, %538, %cst_175 {dimension_numbers = #tpu.dot_dimension_numbers<[1], [0], [0], [1], [0, 0, 1, 1], [], []>} : vector<64x32xf32>, vector<32x96xf32>, vector<64x96xf32> -> vector<64x96xf32>
    %540 = arith.addf %535, %539 : vector<64x96xf32>
    %c0_176 = arith.constant 0 : index
    %c0_177 = arith.constant 0 : index
    %541 = vector.load %arg24[%c0_176, %c0_177] : memref<64x96xf32, #tpu.memory_space<vmem>>, vector<64x96xf32>
    tpu.vector_store %arg24[%c0_176, %c0_177], %540 {strides = array<i32>} : memref<64x96xf32, #tpu.memory_space<vmem>>, vector<64x96xf32>,
    %c0_178 = arith.constant 0 : index
    %c0_179 = arith.constant 0 : index
    %542 = vector.load %arg10[%c0_178, %c0_179] : memref<32x96xf32, #tpu.memory_space<vmem>>, vector<32x96xf32>
    %c0_180 = arith.constant 0 : index
    %c0_181 = arith.constant 0 : index
    %543 = vector.load %arg14[%c0_180, %c0_181] : memref<32x96xf32, #tpu.memory_space<vmem>>, vector<32x96xf32>
    %c0_182 = arith.constant 0 : index
    %c0_183 = arith.constant 0 : index
    %544 = vector.load %arg12[%c0_182, %c0_183] : memref<1x32xf32, #tpu.memory_space<vmem>>, vector<1x32xf32>
    %c0_184 = arith.constant 0 : index
    %c0_185 = arith.constant 0 : index
    %545 = vector.load %arg16[%c0_184, %c0_185] : memref<1x32xf32, #tpu.memory_space<vmem>>, vector<1x32xf32>
    %cst_186 = arith.constant 0.000000e+00 : f32
    %546 = vector.broadcast %cst_186 : f32 to vector<8x32xf32>
    %cst_187 = arith.constant 0.000000e+00 : f32
    %547 = vector.broadcast %cst_187 : f32 to vector<8x32xf32>
    %c0_188 = arith.constant 0 : index
    %c0_189 = arith.constant 0 : index
    %548 = vector.load %arg23[%c0_188, %c0_189] : memref<64x96xf32, #tpu.memory_space<vmem>>, vector<8x96xf32>
    %cst_190 = arith.constant dense<0.000000e+00> : vector<8x96xf32>
    %549 = tpu.matmul %546, %542, %cst_190 {dimension_numbers = #tpu.dot_dimension_numbers<[1], [0], [0], [1], [0, 0, 1, 1], [], []>} : vector<8x32xf32>, vector<32x96xf32>, vector<8x96xf32> -> vector<8x96xf32>
    %550 = vector.extract_strided_slice %548 {offsets = [0, 0], sizes = [8, 32], strides = [1, 1]} : vector<8x96xf32> to vector<8x32xf32>
    %551 = vector.extract_strided_slice %549 {offsets = [0, 0], sizes = [8, 32], strides = [1, 1]} : vector<8x96xf32> to vector<8x32xf32>
    %552 = arith.addf %550, %551 : vector<8x32xf32>
    %553 = arith.negf %552 : vector<8x32xf32>
    %554 = math.exp %553 : vector<8x32xf32>
    %cst_191 = arith.constant 1.000000e+00 : f32
    %555 = vector.broadcast %cst_191 : f32 to vector<8x32xf32>
    %556 = arith.addf %555, %554 : vector<8x32xf32>
    %557 = arith.divf %555, %556 : vector<8x32xf32>
    %558 = vector.extract_strided_slice %548 {offsets = [0, 32], sizes = [8, 32], strides = [1, 1]} : vector<8x96xf32> to vector<8x32xf32>
    %559 = vector.extract_strided_slice %549 {offsets = [0, 32], sizes = [8, 32], strides = [1, 1]} : vector<8x96xf32> to vector<8x32xf32>
    %560 = arith.addf %558, %559 : vector<8x32xf32>
    %561 = arith.negf %560 : vector<8x32xf32>
    %562 = math.exp %561 : vector<8x32xf32>
    %cst_192 = arith.constant 1.000000e+00 : f32
    %563 = vector.broadcast %cst_192 : f32 to vector<8x32xf32>
    %564 = arith.addf %563, %562 : vector<8x32xf32>
    %565 = arith.divf %563, %564 : vector<8x32xf32>
    %566 = vector.extract_strided_slice %548 {offsets = [0, 64], sizes = [8, 32], strides = [1, 1]} : vector<8x96xf32> to vector<8x32xf32>
    %567 = vector.extract_strided_slice %549 {offsets = [0, 64], sizes = [8, 32], strides = [1, 1]} : vector<8x96xf32> to vector<8x32xf32>
    %568 = vector.broadcast %544 : vector<1x32xf32> to vector<8x32xf32>
    %569 = arith.addf %567, %568 : vector<8x32xf32>
    %570 = arith.mulf %557, %569 : vector<8x32xf32>
    %571 = arith.addf %566, %570 : vector<8x32xf32>
    %572 = math.tanh %571 : vector<8x32xf32>
    %cst_193 = arith.constant 1.000000e+00 : f32
    %573 = vector.broadcast %cst_193 : f32 to vector<8x32xf32>
    %574 = arith.subf %573, %565 : vector<8x32xf32>
    %575 = arith.mulf %574, %572 : vector<8x32xf32>
    %576 = arith.mulf %565, %546 : vector<8x32xf32>
    %577 = arith.addf %575, %576 : vector<8x32xf32>
    %c56_194 = arith.constant 56 : index
    %c0_195 = arith.constant 0 : index
    %578 = vector.load %arg24[%c56_194, %c0_195] : memref<64x96xf32, #tpu.memory_space<vmem>>, vector<8x96xf32>
    %cst_196 = arith.constant dense<0.000000e+00> : vector<8x96xf32>
    %579 = tpu.matmul %547, %543, %cst_196 {dimension_numbers = #tpu.dot_dimension_numbers<[1], [0], [0], [1], [0, 0, 1, 1], [], []>} : vector<8x32xf32>, vector<32x96xf32>, vector<8x96xf32> -> vector<8x96xf32>
    %580 = vector.extract_strided_slice %578 {offsets = [0, 0], sizes = [8, 32], strides = [1, 1]} : vector<8x96xf32> to vector<8x32xf32>
    %581 = vector.extract_strided_slice %579 {offsets = [0, 0], sizes = [8, 32], strides = [1, 1]} : vector<8x96xf32> to vector<8x32xf32>
    %582 = arith.addf %580, %581 : vector<8x32xf32>
    %583 = arith.negf %582 : vector<8x32xf32>
    %584 = math.exp %583 : vector<8x32xf32>
    %cst_197 = arith.constant 1.000000e+00 : f32
    %585 = vector.broadcast %cst_197 : f32 to vector<8x32xf32>
    %586 = arith.addf %585, %584 : vector<8x32xf32>
    %587 = arith.divf %585, %586 : vector<8x32xf32>
    %588 = vector.extract_strided_slice %578 {offsets = [0, 32], sizes = [8, 32], strides = [1, 1]} : vector<8x96xf32> to vector<8x32xf32>
    %589 = vector.extract_strided_slice %579 {offsets = [0, 32], sizes = [8, 32], strides = [1, 1]} : vector<8x96xf32> to vector<8x32xf32>
    %590 = arith.addf %588, %589 : vector<8x32xf32>
    %591 = arith.negf %590 : vector<8x32xf32>
    %592 = math.exp %591 : vector<8x32xf32>
    %cst_198 = arith.constant 1.000000e+00 : f32
    %593 = vector.broadcast %cst_198 : f32 to vector<8x32xf32>
    %594 = arith.addf %593, %592 : vector<8x32xf32>
    %595 = arith.divf %593, %594 : vector<8x32xf32>
    %596 = vector.extract_strided_slice %578 {offsets = [0, 64], sizes = [8, 32], strides = [1, 1]} : vector<8x96xf32> to vector<8x32xf32>
    %597 = vector.extract_strided_slice %579 {offsets = [0, 64], sizes = [8, 32], strides = [1, 1]} : vector<8x96xf32> to vector<8x32xf32>
    %598 = vector.broadcast %545 : vector<1x32xf32> to vector<8x32xf32>
    %599 = arith.addf %597, %598 : vector<8x32xf32>
    %600 = arith.mulf %587, %599 : vector<8x32xf32>
    %601 = arith.addf %596, %600 : vector<8x32xf32>
    %602 = math.tanh %601 : vector<8x32xf32>
    %cst_199 = arith.constant 1.000000e+00 : f32
    %603 = vector.broadcast %cst_199 : f32 to vector<8x32xf32>
    %604 = arith.subf %603, %595 : vector<8x32xf32>
    %605 = arith.mulf %604, %602 : vector<8x32xf32>
    %606 = arith.mulf %595, %547 : vector<8x32xf32>
    %607 = arith.addf %605, %606 : vector<8x32xf32>
    %c8_200 = arith.constant 8 : index
    %c0_201 = arith.constant 0 : index
    %608 = vector.load %arg23[%c8_200, %c0_201] : memref<64x96xf32, #tpu.memory_space<vmem>>, vector<8x96xf32>
    %cst_202 = arith.constant dense<0.000000e+00> : vector<8x96xf32>
    %609 = tpu.matmul %577, %542, %cst_202 {dimension_numbers = #tpu.dot_dimension_numbers<[1], [0], [0], [1], [0, 0, 1, 1], [], []>} : vector<8x32xf32>, vector<32x96xf32>, vector<8x96xf32> -> vector<8x96xf32>
    %610 = vector.extract_strided_slice %608 {offsets = [0, 0], sizes = [8, 32], strides = [1, 1]} : vector<8x96xf32> to vector<8x32xf32>
    %611 = vector.extract_strided_slice %609 {offsets = [0, 0], sizes = [8, 32], strides = [1, 1]} : vector<8x96xf32> to vector<8x32xf32>
    %612 = arith.addf %610, %611 : vector<8x32xf32>
    %613 = arith.negf %612 : vector<8x32xf32>
    %614 = math.exp %613 : vector<8x32xf32>
    %cst_203 = arith.constant 1.000000e+00 : f32
    %615 = vector.broadcast %cst_203 : f32 to vector<8x32xf32>
    %616 = arith.addf %615, %614 : vector<8x32xf32>
    %617 = arith.divf %615, %616 : vector<8x32xf32>
    %618 = vector.extract_strided_slice %608 {offsets = [0, 32], sizes = [8, 32], strides = [1, 1]} : vector<8x96xf32> to vector<8x32xf32>
    %619 = vector.extract_strided_slice %609 {offsets = [0, 32], sizes = [8, 32], strides = [1, 1]} : vector<8x96xf32> to vector<8x32xf32>
    %620 = arith.addf %618, %619 : vector<8x32xf32>
    %621 = arith.negf %620 : vector<8x32xf32>
    %622 = math.exp %621 : vector<8x32xf32>
    %cst_204 = arith.constant 1.000000e+00 : f32
    %623 = vector.broadcast %cst_204 : f32 to vector<8x32xf32>
    %624 = arith.addf %623, %622 : vector<8x32xf32>
    %625 = arith.divf %623, %624 : vector<8x32xf32>
    %626 = vector.extract_strided_slice %608 {offsets = [0, 64], sizes = [8, 32], strides = [1, 1]} : vector<8x96xf32> to vector<8x32xf32>
    %627 = vector.extract_strided_slice %609 {offsets = [0, 64], sizes = [8, 32], strides = [1, 1]} : vector<8x96xf32> to vector<8x32xf32>
    %628 = vector.broadcast %544 : vector<1x32xf32> to vector<8x32xf32>
    %629 = arith.addf %627, %628 : vector<8x32xf32>
    %630 = arith.mulf %617, %629 : vector<8x32xf32>
    %631 = arith.addf %626, %630 : vector<8x32xf32>
    %632 = math.tanh %631 : vector<8x32xf32>
    %cst_205 = arith.constant 1.000000e+00 : f32
    %633 = vector.broadcast %cst_205 : f32 to vector<8x32xf32>
    %634 = arith.subf %633, %625 : vector<8x32xf32>
    %635 = arith.mulf %634, %632 : vector<8x32xf32>
    %636 = arith.mulf %625, %577 : vector<8x32xf32>
    %637 = arith.addf %635, %636 : vector<8x32xf32>
    %c16_206 = arith.constant 16 : index
    %c0_207 = arith.constant 0 : index
    %638 = vector.load %arg23[%c16_206, %c0_207] : memref<64x96xf32, #tpu.memory_space<vmem>>, vector<8x96xf32>
    %cst_208 = arith.constant dense<0.000000e+00> : vector<8x96xf32>
    %639 = tpu.matmul %637, %542, %cst_208 {dimension_numbers = #tpu.dot_dimension_numbers<[1], [0], [0], [1], [0, 0, 1, 1], [], []>} : vector<8x32xf32>, vector<32x96xf32>, vector<8x96xf32> -> vector<8x96xf32>
    %640 = vector.extract_strided_slice %638 {offsets = [0, 0], sizes = [8, 32], strides = [1, 1]} : vector<8x96xf32> to vector<8x32xf32>
    %641 = vector.extract_strided_slice %639 {offsets = [0, 0], sizes = [8, 32], strides = [1, 1]} : vector<8x96xf32> to vector<8x32xf32>
    %642 = arith.addf %640, %641 : vector<8x32xf32>
    %643 = arith.negf %642 : vector<8x32xf32>
    %644 = math.exp %643 : vector<8x32xf32>
    %cst_209 = arith.constant 1.000000e+00 : f32
    %645 = vector.broadcast %cst_209 : f32 to vector<8x32xf32>
    %646 = arith.addf %645, %644 : vector<8x32xf32>
    %647 = arith.divf %645, %646 : vector<8x32xf32>
    %648 = vector.extract_strided_slice %638 {offsets = [0, 32], sizes = [8, 32], strides = [1, 1]} : vector<8x96xf32> to vector<8x32xf32>
    %649 = vector.extract_strided_slice %639 {offsets = [0, 32], sizes = [8, 32], strides = [1, 1]} : vector<8x96xf32> to vector<8x32xf32>
    %650 = arith.addf %648, %649 : vector<8x32xf32>
    %651 = arith.negf %650 : vector<8x32xf32>
    %652 = math.exp %651 : vector<8x32xf32>
    %cst_210 = arith.constant 1.000000e+00 : f32
    %653 = vector.broadcast %cst_210 : f32 to vector<8x32xf32>
    %654 = arith.addf %653, %652 : vector<8x32xf32>
    %655 = arith.divf %653, %654 : vector<8x32xf32>
    %656 = vector.extract_strided_slice %638 {offsets = [0, 64], sizes = [8, 32], strides = [1, 1]} : vector<8x96xf32> to vector<8x32xf32>
    %657 = vector.extract_strided_slice %639 {offsets = [0, 64], sizes = [8, 32], strides = [1, 1]} : vector<8x96xf32> to vector<8x32xf32>
    %658 = vector.broadcast %544 : vector<1x32xf32> to vector<8x32xf32>
    %659 = arith.addf %657, %658 : vector<8x32xf32>
    %660 = arith.mulf %647, %659 : vector<8x32xf32>
    %661 = arith.addf %656, %660 : vector<8x32xf32>
    %662 = math.tanh %661 : vector<8x32xf32>
    %cst_211 = arith.constant 1.000000e+00 : f32
    %663 = vector.broadcast %cst_211 : f32 to vector<8x32xf32>
    %664 = arith.subf %663, %655 : vector<8x32xf32>
    %665 = arith.mulf %664, %662 : vector<8x32xf32>
    %666 = arith.mulf %655, %637 : vector<8x32xf32>
    %667 = arith.addf %665, %666 : vector<8x32xf32>
    %c24_212 = arith.constant 24 : index
    %c0_213 = arith.constant 0 : index
    %668 = vector.load %arg23[%c24_212, %c0_213] : memref<64x96xf32, #tpu.memory_space<vmem>>, vector<8x96xf32>
    %cst_214 = arith.constant dense<0.000000e+00> : vector<8x96xf32>
    %669 = tpu.matmul %667, %542, %cst_214 {dimension_numbers = #tpu.dot_dimension_numbers<[1], [0], [0], [1], [0, 0, 1, 1], [], []>} : vector<8x32xf32>, vector<32x96xf32>, vector<8x96xf32> -> vector<8x96xf32>
    %670 = vector.extract_strided_slice %668 {offsets = [0, 0], sizes = [8, 32], strides = [1, 1]} : vector<8x96xf32> to vector<8x32xf32>
    %671 = vector.extract_strided_slice %669 {offsets = [0, 0], sizes = [8, 32], strides = [1, 1]} : vector<8x96xf32> to vector<8x32xf32>
    %672 = arith.addf %670, %671 : vector<8x32xf32>
    %673 = arith.negf %672 : vector<8x32xf32>
    %674 = math.exp %673 : vector<8x32xf32>
    %cst_215 = arith.constant 1.000000e+00 : f32
    %675 = vector.broadcast %cst_215 : f32 to vector<8x32xf32>
    %676 = arith.addf %675, %674 : vector<8x32xf32>
    %677 = arith.divf %675, %676 : vector<8x32xf32>
    %678 = vector.extract_strided_slice %668 {offsets = [0, 32], sizes = [8, 32], strides = [1, 1]} : vector<8x96xf32> to vector<8x32xf32>
    %679 = vector.extract_strided_slice %669 {offsets = [0, 32], sizes = [8, 32], strides = [1, 1]} : vector<8x96xf32> to vector<8x32xf32>
    %680 = arith.addf %678, %679 : vector<8x32xf32>
    %681 = arith.negf %680 : vector<8x32xf32>
    %682 = math.exp %681 : vector<8x32xf32>
    %cst_216 = arith.constant 1.000000e+00 : f32
    %683 = vector.broadcast %cst_216 : f32 to vector<8x32xf32>
    %684 = arith.addf %683, %682 : vector<8x32xf32>
    %685 = arith.divf %683, %684 : vector<8x32xf32>
    %686 = vector.extract_strided_slice %668 {offsets = [0, 64], sizes = [8, 32], strides = [1, 1]} : vector<8x96xf32> to vector<8x32xf32>
    %687 = vector.extract_strided_slice %669 {offsets = [0, 64], sizes = [8, 32], strides = [1, 1]} : vector<8x96xf32> to vector<8x32xf32>
    %688 = vector.broadcast %544 : vector<1x32xf32> to vector<8x32xf32>
    %689 = arith.addf %687, %688 : vector<8x32xf32>
    %690 = arith.mulf %677, %689 : vector<8x32xf32>
    %691 = arith.addf %686, %690 : vector<8x32xf32>
    %692 = math.tanh %691 : vector<8x32xf32>
    %cst_217 = arith.constant 1.000000e+00 : f32
    %693 = vector.broadcast %cst_217 : f32 to vector<8x32xf32>
    %694 = arith.subf %693, %685 : vector<8x32xf32>
    %695 = arith.mulf %694, %692 : vector<8x32xf32>
    %696 = arith.mulf %685, %667 : vector<8x32xf32>
    %697 = arith.addf %695, %696 : vector<8x32xf32>
    %c32_218 = arith.constant 32 : index
    %c0_219 = arith.constant 0 : index
    %698 = vector.load %arg23[%c32_218, %c0_219] : memref<64x96xf32, #tpu.memory_space<vmem>>, vector<8x96xf32>
    %cst_220 = arith.constant dense<0.000000e+00> : vector<8x96xf32>
    %699 = tpu.matmul %697, %542, %cst_220 {dimension_numbers = #tpu.dot_dimension_numbers<[1], [0], [0], [1], [0, 0, 1, 1], [], []>} : vector<8x32xf32>, vector<32x96xf32>, vector<8x96xf32> -> vector<8x96xf32>
    %700 = vector.extract_strided_slice %698 {offsets = [0, 0], sizes = [8, 32], strides = [1, 1]} : vector<8x96xf32> to vector<8x32xf32>
    %701 = vector.extract_strided_slice %699 {offsets = [0, 0], sizes = [8, 32], strides = [1, 1]} : vector<8x96xf32> to vector<8x32xf32>
    %702 = arith.addf %700, %701 : vector<8x32xf32>
    %703 = arith.negf %702 : vector<8x32xf32>
    %704 = math.exp %703 : vector<8x32xf32>
    %cst_221 = arith.constant 1.000000e+00 : f32
    %705 = vector.broadcast %cst_221 : f32 to vector<8x32xf32>
    %706 = arith.addf %705, %704 : vector<8x32xf32>
    %707 = arith.divf %705, %706 : vector<8x32xf32>
    %708 = vector.extract_strided_slice %698 {offsets = [0, 32], sizes = [8, 32], strides = [1, 1]} : vector<8x96xf32> to vector<8x32xf32>
    %709 = vector.extract_strided_slice %699 {offsets = [0, 32], sizes = [8, 32], strides = [1, 1]} : vector<8x96xf32> to vector<8x32xf32>
    %710 = arith.addf %708, %709 : vector<8x32xf32>
    %711 = arith.negf %710 : vector<8x32xf32>
    %712 = math.exp %711 : vector<8x32xf32>
    %cst_222 = arith.constant 1.000000e+00 : f32
    %713 = vector.broadcast %cst_222 : f32 to vector<8x32xf32>
    %714 = arith.addf %713, %712 : vector<8x32xf32>
    %715 = arith.divf %713, %714 : vector<8x32xf32>
    %716 = vector.extract_strided_slice %698 {offsets = [0, 64], sizes = [8, 32], strides = [1, 1]} : vector<8x96xf32> to vector<8x32xf32>
    %717 = vector.extract_strided_slice %699 {offsets = [0, 64], sizes = [8, 32], strides = [1, 1]} : vector<8x96xf32> to vector<8x32xf32>
    %718 = vector.broadcast %544 : vector<1x32xf32> to vector<8x32xf32>
    %719 = arith.addf %717, %718 : vector<8x32xf32>
    %720 = arith.mulf %707, %719 : vector<8x32xf32>
    %721 = arith.addf %716, %720 : vector<8x32xf32>
    %722 = math.tanh %721 : vector<8x32xf32>
    %cst_223 = arith.constant 1.000000e+00 : f32
    %723 = vector.broadcast %cst_223 : f32 to vector<8x32xf32>
    %724 = arith.subf %723, %715 : vector<8x32xf32>
    %725 = arith.mulf %724, %722 : vector<8x32xf32>
    %726 = arith.mulf %715, %697 : vector<8x32xf32>
    %727 = arith.addf %725, %726 : vector<8x32xf32>
    %c40_224 = arith.constant 40 : index
    %c0_225 = arith.constant 0 : index
    %728 = vector.load %arg23[%c40_224, %c0_225] : memref<64x96xf32, #tpu.memory_space<vmem>>, vector<8x96xf32>
    %cst_226 = arith.constant dense<0.000000e+00> : vector<8x96xf32>
    %729 = tpu.matmul %727, %542, %cst_226 {dimension_numbers = #tpu.dot_dimension_numbers<[1], [0], [0], [1], [0, 0, 1, 1], [], []>} : vector<8x32xf32>, vector<32x96xf32>, vector<8x96xf32> -> vector<8x96xf32>
    %730 = vector.extract_strided_slice %728 {offsets = [0, 0], sizes = [8, 32], strides = [1, 1]} : vector<8x96xf32> to vector<8x32xf32>
    %731 = vector.extract_strided_slice %729 {offsets = [0, 0], sizes = [8, 32], strides = [1, 1]} : vector<8x96xf32> to vector<8x32xf32>
    %732 = arith.addf %730, %731 : vector<8x32xf32>
    %733 = arith.negf %732 : vector<8x32xf32>
    %734 = math.exp %733 : vector<8x32xf32>
    %cst_227 = arith.constant 1.000000e+00 : f32
    %735 = vector.broadcast %cst_227 : f32 to vector<8x32xf32>
    %736 = arith.addf %735, %734 : vector<8x32xf32>
    %737 = arith.divf %735, %736 : vector<8x32xf32>
    %738 = vector.extract_strided_slice %728 {offsets = [0, 32], sizes = [8, 32], strides = [1, 1]} : vector<8x96xf32> to vector<8x32xf32>
    %739 = vector.extract_strided_slice %729 {offsets = [0, 32], sizes = [8, 32], strides = [1, 1]} : vector<8x96xf32> to vector<8x32xf32>
    %740 = arith.addf %738, %739 : vector<8x32xf32>
    %741 = arith.negf %740 : vector<8x32xf32>
    %742 = math.exp %741 : vector<8x32xf32>
    %cst_228 = arith.constant 1.000000e+00 : f32
    %743 = vector.broadcast %cst_228 : f32 to vector<8x32xf32>
    %744 = arith.addf %743, %742 : vector<8x32xf32>
    %745 = arith.divf %743, %744 : vector<8x32xf32>
    %746 = vector.extract_strided_slice %728 {offsets = [0, 64], sizes = [8, 32], strides = [1, 1]} : vector<8x96xf32> to vector<8x32xf32>
    %747 = vector.extract_strided_slice %729 {offsets = [0, 64], sizes = [8, 32], strides = [1, 1]} : vector<8x96xf32> to vector<8x32xf32>
    %748 = vector.broadcast %544 : vector<1x32xf32> to vector<8x32xf32>
    %749 = arith.addf %747, %748 : vector<8x32xf32>
    %750 = arith.mulf %737, %749 : vector<8x32xf32>
    %751 = arith.addf %746, %750 : vector<8x32xf32>
    %752 = math.tanh %751 : vector<8x32xf32>
    %cst_229 = arith.constant 1.000000e+00 : f32
    %753 = vector.broadcast %cst_229 : f32 to vector<8x32xf32>
    %754 = arith.subf %753, %745 : vector<8x32xf32>
    %755 = arith.mulf %754, %752 : vector<8x32xf32>
    %756 = arith.mulf %745, %727 : vector<8x32xf32>
    %757 = arith.addf %755, %756 : vector<8x32xf32>
    %c48_230 = arith.constant 48 : index
    %c0_231 = arith.constant 0 : index
    %758 = vector.load %arg23[%c48_230, %c0_231] : memref<64x96xf32, #tpu.memory_space<vmem>>, vector<8x96xf32>
    %cst_232 = arith.constant dense<0.000000e+00> : vector<8x96xf32>
    %759 = tpu.matmul %757, %542, %cst_232 {dimension_numbers = #tpu.dot_dimension_numbers<[1], [0], [0], [1], [0, 0, 1, 1], [], []>} : vector<8x32xf32>, vector<32x96xf32>, vector<8x96xf32> -> vector<8x96xf32>
    %760 = vector.extract_strided_slice %758 {offsets = [0, 0], sizes = [8, 32], strides = [1, 1]} : vector<8x96xf32> to vector<8x32xf32>
    %761 = vector.extract_strided_slice %759 {offsets = [0, 0], sizes = [8, 32], strides = [1, 1]} : vector<8x96xf32> to vector<8x32xf32>
    %762 = arith.addf %760, %761 : vector<8x32xf32>
    %763 = arith.negf %762 : vector<8x32xf32>
    %764 = math.exp %763 : vector<8x32xf32>
    %cst_233 = arith.constant 1.000000e+00 : f32
    %765 = vector.broadcast %cst_233 : f32 to vector<8x32xf32>
    %766 = arith.addf %765, %764 : vector<8x32xf32>
    %767 = arith.divf %765, %766 : vector<8x32xf32>
    %768 = vector.extract_strided_slice %758 {offsets = [0, 32], sizes = [8, 32], strides = [1, 1]} : vector<8x96xf32> to vector<8x32xf32>
    %769 = vector.extract_strided_slice %759 {offsets = [0, 32], sizes = [8, 32], strides = [1, 1]} : vector<8x96xf32> to vector<8x32xf32>
    %770 = arith.addf %768, %769 : vector<8x32xf32>
    %771 = arith.negf %770 : vector<8x32xf32>
    %772 = math.exp %771 : vector<8x32xf32>
    %cst_234 = arith.constant 1.000000e+00 : f32
    %773 = vector.broadcast %cst_234 : f32 to vector<8x32xf32>
    %774 = arith.addf %773, %772 : vector<8x32xf32>
    %775 = arith.divf %773, %774 : vector<8x32xf32>
    %776 = vector.extract_strided_slice %758 {offsets = [0, 64], sizes = [8, 32], strides = [1, 1]} : vector<8x96xf32> to vector<8x32xf32>
    %777 = vector.extract_strided_slice %759 {offsets = [0, 64], sizes = [8, 32], strides = [1, 1]} : vector<8x96xf32> to vector<8x32xf32>
    %778 = vector.broadcast %544 : vector<1x32xf32> to vector<8x32xf32>
    %779 = arith.addf %777, %778 : vector<8x32xf32>
    %780 = arith.mulf %767, %779 : vector<8x32xf32>
    %781 = arith.addf %776, %780 : vector<8x32xf32>
    %782 = math.tanh %781 : vector<8x32xf32>
    %cst_235 = arith.constant 1.000000e+00 : f32
    %783 = vector.broadcast %cst_235 : f32 to vector<8x32xf32>
    %784 = arith.subf %783, %775 : vector<8x32xf32>
    %785 = arith.mulf %784, %782 : vector<8x32xf32>
    %786 = arith.mulf %775, %757 : vector<8x32xf32>
    %787 = arith.addf %785, %786 : vector<8x32xf32>
    %c56_236 = arith.constant 56 : index
    %c0_237 = arith.constant 0 : index
    %788 = vector.load %arg23[%c56_236, %c0_237] : memref<64x96xf32, #tpu.memory_space<vmem>>, vector<8x96xf32>
    %cst_238 = arith.constant dense<0.000000e+00> : vector<8x96xf32>
    %789 = tpu.matmul %787, %542, %cst_238 {dimension_numbers = #tpu.dot_dimension_numbers<[1], [0], [0], [1], [0, 0, 1, 1], [], []>} : vector<8x32xf32>, vector<32x96xf32>, vector<8x96xf32> -> vector<8x96xf32>
    %790 = vector.extract_strided_slice %788 {offsets = [0, 0], sizes = [8, 32], strides = [1, 1]} : vector<8x96xf32> to vector<8x32xf32>
    %791 = vector.extract_strided_slice %789 {offsets = [0, 0], sizes = [8, 32], strides = [1, 1]} : vector<8x96xf32> to vector<8x32xf32>
    %792 = arith.addf %790, %791 : vector<8x32xf32>
    %793 = arith.negf %792 : vector<8x32xf32>
    %794 = math.exp %793 : vector<8x32xf32>
    %cst_239 = arith.constant 1.000000e+00 : f32
    %795 = vector.broadcast %cst_239 : f32 to vector<8x32xf32>
    %796 = arith.addf %795, %794 : vector<8x32xf32>
    %797 = arith.divf %795, %796 : vector<8x32xf32>
    %798 = vector.extract_strided_slice %788 {offsets = [0, 32], sizes = [8, 32], strides = [1, 1]} : vector<8x96xf32> to vector<8x32xf32>
    %799 = vector.extract_strided_slice %789 {offsets = [0, 32], sizes = [8, 32], strides = [1, 1]} : vector<8x96xf32> to vector<8x32xf32>
    %800 = arith.addf %798, %799 : vector<8x32xf32>
    %801 = arith.negf %800 : vector<8x32xf32>
    %802 = math.exp %801 : vector<8x32xf32>
    %cst_240 = arith.constant 1.000000e+00 : f32
    %803 = vector.broadcast %cst_240 : f32 to vector<8x32xf32>
    %804 = arith.addf %803, %802 : vector<8x32xf32>
    %805 = arith.divf %803, %804 : vector<8x32xf32>
    %806 = vector.extract_strided_slice %788 {offsets = [0, 64], sizes = [8, 32], strides = [1, 1]} : vector<8x96xf32> to vector<8x32xf32>
    %807 = vector.extract_strided_slice %789 {offsets = [0, 64], sizes = [8, 32], strides = [1, 1]} : vector<8x96xf32> to vector<8x32xf32>
    %808 = vector.broadcast %544 : vector<1x32xf32> to vector<8x32xf32>
    %809 = arith.addf %807, %808 : vector<8x32xf32>
    %810 = arith.mulf %797, %809 : vector<8x32xf32>
    %811 = arith.addf %806, %810 : vector<8x32xf32>
    %812 = math.tanh %811 : vector<8x32xf32>
    %cst_241 = arith.constant 1.000000e+00 : f32
    %813 = vector.broadcast %cst_241 : f32 to vector<8x32xf32>
    %814 = arith.subf %813, %805 : vector<8x32xf32>
    %815 = arith.mulf %814, %812 : vector<8x32xf32>
    %816 = arith.mulf %805, %787 : vector<8x32xf32>
    %817 = arith.addf %815, %816 : vector<8x32xf32>
    %c0_242 = arith.constant 0 : index
    %c0_243 = arith.constant 0 : index
    %818 = vector.load %arg19[%c0_242, %c0_243] : memref<1x1xf32, #tpu.memory_space<vmem>>, vector<1x1xf32>
    %c0_244 = arith.constant 0 : index
    %c0_245 = arith.constant 0 : index
    %819 = vector.load %arg17[%c0_244, %c0_245] : memref<32x1xf32, #tpu.memory_space<vmem>>, vector<32x1xf32>
    %cst_246 = arith.constant dense<0.000000e+00> : vector<8x1xf32>
    %820 = tpu.matmul %817, %819, %cst_246 {dimension_numbers = #tpu.dot_dimension_numbers<[1], [0], [0], [1], [0, 0, 1, 1], [], []>} : vector<8x32xf32>, vector<32x1xf32>, vector<8x1xf32> -> vector<8x1xf32>
    %821 = vector.broadcast %818 : vector<1x1xf32> to vector<8x1xf32>
    %822 = arith.addf %821, %820 : vector<8x1xf32>
    %c0_247 = arith.constant 0 : index
    %c0_248 = arith.constant 0 : index
    %823 = vector.load %arg18[%c0_247, %c0_248] : memref<32x1xf32, #tpu.memory_space<vmem>>, vector<32x1xf32>
    %cst_249 = arith.constant dense<0.000000e+00> : vector<8x1xf32>
    %824 = tpu.matmul %607, %823, %cst_249 {dimension_numbers = #tpu.dot_dimension_numbers<[1], [0], [0], [1], [0, 0, 1, 1], [], []>} : vector<8x32xf32>, vector<32x1xf32>, vector<8x1xf32> -> vector<8x1xf32>
    %825 = arith.addf %822, %824 : vector<8x1xf32>
    %826 = arith.negf %825 : vector<8x1xf32>
    %827 = math.exp %826 : vector<8x1xf32>
    %cst_250 = arith.constant 1.000000e+00 : f32
    %828 = vector.broadcast %cst_250 : f32 to vector<8x1xf32>
    %829 = arith.addf %828, %827 : vector<8x1xf32>
    %830 = arith.divf %828, %829 : vector<8x1xf32>
    %c0_251 = arith.constant 0 : index
    %c0_252 = arith.constant 0 : index
    %831 = vector.load %arg20[%c0_251, %c0_252] : memref<8x1xf32, #tpu.memory_space<vmem>>, vector<8x1xf32>
    tpu.vector_store %arg20[%c0_251, %c0_252], %830 {strides = array<i32>} : memref<8x1xf32, #tpu.memory_space<vmem>>, vector<8x1xf32>,
    return
  }
}

</mosaic_0001>

<bundles_post_ra>
// kernel: lstm_net_forward.1
= control target key start
LH: loop header
LB: loop body
LE: loop exit
PB: predicated region body
PF: predicated region fallthrough
CT: control target
= control target key end

     0   :  { %vm84_vm0 = vcmask 130048   ;;  %v4955_v13 = vmov 0.0|0.0   ;;  %vm4957_vm1 = vmmov 0   ;;  %v4958_v29 = vmov 0.0   ;;  %s5740_s1 = inlined_call_operand.vmem [shape: f32[16,96], index: 1, kind: input, shape index: {}]   ;;  %s5741_s5 = inlined_call_operand.vmem [shape: f32[16,96], index: 5, kind: input, shape index: {}]   ;;  %s5742_s0 = inlined_call_operand.vmem [shape: f32[64,16], index: 0, kind: input, shape index: {}]   ;;  %s5743_s2 = inlined_call_operand.vmem [shape: f32[32,96], index: 2, kind: input, shape index: {}]   ;;  %s5744_s6 = inlined_call_operand.vmem [shape: f32[32,96], index: 6, kind: input, shape index: {}]   ;;  %s5745_s4 = inlined_call_operand.vmem [shape: f32[1,32], index: 4, kind: input, shape index: {}]   ;;  %s5746_s8 = inlined_call_operand.vmem [shape: f32[1,32], index: 8, kind: input, shape index: {}]   ;;  %s5747_s3 = inlined_call_operand.vmem [shape: f32[1,96], index: 3, kind: input, shape index: {}]   ;;  %s5748_s7 = inlined_call_operand.vmem [shape: f32[1,96], index: 7, kind: input, shape index: {}]   ;;  %s5749_s9 = inlined_call_operand.vmem [shape: f32[2,32,96], index: 9, kind: input, shape index: {}]   ;;  %s5750_s13 = inlined_call_operand.vmem [shape: f32[2,32,96], index: 13, kind: input, shape index: {}]   ;;  %s5751_s12 = inlined_call_operand.vmem [shape: f32[1,32], index: 12, kind: input, shape index: {}]   ;;  %s5752_s10 = inlined_call_operand.vmem [shape: f32[32,96], index: 10, kind: input, shape index: {}]   ;;  %s5753_s14 = inlined_call_operand.vmem [shape: f32[32,96], index: 14, kind: input, shape index: {}]   ;;  %s5754_s11 = inlined_call_operand.vmem [shape: f32[1,96], index: 11, kind: input, shape index: {}]   ;;  %s5755_s15 = inlined_call_operand.vmem [shape: f32[1,96], index: 15, kind: input, shape index: {}]   ;;  %s5756_s16 = inlined_call_operand.vmem [shape: f32[1,32], index: 16, kind: input, shape index: {}]   ;;  %s5757_s17 = inlined_call_operand.vmem [shape: f32[32,1], index: 17, kind: input, shape index: {}]   ;;  %s5758_s19 = inlined_call_operand.<no memory space> [shape: f32[1,1], index: 19, kind: input, shape index: {}]   ;;  %s5759_s18 = inlined_call_operand.vmem [shape: f32[32,1], index: 18, kind: input, shape index: {}]   ;;  %s5760_s20 = inlined_call_operand.vmem [shape: f32[8,1], index: 20, kind: output, shape index: {}]  }
   0x1   :  { %5766 = sst [smem:[#allocation7_spill]] %s5740_s1  ;;  %v3852_v18 = vld [vmem:[%s5745_s4] ss:$0 sm:$0xff]  ;;  %vm214_vm2 = vcmask 785408   ;;  %vm388_vm3 = vcmask 261120   ;;  %vm3827_vm4 = vcmask 7168  }
   0x2   :  { %5767 = sst [smem:[#allocation8_spill]] %s5741_s5  ;;  %s5771_s23 = sld [smem:[#allocation7_spill]]  ;;  %v3854_v25 = vld [vmem:[%s5746_s8] ss:$0 sm:$0xff] }
   0x3   :  { %5768 = sst [smem:[#allocation9_spill]] %s5742_s0  ;;  %s5772_s26 = sld [smem:[#allocation8_spill]]  ;;  %v3833_v30 = vld [vmem:[%s5747_s3] ss:$0 sm:$0xff] }
   0x4   :  { %5769 = sst [smem:[#allocation10_spill]] %s5743_s2  ;;  %s5773_s30 = sld [smem:[#allocation9_spill]]  ;;  %v3842_v31 = vld [vmem:[%s5748_s7] ss:$0 sm:$0xff] }
   0x5   :  { %5770 = sst [smem:[#allocation11_spill]] %s5744_s6  ;;  %s5774_s5 = sld [smem:[#allocation10_spill]] }
   0x6   :  { %s5775_s25 = sld [smem:[#allocation11_spill]]  ;;  %s4956_s6 = smov 64  }
   0x7   :  { %474 = vrot.lane.b32.xlu0 %v3852_v18, %s4956_s6  ;;  %s4959_s3 = smov 96  }
   0x8   :  { %v75_v0 = vld [vmem:[%s5771_s23] sm:$0xff]  ;;  %v76_v1 = vld [vmem:[%s5771_s23 + $0x8] sm:$0xff] }
   0x9   :  { %v231_v2 = vld [vmem:[%s5772_s26] sm:$0xff]  ;;  %v4559_v3 = vpack.c.bf16 %v76_v1, %v75_v0  ;;  %v232_v4 = vld [vmem:[%s5772_s26 + $0x8] sm:$0xff] }
   0xa   :  { %v67_v5 = vld [vmem:[%s5773_s30] sm:$0xff]  ;;  %v4563_v6 = vpack.c.bf16 %v232_v4, %v231_v2  ;;  %v68_v11 = vld [vmem:[%s5773_s30 + $0x8] sm:$0xff]  ;;  %v69_v14 = vld [vmem:[%s5773_s30 + $0x10] sm:$0xff] }
   0xb   :  { %4154 = vmatprep.mubr.msk.f32.mxu0 %vm84_vm0, %v67_v5  ;;  %4170 = vmatprep.mubr.msk.f32.mxu1 %vm84_vm0, %v67_v5  ;;  %v377_v7 = vld [vmem:[%s5774_s5] sm:$0xff]  ;;  %v378_v8 = vld [vmem:[%s5774_s5 + $0x8] sm:$0xff]  ;;  %v379_v16 = vld [vmem:[%s5774_s5 + $0x10] sm:$0xff] }
   0xc   :  { %4560 = vmatprep.subr.bf16.mxu0 %v4559_v3  ;;  %v381_v9 = vld [vmem:[%s5775_s25] sm:$0xff]  ;;  %v382_v10 = vld [vmem:[%s5775_s25 + $0x8] sm:$0xff]  ;;  %4564 = vmatprep.subr.bf16.mxu1 %v4563_v6  ;;  %v5097_v12 = vpack.c.bf16 %v378_v8, %v377_v7  ;;  %v380_v17 = vld [vmem:[%s5774_s5 + $0x18] sm:$0xff] }
   0xd   :  { %4562 = vmatpush3.bf16.msra.mxu0 %v4559_v3  ;;  %4566 = vmatpush3.bf16.msra.mxu1 %v4563_v6  ;;  %v5104_v15 = vpack.c.bf16 %v382_v10, %v381_v9  ;;  %v383_v19 = vld [vmem:[%s5775_s25 + $0x10] sm:$0xff]  ;;  %v384_v20 = vld [vmem:[%s5775_s25 + $0x18] sm:$0xff]  ;;  %v71_v22 = vld [vmem:[%s5773_s30 + $0x20] sm:$0xff]  ;;  %v5133_v23 = vpack.c.bf16 %v380_v17, %v379_v16 }
   0xe   :  { %4567 = vmatprep.subr.bf16.mxu0 %v4955_v13  ;;  %4573 = vmatprep.subr.bf16.mxu1 %v4955_v13  ;;  %v70_v21 = vld [vmem:[%s5773_s30 + $0x18] sm:$0xff]  ;;  %v5137_v24 = vpack.c.bf16 %v384_v20, %v383_v19  ;;  %v72_v26 = vld [vmem:[%s5773_s30 + $0x28] sm:$0xff]  ;;  %v73_v27 = vld [vmem:[%s5773_s30 + $0x30] sm:$0xff] }
   0xf   :  { %585 = vrot.lane.b32.xlu0 %v3854_v25, %s4956_s6  ;;  %v74_v28 = vld [vmem:[%s5773_s30 + $0x38] sm:$0xff] }
  0x10   :  { %4155 = vmatmul.mubr.msk.f32.vlgmr.msra.gmra.mrb[0].mxu0 %vm84_vm0, %v68_v11  ;;  %4171 = vmatmul.mubr.msk.f32.vlgmr.msra.gmra.mrb[0].mxu1 %vm84_vm0, %v68_v11 }
  0x11   :  { %4569 = vmatpush3.bf16.msra.mxu0 %v5097_v12  ;;  %4157 = vmatprep.mubr.msk.f32.mxu0 %vm84_vm0, %v69_v14 }
  0x12   :  { %4173 = vmatprep.mubr.msk.f32.mxu1 %vm84_vm0, %v69_v14  ;;  %4575 = vmatpush3.bf16.msra.mxu1 %v5104_v15 }
  0x13   :  { %4570 = vmatprep.subr.bf16.mxu0 %v4955_v13  ;;  %4576 = vmatprep.subr.bf16.mxu1 %v4955_v13 }
  0x14   :  { %4158 = vmatmul.mubr.msk.f32.gmra.mrb[2].mxu0 %vm84_vm0, %v70_v21  ;;  %4174 = vmatmul.mubr.msk.f32.gmra.mrb[2].mxu1 %vm84_vm0, %v70_v21 }
  0x15   :  { %4160 = vmatprep.mubr.msk.f32.mxu0 %vm84_vm0, %v71_v22  ;;  %4176 = vmatprep.mubr.msk.f32.mxu1 %vm84_vm0, %v71_v22 }
  0x16   :  { %4572 = vmatpush3.bf16.msra.mxu0 %v5133_v23  ;;  %4578 = vmatpush3.bf16.msra.mxu1 %v5137_v24 }
  0x17   :  { %4579 = vmatprep.subr.bf16.mxu0 %v4955_v13  ;;  %4585 = vmatprep.subr.bf16.mxu1 %v4955_v13 }
  0x18   :  { %4161 = vmatmul.mubr.msk.f32.gmra.mrb[4].mxu0 %vm84_vm0, %v72_v26  ;;  %4177 = vmatmul.mubr.msk.f32.gmra.mrb[4].mxu1 %vm84_vm0, %v72_v26 }
  0x19   :  { %4163 = vmatprep.mubr.msk.f32.mxu0 %vm84_vm0, %v73_v27  ;;  %4179 = vmatprep.mubr.msk.f32.mxu1 %vm84_vm0, %v73_v27 }
  0x1c   :  { %4164 = vmatmul.mubr.msk.f32.gmra.mrb[6].mxu0 %vm84_vm0, %v74_v28  ;;  %4180 = vmatmul.mubr.msk.f32.gmra.mrb[6].mxu1 %vm84_vm0, %v74_v28 }
  0x1d   :  { %4190 = vmatprep.mubr.msk.f32.mxu0 %vm4957_vm1, %v4958_v29  ;;  %4201 = vmatprep.mubr.msk.f32.mxu1 %vm4957_vm1, %v4958_v29 }
  0x20   :  { %4191 = vmatmul.mubr.f32.vlgmr.msra.gmra.mrb[8].mxu0 %v4958_v29  ;;  %4202 = vmatmul.mubr.f32.vlgmr.msra.gmra.mrb[8].mxu1 %v4958_v29 }
  0x21   :  { %4581 = vmatpush3.bf16.msra.mxu0 %v5097_v12  ;;  %4587 = vmatpush3.bf16.msra.mxu1 %v5104_v15 }
  0x22   :  { %4582 = vmatprep.subr.bf16.mxu0 %v4955_v13  ;;  %4212 = vmatprep.mubr.msk.f32.mxu0 %vm4957_vm1, %v4958_v29 }
  0x23   :  { %4588 = vmatprep.subr.bf16.mxu1 %v4955_v13  ;;  %4223 = vmatprep.mubr.msk.f32.mxu1 %vm4957_vm1, %v4958_v29 }
  0x25   :  { %4584 = vmatpush3.bf16.msra.mxu0 %v5133_v23  ;;  %4590 = vmatpush3.bf16.msra.mxu1 %v5137_v24 }
  0x26   :  { %4591 = vmatprep.subr.bf16.mxu0 %v4955_v13  ;;  %4597 = vmatprep.subr.bf16.mxu1 %v4955_v13 }
  0x79   :  { %v5199_v55 = vpop.permute.xlu0 %474 }
  0x81   :  { %v5208_v2 = vpop.permute.xlu0 %585 }
  0xe3   :  { %v4156_v32 = vpop.f32.mrb[0].mxu0  ;;  %v4172_v35 = vpop.f32.mrb[0].mxu1 }
  0xe4   :  { %v181_v33 = vadd.f32 %v4156_v32, %v3833_v30  ;;  %v175_v34 = vpop.f32.mrb[1].mxu0  ;;  %v336_v37 = vadd.f32 %v4172_v35, %v3842_v31  ;;  %v330_v38 = vpop.f32.mrb[1].mxu1 }
  0xe5   :  { %v176_v36 = vadd.f32 %v3833_v30, %v175_v34  ;;  %v331_v39 = vadd.f32 %v3842_v31, %v330_v38 }
  0xe6   :  { %216 = vst.msk [vmem:[#allocation4 + $0x8] sm:$0xff] %vm214_vm2, %v181_v33  ;;  %370 = vst.msk [vmem:[#allocation5 + $0x8] sm:$0xff] %vm214_vm2, %v336_v37 }
  0xe7   :  { %215 = vst.msk [vmem:[#allocation4] sm:$0xff] %vm214_vm2, %v176_v36  ;;  %v4159_v40 = vpop.f32.mrb[2].mxu0  ;;  %369 = vst.msk [vmem:[#allocation5] sm:$0xff] %vm214_vm2, %v331_v39  ;;  %v4175_v43 = vpop.f32.mrb[2].mxu1 }
  0xe8   :  { %v191_v41 = vadd.f32 %v4159_v40, %v3833_v30  ;;  %v185_v42 = vpop.f32.mrb[3].mxu0  ;;  %v346_v45 = vadd.f32 %v4175_v43, %v3842_v31  ;;  %v340_v46 = vpop.f32.mrb[3].mxu1 }
  0xe9   :  { %v186_v44 = vadd.f32 %v3833_v30, %v185_v42  ;;  %v341_v47 = vadd.f32 %v3842_v31, %v340_v46 }
  0xea   :  { %218 = vst.msk [vmem:[#allocation4 + $0x18] sm:$0xff] %vm214_vm2, %v191_v41  ;;  %372 = vst.msk [vmem:[#allocation5 + $0x18] sm:$0xff] %vm214_vm2, %v346_v45 }
  0xeb   :  { %217 = vst.msk [vmem:[#allocation4 + $0x10] sm:$0xff] %vm214_vm2, %v186_v44  ;;  %v4162_v48 = vpop.f32.mrb[4].mxu0  ;;  %371 = vst.msk [vmem:[#allocation5 + $0x10] sm:$0xff] %vm214_vm2, %v341_v47  ;;  %v4178_v51 = vpop.f32.mrb[4].mxu1 }
  0xec   :  { %v201_v49 = vadd.f32 %v4162_v48, %v3833_v30  ;;  %v195_v50 = vpop.f32.mrb[5].mxu0  ;;  %v356_v53 = vadd.f32 %v4178_v51, %v3842_v31  ;;  %v350_v54 = vpop.f32.mrb[5].mxu1 }
  0xed   :  { %v196_v52 = vadd.f32 %v3833_v30, %v195_v50  ;;  %v351_v56 = vadd.f32 %v3842_v31, %v350_v54  ;;  %v613_v54 = vld [vmem:[#allocation4 + $0x8] sm:$0xff] }
  0xee   :  { %220 = vst.msk [vmem:[#allocation4 + $0x28] sm:$0xff] %vm214_vm2, %v201_v49  ;;  %374 = vst.msk [vmem:[#allocation5 + $0x28] sm:$0xff] %vm214_vm2, %v356_v53  ;;  %v387_v8 = vld [vmem:[#allocation4] sm:$0xff] }
  0xef   :  { %219 = vst.msk [vmem:[#allocation4 + $0x20] sm:$0xff] %vm214_vm2, %v196_v52  ;;  %v4165_v57 = vpop.f32.mrb[6].mxu0  ;;  %373 = vst.msk [vmem:[#allocation5 + $0x20] sm:$0xff] %vm214_vm2, %v351_v56  ;;  %v4181_v59 = vpop.f32.mrb[6].mxu1 }
  0xf0   :  { %v211_v58 = vadd.f32 %v4165_v57, %v3833_v30  ;;  %v205_v60 = vpop.f32.mrb[7].mxu0  ;;  %v366_v61 = vadd.f32 %v4181_v59, %v3842_v31  ;;  %v360_v63 = vpop.f32.mrb[7].mxu1 }
  0xf1   :  { %v206_v62 = vadd.f32 %v3833_v30, %v205_v60  ;;  %v361_v0 = vadd.f32 %v3842_v31, %v360_v63 }
  0xf2   :  { %222 = vst.msk [vmem:[#allocation4 + $0x38] sm:$0xff] %vm214_vm2, %v211_v58  ;;  %376 = vst.msk [vmem:[#allocation5 + $0x38] sm:$0xff] %vm214_vm2, %v366_v61 }
  0xf3   :  { %221 = vst.msk [vmem:[#allocation4 + $0x30] sm:$0xff] %vm214_vm2, %v206_v62  ;;  %v458_v1 = vpop.f32.mrb[8].mxu0  ;;  %375 = vst.msk [vmem:[#allocation5 + $0x30] sm:$0xff] %vm214_vm2, %v361_v0  ;;  %v569_v5 = vpop.f32.mrb[8].mxu1 }
  0xf4   :  { %v4192_v3 = vpop.f32.mrb[9].mxu0  ;;  %v477_v4 = vadd.f32 %v5199_v55, %v458_v1  ;;  %v4203_v6 = vpop.f32.mrb[9].mxu1  ;;  %v588_v7 = vadd.f32 %v5208_v2, %v569_v5  ;;  %v462_v9 = vadd.f32 %v458_v1, %v387_v8 }
  0xf6   :  { %479 = vrot.lane.b32.xlu1 %v477_v4, %s4956_s6  ;;  %v3851_v11 = vmul.f32 -1.442695, %v462_v9 }
  0xf8   :  { %4801 = vpow2.f32 %v3851_v11 }
  0xf9   :  { %v502_v10 = vld [vmem:[#allocation5 + $0x38] sm:$0xff] }
  0xfa   :  { %590 = vrot.lane.b32.xlu1 %v588_v7, %s4956_s6  ;;  %v573_v14 = vadd.f32 %v569_v5, %v502_v10  ;;  %v718_v57 = vld [vmem:[#allocation5 + $0x30] sm:$0xff] }
  0xfc   :  { %v3853_v16 = vmul.f32 -1.442695, %v573_v14 }
  0xfe   :  { %4803 = vpow2.f32 %v3853_v16 }
 0x102   :  { %v4802_v17 = vpop.eup %4801 }
 0x103   :  { %v466_v18 = vadd.f32 1.0, %v4802_v17 }
 0x105   :  { %4805 = vrcp.f32 %v466_v18 }
 0x108   :  { %v4804_v19 = vpop.eup %4803 }
 0x109   :  { %v577_v20 = vadd.f32 1.0, %v4804_v19 }
 0x10b   :  { %4807 = vrcp.f32 %v577_v20 }
 0x10f   :  { %v4806_v21 = vpop.eup %4805 }
 0x110   :  { %v489_v36 = vsub.f32 1.0, %v4806_v21  ;;  %v495_v38 = vmul.f32 0.0, %v4806_v21 }
 0x115   :  { %v4808_v26 = vpop.eup %4807 }
 0x116   :  { %v600_v41 = vsub.f32 1.0, %v4808_v26  ;;  %v606_v43 = vmul.f32 0.0, %v4808_v26 }
 0x168   :  { %v480_v22 = vpop.permute.xlu1 %479 }
 0x169   :  { %v482_v25 = vmul.f32 %v4806_v21, %v480_v22 }
 0x16b   :  { %484 = vrot.lane.b32.xlu0 %v482_v25, %s4956_s6 }
 0x16c   :  { %v591_v27 = vpop.permute.xlu1 %590 }
 0x16d   :  { %v593_v28 = vmul.f32 %v4808_v26, %v591_v27 }
 0x16f   :  { %595 = vrot.lane.b32.xlu1 %v593_v28, %s4956_s6 }
 0x1dd   :  { %v485_v30 = vpop.permute.xlu0 %484 }
 0x1de   :  { %v487_v31 = vadd.f32 %v485_v30, %v387_v8 }
 0x1e0   :  { %4809 = vtanh.f32 %v487_v31 }
 0x1e1   :  { %v596_v32 = vpop.permute.xlu1 %595 }
 0x1e2   :  { %v598_v33 = vadd.f32 %v596_v32, %v502_v10 }
 0x1e4   :  { %4811 = vtanh.f32 %v598_v33 }
 0x1ea   :  { %v4810_v34 = vpop.eup %4809 }
 0x1eb   :  { %491 = vrot.lane.b32.xlu0 %v4810_v34, %s4959_s3 }
 0x1ee   :  { %v4812_v35 = vpop.eup %4811 }
 0x1ef   :  { %602 = vrot.lane.b32.xlu1 %v4812_v35, %s4959_s3 }
 0x25d   :  { %v492_v37 = vpop.permute.xlu0 %491 }
 0x25e   :  { %v494_v39 = vmul.f32 %v492_v37, %v489_v36 }
 0x260   :  { %v5219_v40 = vadd.f32 %v495_v38, %v494_v39  ;;  %v823_v38 = vld [vmem:[#allocation4 + $0x10] sm:$0xff] }
 0x261   :  { %v603_v42 = vpop.permute.xlu1 %602 }
 0x262   :  { %v605_v44 = vmul.f32 %v603_v42, %v600_v41  ;;  %498 = vrot.lane.b32.xlu0 %v5219_v40, %s4959_s3 }
 0x264   :  { %v5223_v45 = vadd.f32 %v606_v43, %v605_v44 }
 0x266   :  { %609 = vrot.lane.b32.xlu1 %v5223_v45, %s4959_s3 }
 0x2d4   :  { %v499_v46 = vpop.permute.xlu0 %498 }
 0x2d5   :  { %501 = vst.msk [vmem:[#allocation2] sm:$0xff] %vm388_vm3, %v499_v46  ;;  %4213 = vmatmul.mubr.msk.f32.vlgmr.msra.gmra.mrb[10].mxu0 %vm388_vm3, %v499_v46 }
 0x2d6   :  { %4593 = vmatpush3.bf16.msra.mxu0 %v5097_v12  ;;  %4234 = vmatprep.mubr.msk.f32.mxu0 %vm4957_vm1, %v4958_v29 }
 0x2d7   :  { %4594 = vmatprep.subr.bf16.mxu0 %v4955_v13 }
 0x2d8   :  { %v610_v47 = vpop.permute.xlu1 %609 }
 0x2d9   :  { %612 = vst.msk [vmem:[#allocation3 + $0x38] sm:$0xff] %vm388_vm3, %v610_v47  ;;  %4224 = vmatmul.mubr.msk.f32.vlgmr.msra.gmra.mrb[10].mxu1 %vm388_vm3, %v610_v47 }
 0x2da   :  { %4596 = vmatpush3.bf16.msra.mxu0 %v5133_v23  ;;  %4599 = vmatpush3.bf16.msra.mxu1 %v5104_v15 }
 0x2db   :  { %4600 = vmatprep.subr.bf16.mxu1 %v4955_v13  ;;  %4245 = vmatprep.mubr.msk.f32.mxu1 %vm4957_vm1, %v4958_v29 }
 0x2dc   :  { %4603 = vmatprep.subr.bf16.mxu0 %v4955_v13 }
 0x2de   :  { %4602 = vmatpush3.bf16.msra.mxu1 %v5137_v24 }
 0x2df   :  { %4609 = vmatprep.subr.bf16.mxu1 %v4955_v13 }
 0x3a8   :  { %v682_v48 = vpop.f32.mrb[10].mxu0 }
 0x3a9   :  { %v693_v49 = vadd.f32 %v682_v48, %v5199_v55  ;;  %v4214_v50 = vpop.f32.mrb[11].mxu0  ;;  %v686_v56 = vadd.f32 %v682_v48, %v613_v54 }
 0x3ab   :  { %695 = vrot.lane.b32.xlu0 %v693_v49, %s4956_s6  ;;  %v3856_v58 = vmul.f32 -1.442695, %v686_v56 }
 0x3ac   :  { %v787_v51 = vpop.f32.mrb[10].mxu1 }
 0x3ad   :  { %v798_v52 = vadd.f32 %v787_v51, %v5208_v2  ;;  %v4225_v53 = vpop.f32.mrb[11].mxu1  ;;  %v791_v59 = vadd.f32 %v787_v51, %v718_v57  ;;  %4813 = vpow2.f32 %v3856_v58 }
 0x3af   :  { %800 = vrot.lane.b32.xlu1 %v798_v52, %s4956_s6  ;;  %v3858_v60 = vmul.f32 -1.442695, %v791_v59 }
 0x3b1   :  { %4815 = vpow2.f32 %v3858_v60 }
 0x3b7   :  { %v4814_v61 = vpop.eup %4813 }
 0x3b8   :  { %v690_v62 = vadd.f32 1.0, %v4814_v61 }
 0x3ba   :  { %4817 = vrcp.f32 %v690_v62 }
 0x3bb   :  { %v4816_v63 = vpop.eup %4815 }
 0x3bc   :  { %v795_v0 = vadd.f32 1.0, %v4816_v63 }
 0x3be   :  { %4819 = vrcp.f32 %v795_v0 }
 0x3c4   :  { %v4818_v1 = vpop.eup %4817 }
 0x3c5   :  { %v705_v17 = vsub.f32 1.0, %v4818_v1  ;;  %v711_v19 = vmul.f32 %v4818_v1, %v5219_v40  ;;  %v928_v40 = vld [vmem:[#allocation5 + $0x28] sm:$0xff] }
 0x3c8   :  { %v4820_v5 = vpop.eup %4819 }
 0x3c9   :  { %v810_v22 = vsub.f32 1.0, %v4820_v5  ;;  %v816_v26 = vmul.f32 %v4820_v5, %v5223_v45 }
 0x41d   :  { %v696_v3 = vpop.permute.xlu0 %695 }
 0x41e   :  { %v698_v4 = vmul.f32 %v4818_v1, %v696_v3 }
 0x420   :  { %700 = vrot.lane.b32.xlu0 %v698_v4, %s4956_s6 }
 0x421   :  { %v801_v6 = vpop.permute.xlu1 %800 }
 0x422   :  { %v803_v7 = vmul.f32 %v4820_v5, %v801_v6 }
 0x424   :  { %805 = vrot.lane.b32.xlu1 %v803_v7, %s4956_s6 }
 0x492   :  { %v701_v8 = vpop.permute.xlu0 %700 }
 0x493   :  { %v703_v9 = vadd.f32 %v701_v8, %v613_v54 }
 0x495   :  { %4821 = vtanh.f32 %v703_v9 }
 0x496   :  { %v806_v10 = vpop.permute.xlu1 %805 }
 0x497   :  { %v808_v11 = vadd.f32 %v806_v10, %v718_v57 }
 0x499   :  { %4823 = vtanh.f32 %v808_v11 }
 0x49f   :  { %v4822_v14 = vpop.eup %4821 }
 0x4a0   :  { %707 = vrot.lane.b32.xlu0 %v4822_v14, %s4959_s3 }
 0x4a3   :  { %v4824_v16 = vpop.eup %4823 }
 0x4a4   :  { %812 = vrot.lane.b32.xlu1 %v4824_v16, %s4959_s3 }
 0x512   :  { %v708_v18 = vpop.permute.xlu0 %707 }
 0x513   :  { %v710_v20 = vmul.f32 %v708_v18, %v705_v17 }
 0x515   :  { %v5252_v21 = vadd.f32 %v711_v19, %v710_v20  ;;  %v1033_v19 = vld [vmem:[#allocation4 + $0x18] sm:$0xff] }
 0x516   :  { %v813_v25 = vpop.permute.xlu1 %812 }
 0x517   :  { %v815_v27 = vmul.f32 %v813_v25, %v810_v22  ;;  %714 = vrot.lane.b32.xlu0 %v5252_v21, %s4959_s3 }
 0x519   :  { %v5257_v28 = vadd.f32 %v816_v26, %v815_v27 }
 0x51b   :  { %819 = vrot.lane.b32.xlu1 %v5257_v28, %s4959_s3 }
 0x589   :  { %v715_v30 = vpop.permute.xlu0 %714 }
 0x58a   :  { %717 = vst.msk [vmem:[#allocation2 + $0x8] sm:$0xff] %vm388_vm3, %v715_v30  ;;  %4235 = vmatmul.mubr.msk.f32.vlgmr.msra.gmra.mrb[12].mxu0 %vm388_vm3, %v715_v30 }
 0x58b   :  { %4605 = vmatpush3.bf16.msra.mxu0 %v5097_v12  ;;  %4256 = vmatprep.mubr.msk.f32.mxu0 %vm4957_vm1, %v4958_v29 }
 0x58c   :  { %4606 = vmatprep.subr.bf16.mxu0 %v4955_v13 }
 0x58d   :  { %v820_v31 = vpop.permute.xlu1 %819 }
 0x58e   :  { %822 = vst.msk [vmem:[#allocation3 + $0x30] sm:$0xff] %vm388_vm3, %v820_v31  ;;  %4246 = vmatmul.mubr.msk.f32.vlgmr.msra.gmra.mrb[12].mxu1 %vm388_vm3, %v820_v31 }
 0x58f   :  { %4608 = vmatpush3.bf16.msra.mxu0 %v5133_v23  ;;  %4611 = vmatpush3.bf16.msra.mxu1 %v5104_v15 }
 0x590   :  { %4612 = vmatprep.subr.bf16.mxu1 %v4955_v13  ;;  %4267 = vmatprep.mubr.msk.f32.mxu1 %vm4957_vm1, %v4958_v29 }
 0x591   :  { %4615 = vmatprep.subr.bf16.mxu0 %v4955_v13 }
 0x593   :  { %4614 = vmatpush3.bf16.msra.mxu1 %v5137_v24 }
 0x594   :  { %4621 = vmatprep.subr.bf16.mxu1 %v4955_v13 }
 0x65d   :  { %v892_v32 = vpop.f32.mrb[12].mxu0 }
 0x65e   :  { %v903_v33 = vadd.f32 %v892_v32, %v5199_v55  ;;  %v4236_v34 = vpop.f32.mrb[13].mxu0  ;;  %v896_v39 = vadd.f32 %v892_v32, %v823_v38 }
 0x660   :  { %905 = vrot.lane.b32.xlu0 %v903_v33, %s4956_s6  ;;  %v3860_v41 = vmul.f32 -1.442695, %v896_v39 }
 0x661   :  { %v997_v35 = vpop.f32.mrb[12].mxu1 }
 0x662   :  { %v1008_v36 = vadd.f32 %v997_v35, %v5208_v2  ;;  %v4247_v37 = vpop.f32.mrb[13].mxu1  ;;  %v1001_v42 = vadd.f32 %v997_v35, %v928_v40  ;;  %4825 = vpow2.f32 %v3860_v41 }
 0x664   :  { %1010 = vrot.lane.b32.xlu1 %v1008_v36, %s4956_s6  ;;  %v3862_v43 = vmul.f32 -1.442695, %v1001_v42 }
 0x666   :  { %4827 = vpow2.f32 %v3862_v43 }
 0x66c   :  { %v4826_v44 = vpop.eup %4825 }
 0x66d   :  { %v900_v45 = vadd.f32 1.0, %v4826_v44 }
 0x66f   :  { %4829 = vrcp.f32 %v900_v45 }
 0x670   :  { %v4828_v46 = vpop.eup %4827 }
 0x671   :  { %v1005_v47 = vadd.f32 1.0, %v4828_v46 }
 0x673   :  { %4831 = vrcp.f32 %v1005_v47 }
 0x679   :  { %v4830_v48 = vpop.eup %4829 }
 0x67a   :  { %v915_v61 = vsub.f32 1.0, %v4830_v48  ;;  %v921_v63 = vmul.f32 %v4830_v48, %v5252_v21  ;;  %v1138_v21 = vld [vmem:[#allocation5 + $0x20] sm:$0xff] }
 0x67d   :  { %v4832_v51 = vpop.eup %4831 }
 0x67e   :  { %v1020_v3 = vsub.f32 1.0, %v4832_v51  ;;  %v1026_v5 = vmul.f32 %v4832_v51, %v5257_v28 }
 0x6d2   :  { %v906_v49 = vpop.permute.xlu0 %905 }
 0x6d3   :  { %v908_v50 = vmul.f32 %v4830_v48, %v906_v49 }
 0x6d5   :  { %910 = vrot.lane.b32.xlu0 %v908_v50, %s4956_s6 }
 0x6d6   :  { %v1011_v52 = vpop.permute.xlu1 %1010 }
 0x6d7   :  { %v1013_v53 = vmul.f32 %v4832_v51, %v1011_v52 }
 0x6d9   :  { %1015 = vrot.lane.b32.xlu1 %v1013_v53, %s4956_s6 }
 0x747   :  { %v911_v54 = vpop.permute.xlu0 %910 }
 0x748   :  { %v913_v56 = vadd.f32 %v911_v54, %v823_v38 }
 0x74a   :  { %4833 = vtanh.f32 %v913_v56 }
 0x74b   :  { %v1016_v57 = vpop.permute.xlu1 %1015 }
 0x74c   :  { %v1018_v58 = vadd.f32 %v1016_v57, %v928_v40 }
 0x74e   :  { %4835 = vtanh.f32 %v1018_v58 }
 0x754   :  { %v4834_v59 = vpop.eup %4833 }
 0x755   :  { %917 = vrot.lane.b32.xlu0 %v4834_v59, %s4959_s3 }
 0x758   :  { %v4836_v60 = vpop.eup %4835 }
 0x759   :  { %1022 = vrot.lane.b32.xlu1 %v4836_v60, %s4959_s3 }
 0x7c7   :  { %v918_v62 = vpop.permute.xlu0 %917 }
 0x7c8   :  { %v920_v0 = vmul.f32 %v918_v62, %v915_v61 }
 0x7ca   :  { %v5286_v1 = vadd.f32 %v921_v63, %v920_v0  ;;  %v1243_v63 = vld [vmem:[#allocation4 + $0x20] sm:$0xff] }
 0x7cb   :  { %v1023_v4 = vpop.permute.xlu1 %1022 }
 0x7cc   :  { %v1025_v6 = vmul.f32 %v1023_v4, %v1020_v3  ;;  %924 = vrot.lane.b32.xlu0 %v5286_v1, %s4959_s3 }
 0x7ce   :  { %v5291_v7 = vadd.f32 %v1026_v5, %v1025_v6 }
 0x7d0   :  { %1029 = vrot.lane.b32.xlu1 %v5291_v7, %s4959_s3 }
 0x83e   :  { %v925_v8 = vpop.permute.xlu0 %924 }
 0x83f   :  { %927 = vst.msk [vmem:[#allocation2 + $0x10] sm:$0xff] %vm388_vm3, %v925_v8  ;;  %4257 = vmatmul.mubr.msk.f32.vlgmr.msra.gmra.mrb[14].mxu0 %vm388_vm3, %v925_v8 }
 0x840   :  { %4617 = vmatpush3.bf16.msra.mxu0 %v5097_v12  ;;  %4278 = vmatprep.mubr.msk.f32.mxu0 %vm4957_vm1, %v4958_v29 }
 0x841   :  { %4618 = vmatprep.subr.bf16.mxu0 %v4955_v13 }
 0x842   :  { %v1030_v9 = vpop.permute.xlu1 %1029 }
 0x843   :  { %1032 = vst.msk [vmem:[#allocation3 + $0x28] sm:$0xff] %vm388_vm3, %v1030_v9  ;;  %4268 = vmatmul.mubr.msk.f32.vlgmr.msra.gmra.mrb[14].mxu1 %vm388_vm3, %v1030_v9 }
 0x844   :  { %4620 = vmatpush3.bf16.msra.mxu0 %v5133_v23  ;;  %4623 = vmatpush3.bf16.msra.mxu1 %v5104_v15 }
 0x845   :  { %4624 = vmatprep.subr.bf16.mxu1 %v4955_v13  ;;  %4289 = vmatprep.mubr.msk.f32.mxu1 %vm4957_vm1, %v4958_v29 }
 0x846   :  { %4627 = vmatprep.subr.bf16.mxu0 %v4955_v13 }
 0x848   :  { %4626 = vmatpush3.bf16.msra.mxu1 %v5137_v24 }
 0x849   :  { %4633 = vmatprep.subr.bf16.mxu1 %v4955_v13 }
 0x912   :  { %v1102_v10 = vpop.f32.mrb[14].mxu0 }
 0x913   :  { %v1113_v11 = vadd.f32 %v1102_v10, %v5199_v55  ;;  %v4258_v14 = vpop.f32.mrb[15].mxu0  ;;  %v1106_v20 = vadd.f32 %v1102_v10, %v1033_v19 }
 0x915   :  { %1115 = vrot.lane.b32.xlu0 %v1113_v11, %s4956_s6  ;;  %v3864_v22 = vmul.f32 -1.442695, %v1106_v20 }
 0x916   :  { %v1207_v16 = vpop.f32.mrb[14].mxu1 }
 0x917   :  { %v1218_v17 = vadd.f32 %v1207_v16, %v5208_v2  ;;  %v4269_v18 = vpop.f32.mrb[15].mxu1  ;;  %v1211_v25 = vadd.f32 %v1207_v16, %v1138_v21  ;;  %4837 = vpow2.f32 %v3864_v22 }
 0x919   :  { %1220 = vrot.lane.b32.xlu1 %v1218_v17, %s4956_s6  ;;  %v3866_v26 = vmul.f32 -1.442695, %v1211_v25 }
 0x91b   :  { %4839 = vpow2.f32 %v3866_v26 }
 0x921   :  { %v4838_v27 = vpop.eup %4837 }
 0x922   :  { %v1110_v28 = vadd.f32 1.0, %v4838_v27 }
 0x924   :  { %4841 = vrcp.f32 %v1110_v28 }
 0x925   :  { %v4840_v30 = vpop.eup %4839 }
 0x926   :  { %v1215_v31 = vadd.f32 1.0, %v4840_v30 }
 0x928   :  { %4843 = vrcp.f32 %v1215_v31 }
 0x92e   :  { %v4842_v32 = vpop.eup %4841 }
 0x92f   :  { %v1125_v44 = vsub.f32 1.0, %v4842_v32  ;;  %v1131_v46 = vmul.f32 %v4842_v32, %v5286_v1  ;;  %v1348_v1 = vld [vmem:[#allocation5 + $0x18] sm:$0xff] }
 0x932   :  { %v4844_v35 = vpop.eup %4843 }
 0x933   :  { %v1230_v49 = vsub.f32 1.0, %v4844_v35  ;;  %v1236_v51 = vmul.f32 %v4844_v35, %v5291_v7 }
 0x987   :  { %v1116_v33 = vpop.permute.xlu0 %1115 }
 0x988   :  { %v1118_v34 = vmul.f32 %v4842_v32, %v1116_v33 }
 0x98a   :  { %1120 = vrot.lane.b32.xlu0 %v1118_v34, %s4956_s6 }
 0x98b   :  { %v1221_v36 = vpop.permute.xlu1 %1220 }
 0x98c   :  { %v1223_v37 = vmul.f32 %v4844_v35, %v1221_v36 }
 0x98e   :  { %1225 = vrot.lane.b32.xlu1 %v1223_v37, %s4956_s6 }
 0x9fc   :  { %v1121_v38 = vpop.permute.xlu0 %1120 }
 0x9fd   :  { %v1123_v39 = vadd.f32 %v1121_v38, %v1033_v19 }
 0x9ff   :  { %4845 = vtanh.f32 %v1123_v39 }
 0xa00   :  { %v1226_v40 = vpop.permute.xlu1 %1225 }
 0xa01   :  { %v1228_v41 = vadd.f32 %v1226_v40, %v1138_v21 }
 0xa03   :  { %4847 = vtanh.f32 %v1228_v41 }
 0xa09   :  { %v4846_v42 = vpop.eup %4845 }
 0xa0a   :  { %1127 = vrot.lane.b32.xlu0 %v4846_v42, %s4959_s3 }
 0xa0d   :  { %v4848_v43 = vpop.eup %4847 }
 0xa0e   :  { %1232 = vrot.lane.b32.xlu1 %v4848_v43, %s4959_s3 }
 0xa7c   :  { %v1128_v45 = vpop.permute.xlu0 %1127 }
 0xa7d   :  { %v1130_v47 = vmul.f32 %v1128_v45, %v1125_v44 }
 0xa7f   :  { %v5320_v48 = vadd.f32 %v1131_v46, %v1130_v47  ;;  %v1453_v46 = vld [vmem:[#allocation4 + $0x28] sm:$0xff] }
 0xa80   :  { %v1233_v50 = vpop.permute.xlu1 %1232 }
 0xa81   :  { %v1235_v52 = vmul.f32 %v1233_v50, %v1230_v49  ;;  %1134 = vrot.lane.b32.xlu0 %v5320_v48, %s4959_s3 }
 0xa83   :  { %v5325_v53 = vadd.f32 %v1236_v51, %v1235_v52 }
 0xa85   :  { %1239 = vrot.lane.b32.xlu1 %v5325_v53, %s4959_s3 }
 0xaf3   :  { %v1135_v54 = vpop.permute.xlu0 %1134 }
 0xaf4   :  { %1137 = vst.msk [vmem:[#allocation2 + $0x18] sm:$0xff] %vm388_vm3, %v1135_v54  ;;  %4279 = vmatmul.mubr.msk.f32.vlgmr.msra.gmra.mrb[16].mxu0 %vm388_vm3, %v1135_v54 }
 0xaf5   :  { %4629 = vmatpush3.bf16.msra.mxu0 %v5097_v12  ;;  %4300 = vmatprep.mubr.msk.f32.mxu0 %vm4957_vm1, %v4958_v29 }
 0xaf6   :  { %4630 = vmatprep.subr.bf16.mxu0 %v4955_v13 }
 0xaf7   :  { %v1240_v56 = vpop.permute.xlu1 %1239 }
 0xaf8   :  { %1242 = vst.msk [vmem:[#allocation3 + $0x20] sm:$0xff] %vm388_vm3, %v1240_v56  ;;  %4290 = vmatmul.mubr.msk.f32.vlgmr.msra.gmra.mrb[16].mxu1 %vm388_vm3, %v1240_v56 }
 0xaf9   :  { %4632 = vmatpush3.bf16.msra.mxu0 %v5133_v23  ;;  %4635 = vmatpush3.bf16.msra.mxu1 %v5104_v15 }
 0xafa   :  { %4636 = vmatprep.subr.bf16.mxu1 %v4955_v13  ;;  %4311 = vmatprep.mubr.msk.f32.mxu1 %vm4957_vm1, %v4958_v29 }
 0xafb   :  { %4639 = vmatprep.subr.bf16.mxu0 %v4955_v13 }
 0xafd   :  { %4638 = vmatpush3.bf16.msra.mxu1 %v5137_v24 }
 0xafe   :  { %4645 = vmatprep.subr.bf16.mxu1 %v4955_v13 }
 0xbc7   :  { %v1312_v57 = vpop.f32.mrb[16].mxu0 }
 0xbc8   :  { %v1323_v58 = vadd.f32 %v1312_v57, %v5199_v55  ;;  %v4280_v59 = vpop.f32.mrb[17].mxu0  ;;  %v1316_v0 = vadd.f32 %v1312_v57, %v1243_v63 }
 0xbca   :  { %1325 = vrot.lane.b32.xlu0 %v1323_v58, %s4956_s6  ;;  %v3868_v3 = vmul.f32 -1.442695, %v1316_v0 }
 0xbcb   :  { %v1417_v60 = vpop.f32.mrb[16].mxu1 }
 0xbcc   :  { %v1428_v61 = vadd.f32 %v1417_v60, %v5208_v2  ;;  %v4291_v62 = vpop.f32.mrb[17].mxu1  ;;  %v1421_v4 = vadd.f32 %v1417_v60, %v1348_v1  ;;  %4849 = vpow2.f32 %v3868_v3 }
 0xbce   :  { %1430 = vrot.lane.b32.xlu1 %v1428_v61, %s4956_s6  ;;  %v3870_v5 = vmul.f32 -1.442695, %v1421_v4 }
 0xbd0   :  { %4851 = vpow2.f32 %v3870_v5 }
 0xbd6   :  { %v4850_v6 = vpop.eup %4849 }
 0xbd7   :  { %v1320_v7 = vadd.f32 1.0, %v4850_v6 }
 0xbd9   :  { %4853 = vrcp.f32 %v1320_v7 }
 0xbda   :  { %v4852_v8 = vpop.eup %4851 }
 0xbdb   :  { %v1425_v9 = vadd.f32 1.0, %v4852_v8 }
 0xbdd   :  { %4855 = vrcp.f32 %v1425_v9 }
 0xbe3   :  { %v4854_v10 = vpop.eup %4853 }
 0xbe4   :  { %v1335_v27 = vsub.f32 1.0, %v4854_v10  ;;  %v1341_v30 = vmul.f32 %v4854_v10, %v5320_v48  ;;  %v1558_v48 = vld [vmem:[#allocation5 + $0x10] sm:$0xff] }
 0xbe7   :  { %v4856_v16 = vpop.eup %4855 }
 0xbe8   :  { %v1440_v33 = vsub.f32 1.0, %v4856_v16  ;;  %v1446_v35 = vmul.f32 %v4856_v16, %v5325_v53 }
 0xc3c   :  { %v1326_v11 = vpop.permute.xlu0 %1325 }
 0xc3d   :  { %v1328_v14 = vmul.f32 %v4854_v10, %v1326_v11 }
 0xc3f   :  { %1330 = vrot.lane.b32.xlu0 %v1328_v14, %s4956_s6 }
 0xc40   :  { %v1431_v17 = vpop.permute.xlu1 %1430 }
 0xc41   :  { %v1433_v18 = vmul.f32 %v4856_v16, %v1431_v17 }
 0xc43   :  { %1435 = vrot.lane.b32.xlu1 %v1433_v18, %s4956_s6 }
 0xcb1   :  { %v1331_v19 = vpop.permute.xlu0 %1330 }
 0xcb2   :  { %v1333_v20 = vadd.f32 %v1331_v19, %v1243_v63 }
 0xcb4   :  { %4857 = vtanh.f32 %v1333_v20 }
 0xcb5   :  { %v1436_v21 = vpop.permute.xlu1 %1435 }
 0xcb6   :  { %v1438_v22 = vadd.f32 %v1436_v21, %v1348_v1 }
 0xcb8   :  { %4859 = vtanh.f32 %v1438_v22 }
 0xcbe   :  { %v4858_v25 = vpop.eup %4857 }
 0xcbf   :  { %1337 = vrot.lane.b32.xlu0 %v4858_v25, %s4959_s3 }
 0xcc2   :  { %v4860_v26 = vpop.eup %4859 }
 0xcc3   :  { %1442 = vrot.lane.b32.xlu1 %v4860_v26, %s4959_s3 }
 0xd31   :  { %v1338_v28 = vpop.permute.xlu0 %1337 }
 0xd32   :  { %v1340_v31 = vmul.f32 %v1338_v28, %v1335_v27  ;;  %v1768_v28 = vld [vmem:[#allocation5 + $0x8] sm:$0xff] }
 0xd34   :  { %v5354_v32 = vadd.f32 %v1341_v30, %v1340_v31 }
 0xd35   :  { %v1443_v34 = vpop.permute.xlu1 %1442 }
 0xd36   :  { %v1445_v36 = vmul.f32 %v1443_v34, %v1440_v33  ;;  %1344 = vrot.lane.b32.xlu0 %v5354_v32, %s4959_s3 }
 0xd38   :  { %v5359_v37 = vadd.f32 %v1446_v35, %v1445_v36 }
 0xd3a   :  { %1449 = vrot.lane.b32.xlu1 %v5359_v37, %s4959_s3 }
 0xda8   :  { %v1345_v38 = vpop.permute.xlu0 %1344 }
 0xda9   :  { %1347 = vst.msk [vmem:[#allocation2 + $0x20] sm:$0xff] %vm388_vm3, %v1345_v38  ;;  %4301 = vmatmul.mubr.msk.f32.vlgmr.msra.gmra.mrb[18].mxu0 %vm388_vm3, %v1345_v38 }
 0xdaa   :  { %4641 = vmatpush3.bf16.msra.mxu0 %v5097_v12  ;;  %4322 = vmatprep.mubr.msk.f32.mxu0 %vm4957_vm1, %v4958_v29 }
 0xdab   :  { %4642 = vmatprep.subr.bf16.mxu0 %v4955_v13 }
 0xdac   :  { %v1450_v39 = vpop.permute.xlu1 %1449 }
 0xdad   :  { %1452 = vst.msk [vmem:[#allocation3 + $0x18] sm:$0xff] %vm388_vm3, %v1450_v39  ;;  %4312 = vmatmul.mubr.msk.f32.vlgmr.msra.gmra.mrb[18].mxu1 %vm388_vm3, %v1450_v39 }
 0xdae   :  { %4644 = vmatpush3.bf16.msra.mxu0 %v5133_v23  ;;  %4647 = vmatpush3.bf16.msra.mxu1 %v5104_v15 }
 0xdaf   :  { %4648 = vmatprep.subr.bf16.mxu1 %v4955_v13  ;;  %4333 = vmatprep.mubr.msk.f32.mxu1 %vm4957_vm1, %v4958_v29 }
 0xdb0   :  { %4651 = vmatprep.subr.bf16.mxu0 %v4955_v13 }
 0xdb2   :  { %4650 = vmatpush3.bf16.msra.mxu1 %v5137_v24 }
 0xdb3   :  { %4657 = vmatprep.subr.bf16.mxu1 %v4955_v13 }
 0xe7c   :  { %v1522_v40 = vpop.f32.mrb[18].mxu0 }
 0xe7d   :  { %v1533_v41 = vadd.f32 %v1522_v40, %v5199_v55  ;;  %v4302_v42 = vpop.f32.mrb[19].mxu0  ;;  %v1526_v47 = vadd.f32 %v1522_v40, %v1453_v46 }
 0xe7f   :  { %1535 = vrot.lane.b32.xlu0 %v1533_v41, %s4956_s6  ;;  %v3872_v49 = vmul.f32 -1.442695, %v1526_v47  ;;  %v2093_v47 = vld [vmem:[%s5749_s9 + $0x8] sm:$0xff] }
 0xe80   :  { %v1627_v43 = vpop.f32.mrb[18].mxu1 }
 0xe81   :  { %v1638_v44 = vadd.f32 %v1627_v43, %v5208_v2  ;;  %v4313_v45 = vpop.f32.mrb[19].mxu1  ;;  %v1631_v50 = vadd.f32 %v1627_v43, %v1558_v48  ;;  %4861 = vpow2.f32 %v3872_v49 }
 0xe83   :  { %1640 = vrot.lane.b32.xlu1 %v1638_v44, %s4956_s6  ;;  %v3874_v51 = vmul.f32 -1.442695, %v1631_v50 }
 0xe85   :  { %4863 = vpow2.f32 %v3874_v51  ;;  %v2406_v51 = vld [vmem:[%s5750_s13] sm:$0xff] }
 0xe8b   :  { %v4862_v52 = vpop.eup %4861 }
 0xe8c   :  { %v1530_v53 = vadd.f32 1.0, %v4862_v52  ;;  %v2407_v52 = vld [vmem:[%s5750_s13 + $0x8] sm:$0xff] }
 0xe8e   :  { %4865 = vrcp.f32 %v1530_v53  ;;  %v4679_v53 = vpack.c.bf16 %v2407_v52, %v2406_v51  ;;  %v3895_v51 = vld [vmem:[%s5749_s9 + $0x38] sm:$0xff] }
 0xe8f   :  { %v4864_v54 = vpop.eup %4863 }
 0xe90   :  { %v1635_v56 = vadd.f32 1.0, %v4864_v54 }
 0xe92   :  { %4867 = vrcp.f32 %v1635_v56 }
 0xe98   :  { %v4866_v57 = vpop.eup %4865 }
 0xe99   :  { %v1545_v6 = vsub.f32 1.0, %v4866_v57  ;;  %v1551_v8 = vmul.f32 %v4866_v57, %v5354_v32 }
 0xe9c   :  { %v4868_v60 = vpop.eup %4867 }
 0xe9d   :  { %v1650_v11 = vsub.f32 1.0, %v4868_v60  ;;  %v1656_v16 = vmul.f32 %v4868_v60, %v5359_v37 }
 0xef1   :  { %v1536_v58 = vpop.permute.xlu0 %1535 }
 0xef2   :  { %v1538_v59 = vmul.f32 %v4866_v57, %v1536_v58 }
 0xef4   :  { %1540 = vrot.lane.b32.xlu0 %v1538_v59, %s4956_s6 }
 0xef5   :  { %v1641_v61 = vpop.permute.xlu1 %1640 }
 0xef6   :  { %v1643_v62 = vmul.f32 %v4868_v60, %v1641_v61 }
 0xef8   :  { %1645 = vrot.lane.b32.xlu1 %v1643_v62, %s4956_s6 }
 0xf66   :  { %v1541_v63 = vpop.permute.xlu0 %1540 }
 0xf67   :  { %v1543_v0 = vadd.f32 %v1541_v63, %v1453_v46  ;;  %v2092_v46 = vld [vmem:[%s5749_s9] sm:$0xff] }
 0xf69   :  { %4869 = vtanh.f32 %v1543_v0 }
 0xf6a   :  { %v1646_v1 = vpop.permute.xlu1 %1645 }
 0xf6b   :  { %v1648_v3 = vadd.f32 %v1646_v1, %v1558_v48  ;;  %v4663_v48 = vpack.c.bf16 %v2093_v47, %v2092_v46  ;;  %v2094_v1 = vld [vmem:[%s5749_s9 + $0x10] sm:$0xff] }
 0xf6d   :  { %4871 = vtanh.f32 %v1648_v3  ;;  %v2095_v3 = vld [vmem:[%s5749_s9 + $0x18] sm:$0xff] }
 0xf73   :  { %v4870_v4 = vpop.eup %4869 }
 0xf74   :  { %1547 = vrot.lane.b32.xlu0 %v4870_v4, %s4959_s3  ;;  %v4667_v4 = vpack.c.bf16 %v2095_v3, %v2094_v1 }
 0xf77   :  { %v4872_v5 = vpop.eup %4871 }
 0xf78   :  { %1652 = vrot.lane.b32.xlu1 %v4872_v5, %s4959_s3 }
 0xfe6   :  { %v1548_v7 = vpop.permute.xlu0 %1547 }
 0xfe7   :  { %v1550_v9 = vmul.f32 %v1548_v7, %v1545_v6  ;;  %v2408_v6 = vld [vmem:[%s5750_s13 + $0x10] sm:$0xff]  ;;  %v2409_v7 = vld [vmem:[%s5750_s13 + $0x18] sm:$0xff] }
 0xfe9   :  { %v5388_v10 = vadd.f32 %v1551_v8, %v1550_v9  ;;  %v2084_v8 = vld [vmem:[#allocation2] sm:$0xff]  ;;  %v4683_v9 = vpack.c.bf16 %v2409_v7, %v2408_v6 }
 0xfea   :  { %v1653_v14 = vpop.permute.xlu1 %1652 }
 0xfeb   :  { %v1655_v17 = vmul.f32 %v1653_v14, %v1650_v11  ;;  %1554 = vrot.lane.b32.xlu0 %v5388_v10, %s4959_s3  ;;  %v2085_v11 = vld [vmem:[#allocation2 + $0x8] sm:$0xff]  ;;  %v2086_v14 = vld [vmem:[#allocation2 + $0x10] sm:$0xff] }
 0xfed   :  { %v5393_v18 = vadd.f32 %v1656_v16, %v1655_v17  ;;  %v2087_v16 = vld [vmem:[#allocation2 + $0x18] sm:$0xff]  ;;  %v2088_v17 = vld [vmem:[#allocation2 + $0x20] sm:$0xff] }
 0xfef   :  { %1659 = vrot.lane.b32.xlu1 %v5393_v18, %s4959_s3 }
0x105d   :  { %v1555_v19 = vpop.permute.xlu0 %1554 }
0x105e   :  { %1557 = vst.msk [vmem:[#allocation2 + $0x28] sm:$0xff] %vm388_vm3, %v1555_v19  ;;  %4323 = vmatmul.mubr.msk.f32.vlgmr.msra.gmra.mrb[20].mxu0 %vm388_vm3, %v1555_v19 }
0x105f   :  { %4653 = vmatpush3.bf16.msra.mxu0 %v5097_v12  ;;  %4344 = vmatprep.mubr.msk.f32.mxu0 %vm4957_vm1, %v4958_v29 }
0x1060   :  { %4654 = vmatprep.subr.bf16.mxu0 %v4955_v13 }
0x1061   :  { %v1660_v20 = vpop.permute.xlu1 %1659 }
0x1062   :  { %1662 = vst.msk [vmem:[#allocation3 + $0x10] sm:$0xff] %vm388_vm3, %v1660_v20  ;;  %4334 = vmatmul.mubr.msk.f32.vlgmr.msra.gmra.mrb[20].mxu1 %vm388_vm3, %v1660_v20 }
0x1063   :  { %4656 = vmatpush3.bf16.msra.mxu0 %v5133_v23  ;;  %4659 = vmatpush3.bf16.msra.mxu1 %v5104_v15  ;;  %v1663_v15 = vld [vmem:[#allocation4 + $0x30] sm:$0xff] }
0x1064   :  { %4660 = vmatprep.subr.bf16.mxu1 %v4955_v13  ;;  %4355 = vmatprep.mubr.msk.f32.mxu1 %vm4957_vm1, %v4958_v29 }
0x1065   :  { %4664 = vmatprep.subr.bf16.mxu0 %v4663_v48 }
0x1067   :  { %4662 = vmatpush3.bf16.msra.mxu1 %v5137_v24 }
0x1068   :  { %4680 = vmatprep.subr.bf16.mxu1 %v4679_v53 }
0x1131   :  { %v1732_v12 = vpop.f32.mrb[20].mxu0 }
0x1132   :  { %v1743_v21 = vadd.f32 %v1732_v12, %v5199_v55  ;;  %v4324_v22 = vpop.f32.mrb[21].mxu0  ;;  %v1736_v23 = vadd.f32 %v1732_v12, %v1663_v15 }
0x1134   :  { %1745 = vrot.lane.b32.xlu0 %v1743_v21, %s4956_s6  ;;  %v3876_v30 = vmul.f32 -1.442695, %v1736_v23  ;;  %v1978_v23 = vld [vmem:[#allocation5] sm:$0xff] }
0x1135   :  { %v1837_v25 = vpop.f32.mrb[20].mxu1 }
0x1136   :  { %v1848_v26 = vadd.f32 %v1837_v25, %v5208_v2  ;;  %v4335_v27 = vpop.f32.mrb[21].mxu1  ;;  %v1841_v31 = vadd.f32 %v1837_v25, %v1768_v28  ;;  %4873 = vpow2.f32 %v3876_v30 }
0x1137   :  { %v1873_v27 = vld [vmem:[#allocation4 + $0x38] sm:$0xff] }
0x1138   :  { %1850 = vrot.lane.b32.xlu1 %v1848_v26, %s4956_s6  ;;  %v3878_v32 = vmul.f32 -1.442695, %v1841_v31 }
0x113a   :  { %4875 = vpow2.f32 %v3878_v32 }
0x1140   :  { %v4874_v24 = vpop.eup %4873 }
0x1141   :  { %v1740_v33 = vadd.f32 1.0, %v4874_v24 }
0x1143   :  { %4877 = vrcp.f32 %v1740_v33 }
0x1144   :  { %v4876_v34 = vpop.eup %4875 }
0x1145   :  { %v1845_v35 = vadd.f32 1.0, %v4876_v34 }
0x1147   :  { %4879 = vrcp.f32 %v1845_v35 }
0x114d   :  { %v4878_v36 = vpop.eup %4877 }
0x114e   :  { %v1755_v54 = vsub.f32 1.0, %v4878_v36  ;;  %v1761_v57 = vmul.f32 %v4878_v36, %v5388_v10 }
0x1151   :  { %v4880_v39 = vpop.eup %4879 }
0x1152   :  { %v1860_v60 = vsub.f32 1.0, %v4880_v39  ;;  %v1866_v62 = vmul.f32 %v4880_v39, %v5393_v18  ;;  %v2089_v18 = vld [vmem:[#allocation2 + $0x28] sm:$0xff] }
0x11a6   :  { %v1746_v37 = vpop.permute.xlu0 %1745 }
0x11a7   :  { %v1748_v38 = vmul.f32 %v4878_v36, %v1746_v37 }
0x11a9   :  { %1750 = vrot.lane.b32.xlu0 %v1748_v38, %s4956_s6 }
0x11aa   :  { %v1851_v40 = vpop.permute.xlu1 %1850 }
0x11ab   :  { %v1853_v41 = vmul.f32 %v4880_v39, %v1851_v40 }
0x11ad   :  { %1855 = vrot.lane.b32.xlu1 %v1853_v41, %s4956_s6 }
0x121b   :  { %v1751_v42 = vpop.permute.xlu0 %1750 }
0x121c   :  { %v1753_v43 = vadd.f32 %v1751_v42, %v1663_v15 }
0x121e   :  { %4881 = vtanh.f32 %v1753_v43  ;;  %v3892_v43 = vld [vmem:[%s5749_s9 + $0x20] sm:$0xff] }
0x121f   :  { %v1856_v44 = vpop.permute.xlu1 %1855 }
0x1220   :  { %v1858_v45 = vadd.f32 %v1856_v44, %v1768_v28  ;;  %v3893_v44 = vld [vmem:[%s5749_s9 + $0x28] sm:$0xff] }
0x1222   :  { %4883 = vtanh.f32 %v1858_v45  ;;  %v4671_v45 = vpack.c.bf16 %v3893_v44, %v3892_v43 }
0x1228   :  { %v4882_v49 = vpop.eup %4881 }
0x1229   :  { %1757 = vrot.lane.b32.xlu0 %v4882_v49, %s4959_s3  ;;  %v3914_v49 = vld [vmem:[%s5750_s13 + $0x28] sm:$0xff] }
0x122c   :  { %v4884_v50 = vpop.eup %4883 }
0x122d   :  { %1862 = vrot.lane.b32.xlu1 %v4884_v50, %s4959_s3  ;;  %v3894_v50 = vld [vmem:[%s5749_s9 + $0x30] sm:$0xff] }
0x129b   :  { %v1758_v56 = vpop.permute.xlu0 %1757 }
0x129c   :  { %v1760_v58 = vmul.f32 %v1758_v56, %v1755_v54  ;;  %v3915_v56 = vld [vmem:[%s5750_s13 + $0x30] sm:$0xff] }
0x129e   :  { %v5432_v59 = vadd.f32 %v1761_v57, %v1760_v58  ;;  %v3916_v57 = vld [vmem:[%s5750_s13 + $0x38] sm:$0xff] }
0x129f   :  { %v1863_v61 = vpop.permute.xlu1 %1862 }
0x12a0   :  { %v1865_v63 = vmul.f32 %v1863_v61, %v1860_v60  ;;  %1764 = vrot.lane.b32.xlu0 %v5432_v59, %s4959_s3  ;;  %v4691_v60 = vpack.c.bf16 %v3916_v57, %v3915_v56 }
0x12a2   :  { %v5437_v0 = vadd.f32 %v1866_v62, %v1865_v63 }
0x12a4   :  { %1869 = vrot.lane.b32.xlu1 %v5437_v0, %s4959_s3 }
0x1312   :  { %v1765_v5 = vpop.permute.xlu0 %1764 }
0x1313   :  { %1767 = vst.msk [vmem:[#allocation2 + $0x30] sm:$0xff] %vm388_vm3, %v1765_v5  ;;  %4345 = vmatmul.mubr.msk.f32.vlgmr.msra.gmra.mrb[22].mxu0 %vm388_vm3, %v1765_v5 }
0x1314   :  { %4666 = vmatpush3.bf16.msra.mxu0 %v4663_v48  ;;  %4366 = vmatprep.mubr.msk.f32.mxu0 %vm388_vm3, %v2084_v8  ;;  %v3913_v48 = vld [vmem:[%s5750_s13 + $0x20] sm:$0xff] }
0x1315   :  { %4668 = vmatprep.subr.bf16.mxu0 %v4667_v4  ;;  %v4687_v52 = vpack.c.bf16 %v3914_v49, %v3913_v48 }
0x1316   :  { %v1870_v10 = vpop.permute.xlu1 %1869 }
0x1317   :  { %1872 = vst.msk [vmem:[#allocation3 + $0x8] sm:$0xff] %vm388_vm3, %v1870_v10  ;;  %4356 = vmatmul.mubr.msk.f32.vlgmr.msra.gmra.mrb[22].mxu1 %vm388_vm3, %v1870_v10  ;;  %v2712_v10 = vld [vmem:[%s5752_s10 + $0x8] sm:$0xff] }
0x1318   :  { %4670 = vmatpush3.bf16.msra.mxu0 %v4667_v4  ;;  %4682 = vmatpush3.bf16.msra.mxu1 %v4679_v53  ;;  %v4675_v53 = vpack.c.bf16 %v3895_v51, %v3894_v50 }
0x1319   :  { %4406 = vmatprep.mubr.msk.f32.mxu1 %vm388_vm3, %v2084_v8  ;;  %4684 = vmatprep.subr.bf16.mxu1 %v4683_v9 }
0x131a   :  { %v2090_v19 = vld [vmem:[#allocation2 + $0x30] sm:$0xff]  ;;  %4672 = vmatprep.subr.bf16.mxu0 %v4671_v45 }
0x131b   :  { %4367 = vmatmul.mubr.msk.f32.vlgmr.msra.gmra.mrb[24].mxu0 %vm388_vm3, %v2085_v11 }
0x131c   :  { %4369 = vmatprep.mubr.msk.f32.mxu0 %vm388_vm3, %v2086_v14  ;;  %4686 = vmatpush3.bf16.msra.mxu1 %v4683_v9 }
0x131d   :  { %4674 = vmatpush3.bf16.msra.mxu0 %v4671_v45  ;;  %4688 = vmatprep.subr.bf16.mxu1 %v4687_v52 }
0x131e   :  { %4676 = vmatprep.subr.bf16.mxu0 %v4675_v53 }
0x131f   :  { %4370 = vmatmul.mubr.msk.f32.gmra.mrb[26].mxu0 %vm388_vm3, %v2087_v16  ;;  %4407 = vmatmul.mubr.msk.f32.vlgmr.msra.gmra.mrb[24].mxu1 %vm388_vm3, %v2085_v11  ;;  %v2715_v11 = vld [vmem:[%s5753_s14] sm:$0xff] }
0x1320   :  { %4372 = vmatprep.mubr.msk.f32.mxu0 %vm388_vm3, %v2088_v17  ;;  %4409 = vmatprep.mubr.msk.f32.mxu1 %vm388_vm3, %v2086_v14  ;;  %v2716_v14 = vld [vmem:[%s5753_s14 + $0x8] sm:$0xff] }
0x1321   :  { %4690 = vmatpush3.bf16.msra.mxu1 %v4687_v52  ;;  %4678 = vmatpush3.bf16.msra.mxu0 %v4675_v53 }
0x1322   :  { %4695 = vmatprep.subr.bf16.mxu0 %v4955_v13  ;;  %4692 = vmatprep.subr.bf16.mxu1 %v4691_v60 }
0x1323   :  { %4373 = vmatmul.mubr.msk.f32.gmra.mrb[28].mxu0 %vm388_vm3, %v2089_v18  ;;  %4410 = vmatmul.mubr.msk.f32.gmra.mrb[26].mxu1 %vm388_vm3, %v2087_v16 }
0x1324   :  { %4375 = vmatprep.mubr.msk.f32.mxu0 %vm388_vm3, %v2090_v19  ;;  %4412 = vmatprep.mubr.msk.f32.mxu1 %vm388_vm3, %v2088_v17  ;;  %v2240_v17 = vld [vmem:[#allocation3 + $0x8] sm:$0xff] }
0x1325   :  { %4694 = vmatpush3.bf16.msra.mxu1 %v4691_v60 }
0x1326   :  { %4701 = vmatprep.subr.bf16.mxu1 %v4955_v13 }
0x1327   :  { %4413 = vmatmul.mubr.msk.f32.gmra.mrb[28].mxu1 %vm388_vm3, %v2089_v18 }
0x1328   :  { %4415 = vmatprep.mubr.msk.f32.mxu1 %vm388_vm3, %v2090_v19  ;;  %v2713_v19 = vld [vmem:[%s5752_s10 + $0x10] sm:$0xff] }
0x13e6   :  { %v1942_v20 = vpop.f32.mrb[22].mxu0 }
0x13e7   :  { %v1953_v12 = vadd.f32 %v1942_v20, %v5199_v55  ;;  %v4346_v21 = vpop.f32.mrb[23].mxu0  ;;  %v1946_v15 = vadd.f32 %v1942_v20, %v1873_v27  ;;  %v4702_v20 = vpack.c.bf16 %v2716_v14, %v2715_v11 }
0x13e8   :  { %v2717_v21 = vld [vmem:[%s5753_s14 + $0x10] sm:$0xff] }
0x13e9   :  { %1955 = vrot.lane.b32.xlu0 %v1953_v12, %s4956_s6  ;;  %v3880_v28 = vmul.f32 -1.442695, %v1946_v15  ;;  %v2714_v12 = vld [vmem:[%s5752_s10 + $0x18] sm:$0xff] }
0x13ea   :  { %v2047_v22 = vpop.f32.mrb[22].mxu1  ;;  %v2242_v15 = vld [vmem:[#allocation3 + $0x18] sm:$0xff] }
0x13eb   :  { %v2058_v25 = vadd.f32 %v2047_v22, %v5208_v2  ;;  %v4357_v26 = vpop.f32.mrb[23].mxu1  ;;  %v2051_v30 = vadd.f32 %v2047_v22, %v1978_v23  ;;  %4885 = vpow2.f32 %v3880_v28  ;;  %v2718_v22 = vld [vmem:[%s5753_s14 + $0x18] sm:$0xff]  ;;  %v2244_v28 = vld [vmem:[#allocation3 + $0x28] sm:$0xff] }
0x13ec   :  { %v5550_v26 = vpack.c.bf16 %v2714_v12, %v2713_v19 }
0x13ed   :  { %2060 = vrot.lane.b32.xlu1 %v2058_v25, %s4956_s6  ;;  %v3882_v31 = vmul.f32 -1.442695, %v2051_v30  ;;  %v2241_v25 = vld [vmem:[#allocation3 + $0x10] sm:$0xff] }
0x13ee   :  { %v2245_v30 = vld [vmem:[#allocation3 + $0x30] sm:$0xff] }
0x13ef   :  { %4887 = vpow2.f32 %v3882_v31  ;;  %v2246_v31 = vld [vmem:[#allocation3 + $0x38] sm:$0xff] }
0x13f5   :  { %v4886_v32 = vpop.eup %4885 }
0x13f6   :  { %v1950_v24 = vadd.f32 1.0, %v4886_v32  ;;  %v3891_v32 = vld [vmem:[%s5754_s11] ss:$0 sm:$0xff] }
0x13f8   :  { %4889 = vrcp.f32 %v1950_v24  ;;  %v3912_v24 = vld [vmem:[%s5755_s15] ss:$0 sm:$0xff] }
0x13f9   :  { %v4888_v55 = vpop.eup %4887 }
0x13fa   :  { %v2055_v33 = vadd.f32 1.0, %v4888_v55 }
0x13fc   :  { %4891 = vrcp.f32 %v2055_v33 }
0x1402   :  { %v4890_v34 = vpop.eup %4889 }
0x1403   :  { %v1965_v54 = vsub.f32 1.0, %v4890_v34  ;;  %v1971_v61 = vmul.f32 %v4890_v34, %v5432_v59  ;;  %v3926_v59 = vld [vmem:[%s5751_s12] ss:$0 sm:$0xff] }
0x1406   :  { %v4892_v36 = vpop.eup %4891 }
0x1407   :  { %v2070_v1 = vsub.f32 1.0, %v4892_v36  ;;  %v2076_v4 = vmul.f32 %v4892_v36, %v5437_v0  ;;  %v2711_v0 = vld [vmem:[%s5752_s10] sm:$0xff] }
0x1408   :  { %v5529_v18 = vpack.c.bf16 %v2712_v10, %v2711_v0 }
0x145b   :  { %v1956_v35 = vpop.permute.xlu0 %1955 }
0x145c   :  { %v1958_v2 = vmul.f32 %v4890_v34, %v1956_v35 }
0x145e   :  { %1960 = vrot.lane.b32.xlu0 %v1958_v2, %s4956_s6 }
0x145f   :  { %v2061_v37 = vpop.permute.xlu1 %2060 }
0x1460   :  { %v2063_v38 = vmul.f32 %v4892_v36, %v2061_v37 }
0x1462   :  { %2065 = vrot.lane.b32.xlu1 %v2063_v38, %s4956_s6 }
0x14d0   :  { %v1961_v39 = vpop.permute.xlu0 %1960 }
0x14d1   :  { %v1963_v40 = vadd.f32 %v1961_v39, %v1873_v27  ;;  %v4705_v27 = vpack.c.bf16 %v2718_v22, %v2717_v21 }
0x14d3   :  { %4893 = vtanh.f32 %v1963_v40 }
0x14d4   :  { %v2066_v41 = vpop.permute.xlu1 %2065 }
0x14d5   :  { %v2068_v42 = vadd.f32 %v2066_v41, %v1978_v23  ;;  %v2243_v23 = vld [vmem:[#allocation3 + $0x20] sm:$0xff] }
0x14d7   :  { %4895 = vtanh.f32 %v2068_v42 }
0x14dd   :  { %v4894_v46 = vpop.eup %4893 }
0x14de   :  { %1967 = vrot.lane.b32.xlu0 %v4894_v46, %s4959_s3 }
0x14e1   :  { %v4896_v47 = vpop.eup %4895 }
0x14e2   :  { %2072 = vrot.lane.b32.xlu1 %v4896_v47, %s4959_s3 }
0x1550   :  { %v1968_v58 = vpop.permute.xlu0 %1967 }
0x1551   :  { %v1970_v62 = vmul.f32 %v1968_v58, %v1965_v54 }
0x1553   :  { %v1972_v63 = vadd.f32 %v1971_v61, %v1970_v62 }
0x1554   :  { %v2073_v3 = vpop.permute.xlu1 %2072 }
0x1555   :  { %v2075_v5 = vmul.f32 %v2073_v3, %v2070_v1  ;;  %1974 = vrot.lane.b32.xlu0 %v1972_v63, %s4959_s3 }
0x1557   :  { %v2077_v6 = vadd.f32 %v2076_v4, %v2075_v5 }
0x1559   :  { %2079 = vrot.lane.b32.xlu1 %v2077_v6, %s4959_s3  ;;  %2804 = vrot.lane.b32.xlu0 %v3926_v59, %s4956_s6 }
0x15c7   :  { %v1975_v7 = vpop.permute.xlu0 %1974 }
0x15c8   :  { %1977 = vst.msk [vmem:[#allocation2 + $0x38] sm:$0xff] %vm388_vm3, %v1975_v7 }
0x15cb   :  { %v2080_v8 = vpop.permute.xlu1 %2079  ;;  %v5603_v3 = vpop.permute.xlu0 %2804 }
0x15cc   :  { %2082 = vst.msk [vmem:[#allocation3] sm:$0xff] %vm388_vm3, %v2080_v8 }
0x15cf   :  { %v2091_v9 = vld [vmem:[#allocation2 + $0x38] sm:$0xff] }
0x15d0   :  { %4376 = vmatmul.mubr.msk.f32.gmra.mrb[30].mxu0 %vm388_vm3, %v2091_v9  ;;  %4416 = vmatmul.mubr.msk.f32.gmra.mrb[30].mxu1 %vm388_vm3, %v2091_v9 }
0x15d3   :  { %v2239_v16 = vld [vmem:[#allocation3] sm:$0xff] }
0x15d4   :  { %4386 = vmatprep.mubr.msk.f32.mxu0 %vm388_vm3, %v2239_v16  ;;  %4426 = vmatprep.mubr.msk.f32.mxu1 %vm388_vm3, %v2239_v16 }
0x15d5   :  { %4387 = vmatmul.mubr.msk.f32.vlgmr.msra.gmra.mrb[24].mxu0 %vm388_vm3, %v2240_v17  ;;  %4427 = vmatmul.mubr.msk.f32.vlgmr.msra.gmra.mrb[24].mxu1 %vm388_vm3, %v2240_v17 }
0x15d6   :  { %4389 = vmatprep.mubr.msk.f32.mxu0 %vm388_vm3, %v2241_v25  ;;  %4429 = vmatprep.mubr.msk.f32.mxu1 %vm388_vm3, %v2241_v25 }
0x15d7   :  { %4697 = vmatpush3.bf16.msra.mxu0 %v5529_v18  ;;  %4703 = vmatpush3.bf16.msra.mxu1 %v4702_v20 }
0x15d8   :  { %4698 = vmatprep.subr.bf16.mxu0 %v4955_v13  ;;  %4704 = vmatprep.subr.bf16.mxu1 %v4955_v13 }
0x15d9   :  { %4390 = vmatmul.mubr.msk.f32.gmra.mrb[26].mxu0 %vm388_vm3, %v2242_v15  ;;  %4430 = vmatmul.mubr.msk.f32.gmra.mrb[26].mxu1 %vm388_vm3, %v2242_v15 }
0x15da   :  { %4392 = vmatprep.mubr.msk.f32.mxu0 %vm388_vm3, %v2243_v23  ;;  %4432 = vmatprep.mubr.msk.f32.mxu1 %vm388_vm3, %v2243_v23 }
0x15db   :  { %4700 = vmatpush3.bf16.msra.mxu0 %v5550_v26  ;;  %4706 = vmatpush3.bf16.msra.mxu1 %v4705_v27 }
0x15dc   :  { %4707 = vmatprep.subr.bf16.mxu0 %v4955_v13  ;;  %4713 = vmatprep.subr.bf16.mxu1 %v4955_v13 }
0x15dd   :  { %4393 = vmatmul.mubr.msk.f32.gmra.mrb[28].mxu0 %vm388_vm3, %v2244_v28  ;;  %4433 = vmatmul.mubr.msk.f32.gmra.mrb[28].mxu1 %vm388_vm3, %v2244_v28 }
0x15de   :  { %4395 = vmatprep.mubr.msk.f32.mxu0 %vm388_vm3, %v2245_v30  ;;  %4435 = vmatprep.mubr.msk.f32.mxu1 %vm388_vm3, %v2245_v30 }
0x15e1   :  { %4396 = vmatmul.mubr.msk.f32.gmra.mrb[30].mxu0 %vm388_vm3, %v2246_v31  ;;  %4436 = vmatmul.mubr.msk.f32.gmra.mrb[30].mxu1 %vm388_vm3, %v2246_v31 }
0x15e2   :  { %4446 = vmatprep.mubr.msk.f32.mxu0 %vm4957_vm1, %v4958_v29  ;;  %4457 = vmatprep.mubr.msk.f32.mxu1 %vm4957_vm1, %v4958_v29 }
0x15e5   :  { %4447 = vmatmul.mubr.f32.vlgmr.msra.gmra.mrb[32].mxu0 %v4958_v29  ;;  %4458 = vmatmul.mubr.f32.vlgmr.msra.gmra.mrb[32].mxu1 %v4958_v29 }
0x15e6   :  { %4709 = vmatpush3.bf16.msra.mxu0 %v5529_v18  ;;  %4468 = vmatprep.mubr.msk.f32.mxu0 %vm4957_vm1, %v4958_v29 }
0x15e7   :  { %4710 = vmatprep.subr.bf16.mxu0 %v4955_v13  ;;  %4715 = vmatpush3.bf16.msra.mxu1 %v5529_v18 }
0x15e8   :  { %4716 = vmatprep.subr.bf16.mxu1 %v4955_v13  ;;  %4479 = vmatprep.mubr.msk.f32.mxu1 %vm4957_vm1, %v4958_v29 }
0x15ea   :  { %4712 = vmatpush3.bf16.msra.mxu0 %v5550_v26 }
0x15eb   :  { %4718 = vmatpush3.bf16.msra.mxu1 %v5550_v26  ;;  %4719 = vmatprep.subr.bf16.mxu0 %v4955_v13 }
0x15ec   :  { %4725 = vmatprep.subr.bf16.mxu1 %v4955_v13 }
0x16a8   :  { %v4388_v55 = vpop.f32.mrb[24].mxu0  ;;  %v4428_v33 = vpop.f32.mrb[24].mxu1 }
0x16a9   :  { %v4761_v34 = vadd.f32 %v4388_v55, %v3891_v32  ;;  %v4769_v35 = vadd.f32 %v4428_v33, %v3912_v24  ;;  %v2342_v2 = vpop.f32.mrb[25].mxu0  ;;  %v2656_v36 = vpop.f32.mrb[25].mxu1 }
0x16aa   :  { %v4762_v37 = vadd.f32 %v3891_v32, %v2342_v2  ;;  %v4770_v38 = vadd.f32 %v3912_v24, %v2656_v36 }
0x16ab   :  { %2390 = vst.msk [vmem:[#allocation4 + $0x8] sm:$0xff] %vm214_vm2, %v4761_v34  ;;  %2704 = vst.msk [vmem:[#allocation5 + $0x8] sm:$0xff] %vm214_vm2, %v4769_v35 }
0x16ac   :  { %2389 = vst.msk [vmem:[#allocation4] sm:$0xff] %vm214_vm2, %v4762_v37  ;;  %2703 = vst.msk [vmem:[#allocation5] sm:$0xff] %vm214_vm2, %v4770_v38  ;;  %v4391_v39 = vpop.f32.mrb[26].mxu0  ;;  %v4431_v40 = vpop.f32.mrb[26].mxu1 }
0x16ad   :  { %v4763_v41 = vadd.f32 %v4391_v39, %v3891_v32  ;;  %v4771_v42 = vadd.f32 %v4431_v40, %v3912_v24  ;;  %v2352_v43 = vpop.f32.mrb[27].mxu0  ;;  %v2666_v44 = vpop.f32.mrb[27].mxu1 }
0x16ae   :  { %v4764_v45 = vadd.f32 %v3891_v32, %v2352_v43  ;;  %v4772_v46 = vadd.f32 %v3912_v24, %v2666_v44 }
0x16af   :  { %2392 = vst.msk [vmem:[#allocation4 + $0x18] sm:$0xff] %vm214_vm2, %v4763_v41  ;;  %2706 = vst.msk [vmem:[#allocation5 + $0x18] sm:$0xff] %vm214_vm2, %v4771_v42 }
0x16b0   :  { %2391 = vst.msk [vmem:[#allocation4 + $0x10] sm:$0xff] %vm214_vm2, %v4764_v45  ;;  %2705 = vst.msk [vmem:[#allocation5 + $0x10] sm:$0xff] %vm214_vm2, %v4772_v46  ;;  %v4394_v47 = vpop.f32.mrb[28].mxu0  ;;  %v4434_v48 = vpop.f32.mrb[28].mxu1 }
0x16b1   :  { %v4765_v49 = vadd.f32 %v4394_v47, %v3891_v32  ;;  %v4773_v50 = vadd.f32 %v4434_v48, %v3912_v24  ;;  %v2362_v51 = vpop.f32.mrb[29].mxu0  ;;  %v2676_v52 = vpop.f32.mrb[29].mxu1 }
0x16b2   :  { %v4766_v53 = vadd.f32 %v3891_v32, %v2362_v51  ;;  %v4774_v54 = vadd.f32 %v3912_v24, %v2676_v52 }
0x16b3   :  { %2394 = vst.msk [vmem:[#allocation4 + $0x28] sm:$0xff] %vm214_vm2, %v4765_v49  ;;  %2708 = vst.msk [vmem:[#allocation5 + $0x28] sm:$0xff] %vm214_vm2, %v4773_v50  ;;  %v2721_v8 = vld [vmem:[#allocation4] sm:$0xff] }
0x16b4   :  { %2393 = vst.msk [vmem:[#allocation4 + $0x20] sm:$0xff] %vm214_vm2, %v4766_v53  ;;  %2707 = vst.msk [vmem:[#allocation5 + $0x20] sm:$0xff] %vm214_vm2, %v4774_v54  ;;  %v4397_v56 = vpop.f32.mrb[30].mxu0  ;;  %v4437_v57 = vpop.f32.mrb[30].mxu1 }
0x16b5   :  { %v4767_v58 = vadd.f32 %v4397_v56, %v3891_v32  ;;  %v4775_v60 = vadd.f32 %v4437_v57, %v3912_v24  ;;  %v2372_v61 = vpop.f32.mrb[31].mxu0  ;;  %v2686_v62 = vpop.f32.mrb[31].mxu1 }
0x16b6   :  { %v4768_v63 = vadd.f32 %v3891_v32, %v2372_v61  ;;  %v4776_v1 = vadd.f32 %v3912_v24, %v2686_v62  ;;  %v2933_v32 = vld [vmem:[#allocation4 + $0x8] sm:$0xff] }
0x16b7   :  { %2396 = vst.msk [vmem:[#allocation4 + $0x38] sm:$0xff] %vm214_vm2, %v4767_v58  ;;  %2710 = vst.msk [vmem:[#allocation5 + $0x38] sm:$0xff] %vm214_vm2, %v4775_v60  ;;  %v3036_v49 = vld [vmem:[#allocation4 + $0x10] sm:$0xff] }
0x16b8   :  { %2395 = vst.msk [vmem:[#allocation4 + $0x30] sm:$0xff] %vm214_vm2, %v4768_v63  ;;  %2709 = vst.msk [vmem:[#allocation5 + $0x30] sm:$0xff] %vm214_vm2, %v4776_v1  ;;  %v2788_v4 = vpop.f32.mrb[32].mxu0  ;;  %v5609_v5 = vpop.f32.mrb[32].mxu1 }
0x16b9   :  { %v2807_v6 = vadd.f32 %v5603_v3, %v2788_v4  ;;  %v4448_v59 = vpop.f32.mrb[33].mxu0  ;;  %v4459_v7 = vpop.f32.mrb[33].mxu1  ;;  %v2792_v9 = vadd.f32 %v2788_v4, %v2721_v8 }
0x16bb   :  { %2809 = vrot.lane.b32.xlu1 %v2807_v6, %s4956_s6  ;;  %v3925_v0 = vmul.f32 -1.442695, %v2792_v9 }
0x16bd   :  { %4897 = vpow2.f32 %v3925_v0  ;;  %v3139_v0 = vld [vmem:[#allocation4 + $0x18] sm:$0xff] }
0x16c7   :  { %v4898_v10 = vpop.eup %4897 }
0x16c8   :  { %v2796_v11 = vadd.f32 1.0, %v4898_v10 }
0x16ca   :  { %4899 = vrcp.f32 %v2796_v11 }
0x16d4   :  { %v4900_v14 = vpop.eup %4899 }
0x16d5   :  { %v2819_v21 = vsub.f32 1.0, %v4900_v14  ;;  %v2825_v25 = vmul.f32 0.0, %v4900_v14 }
0x172d   :  { %v2810_v16 = vpop.permute.xlu1 %2809 }
0x172e   :  { %v2812_v17 = vmul.f32 %v4900_v14, %v2810_v16 }
0x1730   :  { %2814 = vrot.lane.b32.xlu0 %v2812_v17, %s4956_s6 }
0x17a2   :  { %v2815_v19 = vpop.permute.xlu0 %2814 }
0x17a3   :  { %v2817_v20 = vadd.f32 %v2815_v19, %v2721_v8 }
0x17a5   :  { %4901 = vtanh.f32 %v2817_v20 }
0x17af   :  { %v4902_v12 = vpop.eup %4901 }
0x17b0   :  { %2821 = vrot.lane.b32.xlu1 %v4902_v12, %s4959_s3 }
0x1822   :  { %v2822_v22 = vpop.permute.xlu1 %2821 }
0x1823   :  { %v2824_v27 = vmul.f32 %v2822_v22, %v2819_v21 }
0x1825   :  { %v2826_v15 = vadd.f32 %v2825_v25, %v2824_v27 }
0x1827   :  { %2935 = vrot.lane.b32.xlu0 %v2826_v15, %s4959_s3 }
0x1899   :  { %v2936_v23 = vpop.permute.xlu0 %2935 }
0x189a   :  { %4469 = vmatmul.mubr.msk.f32.vlgmr.msra.gmra.mrb[34].mxu0 %vm388_vm3, %v2936_v23 }
0x189b   :  { %4721 = vmatpush3.bf16.msra.mxu0 %v5529_v18  ;;  %4490 = vmatprep.mubr.msk.f32.mxu0 %vm4957_vm1, %v4958_v29 }
0x189c   :  { %4722 = vmatprep.subr.bf16.mxu0 %v4955_v13 }
0x189f   :  { %4724 = vmatpush3.bf16.msra.mxu0 %v5550_v26 }
0x18a0   :  { %4731 = vmatprep.subr.bf16.mxu0 %v4955_v13 }
0x196d   :  { %v3005_v28 = vpop.f32.mrb[34].mxu0 }
0x196e   :  { %v3016_v30 = vadd.f32 %v3005_v28, %v5603_v3  ;;  %v4470_v31 = vpop.f32.mrb[35].mxu0  ;;  %v3009_v24 = vadd.f32 %v3005_v28, %v2933_v32 }
0x1970   :  { %3018 = vrot.lane.b32.xlu1 %v3016_v30, %s4956_s6  ;;  %v3930_v55 = vmul.f32 -1.442695, %v3009_v24 }
0x1972   :  { %4903 = vpow2.f32 %v3930_v55  ;;  %v3242_v55 = vld [vmem:[#allocation4 + $0x20] sm:$0xff] }
0x197c   :  { %v4904_v33 = vpop.eup %4903 }
0x197d   :  { %v3013_v34 = vadd.f32 1.0, %v4904_v33 }
0x197f   :  { %4905 = vrcp.f32 %v3013_v34 }
0x1989   :  { %v4906_v35 = vpop.eup %4905 }
0x198a   :  { %v3028_v40 = vsub.f32 1.0, %v4906_v35  ;;  %v3034_v42 = vmul.f32 %v4906_v35, %v2826_v15 }
0x19e2   :  { %v3019_v2 = vpop.permute.xlu1 %3018 }
0x19e3   :  { %v3021_v36 = vmul.f32 %v4906_v35, %v3019_v2 }
0x19e5   :  { %3023 = vrot.lane.b32.xlu0 %v3021_v36, %s4956_s6 }
0x1a57   :  { %v3024_v37 = vpop.permute.xlu0 %3023 }
0x1a58   :  { %v3026_v38 = vadd.f32 %v3024_v37, %v2933_v32 }
0x1a5a   :  { %4907 = vtanh.f32 %v3026_v38 }
0x1a64   :  { %v4908_v39 = vpop.eup %4907 }
0x1a65   :  { %3030 = vrot.lane.b32.xlu1 %v4908_v39, %s4959_s3 }
0x1ad7   :  { %v3031_v41 = vpop.permute.xlu1 %3030 }
0x1ad8   :  { %v3033_v43 = vmul.f32 %v3031_v41, %v3028_v40 }
0x1ada   :  { %v3035_v44 = vadd.f32 %v3034_v42, %v3033_v43 }
0x1adc   :  { %3038 = vrot.lane.b32.xlu0 %v3035_v44, %s4959_s3 }
0x1b4e   :  { %v3039_v45 = vpop.permute.xlu0 %3038 }
0x1b4f   :  { %4480 = vmatmul.mubr.msk.f32.vlgmr.msra.gmra.mrb[34].mxu1 %vm388_vm3, %v3039_v45 }
0x1b50   :  { %4727 = vmatpush3.bf16.msra.mxu1 %v5529_v18  ;;  %4501 = vmatprep.mubr.msk.f32.mxu1 %vm4957_vm1, %v4958_v29 }
0x1b51   :  { %4728 = vmatprep.subr.bf16.mxu1 %v4955_v13 }
0x1b54   :  { %4730 = vmatpush3.bf16.msra.mxu1 %v5550_v26 }
0x1b55   :  { %4737 = vmatprep.subr.bf16.mxu1 %v4955_v13 }
0x1c22   :  { %v3108_v46 = vpop.f32.mrb[34].mxu1 }
0x1c23   :  { %v3119_v47 = vadd.f32 %v3108_v46, %v5603_v3  ;;  %v4481_v48 = vpop.f32.mrb[35].mxu1  ;;  %v3112_v50 = vadd.f32 %v3108_v46, %v3036_v49 }
0x1c25   :  { %3121 = vrot.lane.b32.xlu1 %v3119_v47, %s4956_s6  ;;  %v3932_v51 = vmul.f32 -1.442695, %v3112_v50 }
0x1c27   :  { %4909 = vpow2.f32 %v3932_v51  ;;  %v3345_v51 = vld [vmem:[#allocation4 + $0x28] sm:$0xff] }
0x1c31   :  { %v4910_v52 = vpop.eup %4909 }
0x1c32   :  { %v3116_v53 = vadd.f32 1.0, %v4910_v52 }
0x1c34   :  { %4911 = vrcp.f32 %v3116_v53 }
0x1c3e   :  { %v4912_v54 = vpop.eup %4911 }
0x1c3f   :  { %v3131_v62 = vsub.f32 1.0, %v4912_v54  ;;  %v3137_v1 = vmul.f32 %v4912_v54, %v3035_v44 }
0x1c97   :  { %v3122_v56 = vpop.permute.xlu1 %3121 }
0x1c98   :  { %v3124_v57 = vmul.f32 %v4912_v54, %v3122_v56 }
0x1c9a   :  { %3126 = vrot.lane.b32.xlu0 %v3124_v57, %s4956_s6 }
0x1d0c   :  { %v3127_v58 = vpop.permute.xlu0 %3126 }
0x1d0d   :  { %v3129_v60 = vadd.f32 %v3127_v58, %v3036_v49 }
0x1d0f   :  { %4913 = vtanh.f32 %v3129_v60 }
0x1d19   :  { %v4914_v61 = vpop.eup %4913 }
0x1d1a   :  { %3133 = vrot.lane.b32.xlu1 %v4914_v61, %s4959_s3 }
0x1d8c   :  { %v3134_v63 = vpop.permute.xlu1 %3133 }
0x1d8d   :  { %v3136_v4 = vmul.f32 %v3134_v63, %v3131_v62 }
0x1d8f   :  { %v3138_v6 = vadd.f32 %v3137_v1, %v3136_v4 }
0x1d91   :  { %3141 = vrot.lane.b32.xlu0 %v3138_v6, %s4959_s3 }
0x1e03   :  { %v3142_v59 = vpop.permute.xlu0 %3141 }
0x1e04   :  { %4491 = vmatmul.mubr.msk.f32.vlgmr.msra.gmra.mrb[36].mxu0 %vm388_vm3, %v3142_v59 }
0x1e05   :  { %4733 = vmatpush3.bf16.msra.mxu0 %v5529_v18  ;;  %4512 = vmatprep.mubr.msk.f32.mxu0 %vm4957_vm1, %v4958_v29 }
0x1e06   :  { %4734 = vmatprep.subr.bf16.mxu0 %v4955_v13 }
0x1e09   :  { %4736 = vmatpush3.bf16.msra.mxu0 %v5550_v26 }
0x1e0a   :  { %4743 = vmatprep.subr.bf16.mxu0 %v4955_v13 }
0x1ed7   :  { %v3211_v7 = vpop.f32.mrb[36].mxu0 }
0x1ed8   :  { %v3222_v8 = vadd.f32 %v3211_v7, %v5603_v3  ;;  %v4492_v9 = vpop.f32.mrb[37].mxu0  ;;  %v3215_v10 = vadd.f32 %v3211_v7, %v3139_v0 }
0x1eda   :  { %3224 = vrot.lane.b32.xlu1 %v3222_v8, %s4956_s6  ;;  %v3934_v11 = vmul.f32 -1.442695, %v3215_v10 }
0x1edc   :  { %4915 = vpow2.f32 %v3934_v11 }
0x1ee6   :  { %v4916_v14 = vpop.eup %4915 }
0x1ee7   :  { %v3219_v16 = vadd.f32 1.0, %v4916_v14 }
0x1ee9   :  { %4917 = vrcp.f32 %v3219_v16 }
0x1ef3   :  { %v4918_v17 = vpop.eup %4917 }
0x1ef4   :  { %v3234_v25 = vsub.f32 1.0, %v4918_v17  ;;  %v3240_v15 = vmul.f32 %v4918_v17, %v3138_v6 }
0x1f4c   :  { %v3225_v19 = vpop.permute.xlu1 %3224 }
0x1f4d   :  { %v3227_v20 = vmul.f32 %v4918_v17, %v3225_v19 }
0x1f4f   :  { %3229 = vrot.lane.b32.xlu0 %v3227_v20, %s4956_s6 }
0x1fc1   :  { %v3230_v12 = vpop.permute.xlu0 %3229 }
0x1fc2   :  { %v3232_v21 = vadd.f32 %v3230_v12, %v3139_v0  ;;  %v3448_v0 = vld [vmem:[#allocation4 + $0x30] sm:$0xff] }
0x1fc4   :  { %4919 = vtanh.f32 %v3232_v21 }
0x1fce   :  { %v4920_v22 = vpop.eup %4919 }
0x1fcf   :  { %3236 = vrot.lane.b32.xlu1 %v4920_v22, %s4959_s3 }
0x2041   :  { %v3237_v27 = vpop.permute.xlu1 %3236 }
0x2042   :  { %v3239_v23 = vmul.f32 %v3237_v27, %v3234_v25  ;;  %v3928_v25 = vld [vmem:[%s5756_s16] ss:$0 sm:$0xff] }
0x2044   :  { %v3241_v28 = vadd.f32 %v3240_v15, %v3239_v23 }
0x2046   :  { %3244 = vrot.lane.b32.xlu0 %v3241_v28, %s4959_s3 }
0x20b8   :  { %v3245_v30 = vpop.permute.xlu0 %3244 }
0x20b9   :  { %4502 = vmatmul.mubr.msk.f32.vlgmr.msra.gmra.mrb[36].mxu1 %vm388_vm3, %v3245_v30 }
0x20ba   :  { %4739 = vmatpush3.bf16.msra.mxu1 %v5529_v18  ;;  %4523 = vmatprep.mubr.msk.f32.mxu1 %vm4957_vm1, %v4958_v29 }
0x20bb   :  { %4740 = vmatprep.subr.bf16.mxu1 %v4955_v13 }
0x20be   :  { %4742 = vmatpush3.bf16.msra.mxu1 %v5550_v26 }
0x20bf   :  { %4749 = vmatprep.subr.bf16.mxu1 %v4955_v13 }
0x218c   :  { %v3314_v31 = vpop.f32.mrb[36].mxu1 }
0x218d   :  { %v3325_v32 = vadd.f32 %v3314_v31, %v5603_v3  ;;  %v4503_v24 = vpop.f32.mrb[37].mxu1  ;;  %v3318_v33 = vadd.f32 %v3314_v31, %v3242_v55 }
0x218e   :  { %v2827_v24 = vld [vmem:[#allocation5 + $0x38] sm:$0xff] }
0x218f   :  { %3327 = vrot.lane.b32.xlu1 %v3325_v32, %s4956_s6  ;;  %v3936_v34 = vmul.f32 -1.442695, %v3318_v33 }
0x2191   :  { %4921 = vpow2.f32 %v3936_v34 }
0x219b   :  { %v4922_v35 = vpop.eup %4921 }
0x219c   :  { %v3322_v2 = vadd.f32 1.0, %v4922_v35 }
0x219e   :  { %4923 = vrcp.f32 %v3322_v2 }
0x21a8   :  { %v4924_v36 = vpop.eup %4923 }
0x21a9   :  { %v3337_v42 = vsub.f32 1.0, %v4924_v36  ;;  %v3343_v44 = vmul.f32 %v4924_v36, %v3241_v28 }
0x2201   :  { %v3328_v37 = vpop.permute.xlu1 %3327 }
0x2202   :  { %v3330_v38 = vmul.f32 %v4924_v36, %v3328_v37 }
0x2204   :  { %3332 = vrot.lane.b32.xlu0 %v3330_v38, %s4956_s6 }
0x2276   :  { %v3333_v39 = vpop.permute.xlu0 %3332 }
0x2277   :  { %v3335_v40 = vadd.f32 %v3333_v39, %v3242_v55  ;;  %v2898_v55 = vadd.f32 %v5609_v5, %v2827_v24 }
0x2279   :  { %4925 = vtanh.f32 %v3335_v40  ;;  %v3927_v33 = vmul.f32 -1.442695, %v2898_v55 }
0x2283   :  { %v4926_v41 = vpop.eup %4925 }
0x2284   :  { %3339 = vrot.lane.b32.xlu1 %v4926_v41, %s4959_s3 }
0x22f6   :  { %v3340_v43 = vpop.permute.xlu1 %3339 }
0x22f7   :  { %v3342_v45 = vmul.f32 %v3340_v43, %v3337_v42 }
0x22f9   :  { %v3344_v46 = vadd.f32 %v3343_v44, %v3342_v45 }
0x22fb   :  { %3347 = vrot.lane.b32.xlu0 %v3344_v46, %s4959_s3 }
0x236d   :  { %v3348_v47 = vpop.permute.xlu0 %3347 }
0x236e   :  { %4513 = vmatmul.mubr.msk.f32.vlgmr.msra.gmra.mrb[38].mxu0 %vm388_vm3, %v3348_v47 }
0x236f   :  { %4745 = vmatpush3.bf16.msra.mxu0 %v5529_v18  ;;  %4534 = vmatprep.mubr.msk.f32.mxu0 %vm4957_vm1, %v4958_v29 }
0x2370   :  { %4746 = vmatprep.subr.bf16.mxu0 %v4955_v13 }
0x2373   :  { %4748 = vmatpush3.bf16.msra.mxu0 %v5550_v26 }
0x2441   :  { %v3417_v48 = vpop.f32.mrb[38].mxu0 }
0x2442   :  { %v3428_v49 = vadd.f32 %v3417_v48, %v5603_v3  ;;  %v4514_v50 = vpop.f32.mrb[39].mxu0  ;;  %v3421_v52 = vadd.f32 %v3417_v48, %v3345_v51 }
0x2444   :  { %3430 = vrot.lane.b32.xlu1 %v3428_v49, %s4956_s6  ;;  %v3938_v53 = vmul.f32 -1.442695, %v3421_v52  ;;  %v3551_v49 = vld [vmem:[#allocation4 + $0x38] sm:$0xff] }
0x2446   :  { %4927 = vpow2.f32 %v3938_v53 }
0x2450   :  { %v4928_v54 = vpop.eup %4927 }
0x2451   :  { %v3425_v56 = vadd.f32 1.0, %v4928_v54 }
0x2453   :  { %4929 = vrcp.f32 %v3425_v56 }
0x245d   :  { %v4930_v18 = vpop.eup %4929 }
0x245e   :  { %v3440_v62 = vsub.f32 1.0, %v4930_v18  ;;  %v3446_v1 = vmul.f32 %v4930_v18, %v3344_v46 }
0x24b6   :  { %v3431_v57 = vpop.permute.xlu1 %3430 }
0x24b7   :  { %v3433_v58 = vmul.f32 %v4930_v18, %v3431_v57 }
0x24b9   :  { %3435 = vrot.lane.b32.xlu0 %v3433_v58, %s4956_s6  ;;  %v3655_v58 = vld [vmem:[%s5757_s17] sm:$0xff] }
0x252b   :  { %v3436_v60 = vpop.permute.xlu0 %3435 }
0x252c   :  { %v3438_v26 = vadd.f32 %v3436_v60, %v3345_v51  ;;  %v3656_v60 = vld [vmem:[%s5757_s17 + $0x8] sm:$0xff] }
0x252e   :  { %4931 = vtanh.f32 %v3438_v26  ;;  %v3657_v26 = vld [vmem:[%s5757_s17 + $0x10] sm:$0xff] }
0x2538   :  { %v4932_v61 = vpop.eup %4931 }
0x2539   :  { %3442 = vrot.lane.b32.xlu1 %v4932_v61, %s4959_s3  ;;  %v4750_v61 = vpack.c.bf16 %v3656_v60, %v3655_v58 }
0x25ab   :  { %v3443_v63 = vpop.permute.xlu1 %3442 }
0x25ac   :  { %v3445_v4 = vmul.f32 %v3443_v63, %v3440_v62  ;;  %v3658_v62 = vld [vmem:[%s5757_s17 + $0x18] sm:$0xff] }
0x25ad   :  { %v4753_v63 = vpack.c.bf16 %v3658_v62, %v3657_v26 }
0x25ae   :  { %v3447_v6 = vadd.f32 %v3446_v1, %v3445_v4 }
0x25b0   :  { %3450 = vrot.lane.b32.xlu0 %v3447_v6, %s4959_s3 }
0x2622   :  { %v3451_v59 = vpop.permute.xlu0 %3450 }
0x2623   :  { %4524 = vmatmul.mubr.msk.f32.vlgmr.msra.gmra.mrb[38].mxu1 %vm388_vm3, %v3451_v59 }
0x2624   :  { %4545 = vmatprep.mubr.msk.f32.mxu1 %vm4957_vm1, %v4958_v29  ;;  %4751 = vmatpush3.bf16.msra.mxu1 %v4750_v61 }
0x2625   :  { %4752 = vmatprep.subr.bf16.mxu1 %v4955_v13 }
0x2628   :  { %4754 = vmatpush3.bf16.msra.mxu1 %v4753_v63 }
0x2629   :  { %4755 = vmatprep.subr.bf16.mxu1 %v4955_v13 }
0x26f6   :  { %v3520_v7 = vpop.f32.mrb[38].mxu1 }
0x26f7   :  { %v3531_v8 = vadd.f32 %v3520_v7, %v5603_v3  ;;  %v4525_v9 = vpop.f32.mrb[39].mxu1  ;;  %v3524_v10 = vadd.f32 %v3520_v7, %v3448_v0 }
0x26f9   :  { %3533 = vrot.lane.b32.xlu1 %v3531_v8, %s4956_s6  ;;  %v3940_v11 = vmul.f32 -1.442695, %v3524_v10  ;;  %v25_v8 = vstv %s5758_s19  ;;  %v3742_v10 = vld [vmem:[%s5759_s18 + $0x8] sm:$0xff] }
0x26fa   :  { %26 = vst [vmem:[#allocation6] sm:$0x1] %v25_v8 }
0x26fb   :  { %4933 = vpow2.f32 %v3940_v11 }
0x2705   :  { %v4934_v14 = vpop.eup %4933 }
0x2706   :  { %v3528_v16 = vadd.f32 1.0, %v4934_v14  ;;  %v3743_v14 = vld [vmem:[%s5759_s18 + $0x10] sm:$0xff] }
0x2708   :  { %4935 = vrcp.f32 %v3528_v16  ;;  %v3744_v16 = vld [vmem:[%s5759_s18 + $0x18] sm:$0xff] }
0x2712   :  { %v4936_v17 = vpop.eup %4935 }
0x2713   :  { %v3543_v27 = vsub.f32 1.0, %v4936_v17  ;;  %v3549_v23 = vmul.f32 %v4936_v17, %v3447_v6 }
0x276b   :  { %v3534_v19 = vpop.permute.xlu1 %3533 }
0x276c   :  { %v3536_v20 = vmul.f32 %v4936_v17, %v3534_v19  ;;  %v4759_v19 = vpack.c.bf16 %v3744_v16, %v3743_v14 }
0x276e   :  { %3538 = vrot.lane.b32.xlu0 %v3536_v20, %s4956_s6 }
0x27e0   :  { %v3539_v12 = vpop.permute.xlu0 %3538 }
0x27e1   :  { %v3541_v21 = vadd.f32 %v3539_v12, %v3448_v0  ;;  %v3741_v0 = vld [vmem:[%s5759_s18] sm:$0xff] }
0x27e2   :  { %v4756_v11 = vpack.c.bf16 %v3742_v10, %v3741_v0  ;;  %v3944_v12 = vld [vmem:[#allocation6] ss:$0 sm:$0xff] }
0x27e3   :  { %4937 = vtanh.f32 %v3541_v21 }
0x27e4   :  { %4939 = vpow2.f32 %v3927_v33 }
0x27ed   :  { %v4938_v22 = vpop.eup %4937 }
0x27ee   :  { %3545 = vrot.lane.b32.xlu1 %v4938_v22, %s4959_s3  ;;  %v4940_v34 = vpop.eup %4939 }
0x27ef   :  { %v2902_v35 = vadd.f32 1.0, %v4940_v34 }
0x27f1   :  { %4941 = vrcp.f32 %v2902_v35 }
0x27f2   :  { %2910 = vrot.lane.b32.xlu1 %v3928_v25, %s4956_s6 }
0x27fb   :  { %v4942_v36 = vpop.eup %4941 }
0x27fc   :  { %v2925_v44 = vsub.f32 1.0, %v4942_v36  ;;  %v2931_v46 = vmul.f32 0.0, %v4942_v36 }
0x2860   :  { %v3546_v15 = vpop.permute.xlu1 %3545 }
0x2861   :  { %v3548_v28 = vmul.f32 %v3546_v15, %v3543_v27 }
0x2863   :  { %v5686_v30 = vadd.f32 %v3549_v23, %v3548_v28 }
0x2864   :  { %v2911_v31 = vpop.permute.xlu1 %2910 }
0x2865   :  { %v2913_v32 = vadd.f32 %v2911_v31, %v5609_v5  ;;  %3553 = vrot.lane.b32.xlu0 %v5686_v30, %s4959_s3 }
0x2867   :  { %2915 = vrot.lane.b32.xlu1 %v2913_v32, %s4956_s6 }
0x28d7   :  { %v3554_v2 = vpop.permute.xlu0 %3553 }
0x28d8   :  { %4535 = vmatmul.mubr.msk.f32.vlgmr.msra.gmra.mrb[40].mxu0 %vm388_vm3, %v3554_v2 }
0x28d9   :  { %v2916_v37 = vpop.permute.xlu1 %2915 }
0x28da   :  { %v2918_v38 = vmul.f32 %v4942_v36, %v2916_v37 }
0x28dc   :  { %2920 = vrot.lane.b32.xlu1 %v2918_v38, %s4956_s6 }
0x294e   :  { %v2921_v39 = vpop.permute.xlu1 %2920 }
0x294f   :  { %v2923_v40 = vadd.f32 %v2921_v39, %v2827_v24 }
0x2951   :  { %4943 = vtanh.f32 %v2923_v40 }
0x295b   :  { %v4944_v41 = vpop.eup %4943 }
0x295c   :  { %2927 = vrot.lane.b32.xlu1 %v4944_v41, %s4959_s3 }
0x29ab   :  { %v3623_v5 = vpop.f32.mrb[40].mxu0 }
0x29ac   :  { %v3634_v42 = vadd.f32 %v3623_v5, %v5603_v3  ;;  %v4536_v43 = vpop.f32.mrb[41].mxu0  ;;  %v3627_v50 = vadd.f32 %v3623_v5, %v3551_v49 }
0x29ae   :  { %3636 = vrot.lane.b32.xlu0 %v3634_v42, %s4956_s6  ;;  %v3942_v51 = vmul.f32 -1.442695, %v3627_v50 }
0x29b0   :  { %4945 = vpow2.f32 %v3942_v51 }
0x29ba   :  { %v4946_v52 = vpop.eup %4945 }
0x29bb   :  { %v3631_v53 = vadd.f32 1.0, %v4946_v52 }
0x29bd   :  { %4947 = vrcp.f32 %v3631_v53 }
0x29c7   :  { %v4948_v54 = vpop.eup %4947 }
0x29c8   :  { %v3646_v4 = vsub.f32 1.0, %v4948_v54  ;;  %v3652_v59 = vmul.f32 %v4948_v54, %v5686_v30 }
0x29ce   :  { %v2928_v45 = vpop.permute.xlu1 %2927 }
0x29cf   :  { %v2930_v47 = vmul.f32 %v2928_v45, %v2925_v44 }
0x29d1   :  { %v2932_v48 = vadd.f32 %v2931_v46, %v2930_v47 }
0x29d3   :  { %3746 = vrot.lane.b32.xlu1 %v2932_v48, %s4959_s3 }
0x2a20   :  { %v3637_v56 = vpop.permute.xlu0 %3636 }
0x2a21   :  { %v3639_v3 = vmul.f32 %v4948_v54, %v3637_v56 }
0x2a23   :  { %3641 = vrot.lane.b32.xlu0 %v3639_v3, %s4956_s6 }
0x2a45   :  { %v3747_v20 = vpop.permute.xlu1 %3746 }
0x2a95   :  { %v3642_v18 = vpop.permute.xlu0 %3641 }
0x2a96   :  { %v3644_v57 = vadd.f32 %v3642_v18, %v3551_v49 }
0x2a98   :  { %4949 = vtanh.f32 %v3644_v57 }
0x2aa2   :  { %v4950_v1 = vpop.eup %4949 }
0x2aa3   :  { %3648 = vrot.lane.b32.xlu0 %v4950_v1, %s4959_s3 }
0x2b15   :  { %v3649_v6 = vpop.permute.xlu0 %3648 }
0x2b16   :  { %v3651_v7 = vmul.f32 %v3649_v6, %v3646_v4 }
0x2b18   :  { %v3653_v9 = vadd.f32 %v3652_v59, %v3651_v7 }
0x2b1a   :  { %3660 = vrot.lane.b32.xlu0 %v3653_v9, %s4959_s3 }
0x2b8c   :  { %v3661_v17 = vpop.permute.xlu0 %3660 }
0x2b8d   :  { %4546 = vmatmul.mubr.msk.f32.vlgmr.msra.gmra.mrb[40].mxu1 %vm388_vm3, %v3661_v17 }
0x2b8e   :  { %4757 = vmatpush3.bf16.msra.mxu1 %v4756_v11  ;;  %4556 = vmatprep.mubr.msk.f32.mxu1 %vm4957_vm1, %v4958_v29 }
0x2b8f   :  { %4758 = vmatprep.subr.bf16.mxu1 %v4955_v13 }
0x2b92   :  { %4760 = vmatpush3.bf16.msra.mxu1 %v4759_v19 }
0x2b95   :  { %4557 = vmatmul.mubr.msk.f32.vlgmr.msra.gmra.mrb[40].mxu1 %vm388_vm3, %v3747_v20 }
0x2c68   :  { %v3816_v21 = vpop.f32.mrb[40].mxu1 }
0x2c69   :  { %v4777_v22 = vadd.f32 %v3944_v12, %v3816_v21  ;;  %v4558_v25 = vpop.f32.mrb[41].mxu1 }
0x2c6b   :  { %v3946_v27 = vmul.f32 -1.442695, %v4777_v22 }
0x2c6d   :  { %4951 = vpow2.f32 %v3946_v27 }
0x2c77   :  { %v4952_v15 = vpop.eup %4951 }
0x2c78   :  { %v3824_v23 = vadd.f32 1.0, %v4952_v15 }
0x2c7a   :  { %4953 = vrcp.f32 %v3824_v23 }
0x2c84   :  { %v4954_v28 = vpop.eup %4953 }
0x2c85   :  { %3828 = vst.msk [vmem:[%s5760_s20] sm:$0xff] %vm3827_vm4, %v4954_v28 }

</bundles_post_ra>
